<compile_context>
chip_gen: v6e
topology: v6e:2x2x1
jax: 0.10.0
libtpu: 0.0.40
codegen_flags: <defaults>
</compile_context>

<pallas_src>
import math
import functools

import jax
import jax.numpy as jnp
from jax.experimental import pallas as pl
from jax.experimental.pallas import tpu as pltpu


def _round_up(a: int, b: int) -> int:
    return (a + b - 1) // b * b


def _vmem_ceiling_bytes() -> int:
    # Leave ~25% headroom for compiler-internal scratch and double buffers.
    try:
        cap = int(pltpu.get_tpu_info().vmem_capacity_bytes)
    except Exception:
        cap = 64 * 1024 * 1024   # conservative fallback (v7x-sized)
    return (cap * 3) // 4


_VMEM_CEILING = _vmem_ceiling_bytes()


def _mlp_kernel(x_ref, w1_ref, b1_ref, w2_ref, b2_ref, o_ref, acc_ref):
    # x_ref:   (tm, C_in)    token tile (input dtype; cast to bf16 in-kernel)
    # w1_ref:  (C_in, th)    bf16 fc1 weight chunk ((in, out) layout)
    # b1_ref:  (1, th)       f32 fc1 bias chunk
    # w2_ref:  (th, C_out)   bf16 fc2 weight chunk
    # b2_ref:  (1, C_out)    f32 fc2 bias
    # o_ref:   (tm, C_out)   output tile (written once, at the last H chunk)
    # acc_ref: (tm, C_out)   f32 accumulator (resident across the H axis)
    h_idx = pl.program_id(1)

    @pl.when(h_idx == 0)
    def _():
        acc_ref[...] = jnp.zeros_like(acc_ref)

    # fc1 partial (this hidden chunk): bf16 x bf16 -> f32 accumulation on the MXU.
    x = x_ref[...].astype(w1_ref.dtype)
    h = jnp.dot(x, w1_ref[...], preferred_element_type=jnp.float32)
    h = h + b1_ref[...]

    # Exact-erf GELU (torch.nn.GELU default), f32, on the (tm, th) chunk only.
    h = 0.5 * h * (1.0 + jax.lax.erf(h * (1.0 / math.sqrt(2.0))))

    # Dropout(p=0.0) is identity.  TODO(synk): stochastic dropout (p > 0) would
    # need pltpu.prng_seed / prng_random_bits; not needed for drop=0.0.

    # fc2 partial: accumulate this hidden chunk's contribution in f32.
    acc_ref[...] += jnp.dot(h.astype(w2_ref.dtype), w2_ref[...],
                            preferred_element_type=jnp.float32)

    @pl.when(h_idx == pl.num_programs(1) - 1)
    def _():
        o_ref[...] = (acc_ref[...] + b2_ref[...]).astype(o_ref.dtype)


def prepare_mlp_params(w1, b1, w2, b2):
    """One-time (model-init) parameter conversion for the kernel.

    Weights stored (in, out) (transposed vs. torch nn.Linear.weight) and cast
    to bf16 for the MXU; biases kept f32 and reshaped to (1, X).
    """
    return (jnp.asarray(w1, jnp.bfloat16),
            jnp.asarray(b1, jnp.float32).reshape(1, -1),
            jnp.asarray(w2, jnp.bfloat16),
            jnp.asarray(b2, jnp.float32).reshape(1, -1))


@functools.partial(jax.jit, static_argnames=("tm",))
def mlp_pallas(x, w1, b1, w2, b2, *, tm=256):
    """Fused Mlp forward.  x: (B, N, C_in) -> (B, N, C_out).

    w1/w2 are (in, out) bf16, b1/b2 are (1, hidden)/(1, out) f32
    (see prepare_mlp_params).
    """
    B, N, C_in = x.shape
    H = w1.shape[1]
    C_out = w2.shape[1]
    M = B * N
    out_dtype = x.dtype
    out_itemsize = jnp.dtype(out_dtype).itemsize
    x_itemsize = jnp.dtype(x.dtype).itemsize

    # --- token tile: multiple of 128; keep >=2 steps when there is enough work
    tm_eff = min(_round_up(max(tm, 128), 128), _round_up(M, 128))
    if _round_up(M, tm_eff) // tm_eff < 2 and M >= 256:
        tm_eff = _round_up(_round_up(M, 128) // 2, 128)   # let both v7x TCs work
    M_p = _round_up(M, tm_eff)
    grid_m = M_p // tm_eff

    # --- hidden (reduction) tile: bounds live f32 activations to (tm, th) ----
    if H % 128 == 0:
        th = math.gcd(H, 512)
    else:
        th = H                        # full-dim block (legal; no padding needed)
    grid_h = H // th

    # --- pad tokens only if needed (zero rows are inert, sliced off below) ---
    x2d = x.reshape(M, C_in)
    if M_p != M:
        x2d = jnp.pad(x2d, ((0, M_p - M), (0, 0)))

    # --- scheduler hint -------------------------------------------------------
    flops = 2 * M_p * H * (C_in + C_out)
    bytes_accessed = (M_p * C_in * x_itemsize + (C_in * H + H * C_out) * 2
                      + (H + C_out) * 4 + M_p * C_out * out_itemsize)
    cost = pl.CostEstimate(flops=flops, transcendentals=M_p * H,
                           bytes_accessed=bytes_accessed)

    # --- VMEM budget ----------------------------------------------------------
    vmem_est = (
        2 * tm_eff * C_in * x_itemsize        # x tile (double-buffered)
        + 2 * C_in * th * 2                   # W1 chunk (double-buffered)
        + 2 * th * C_out * 2                  # W2 chunk (double-buffered)
        + 2 * (th + C_out) * 4                # bias chunks
        + 2 * tm_eff * C_out * out_itemsize   # out tile (double-buffered)
        + tm_eff * C_out * 4                  # f32 accumulator scratch
        + 2 * tm_eff * th * 4                 # live f32 hidden chunk (+ headroom)
    )
    vmem_limit = int(min(max(int(vmem_est * 1.5), 32 * 1024 * 1024), _VMEM_CEILING))

    # Weight chunks never change across the grid when grid_h == 1: single-buffer
    # them (held resident); otherwise use default double-buffered streaming.
    if grid_h == 1:
        w1_spec = pl.BlockSpec((C_in, th), lambda i, h: (0, h),
                               pipeline_mode=pl.Buffered(1))
        w2_spec = pl.BlockSpec((th, C_out), lambda i, h: (h, 0),
                               pipeline_mode=pl.Buffered(1))
    else:
        w1_spec = pl.BlockSpec((C_in, th), lambda i, h: (0, h))
        w2_spec = pl.BlockSpec((th, C_out), lambda i, h: (h, 0))

    out2d = pl.pallas_call(
        _mlp_kernel,
        out_shape=jax.ShapeDtypeStruct((M_p, C_out), out_dtype),
        grid_spec=pltpu.PrefetchScalarGridSpec(
            num_scalar_prefetch=0,
            grid=(grid_m, grid_h),
            in_specs=[
                pl.BlockSpec((tm_eff, C_in), lambda i, h: (i, 0)),   # x tile
                w1_spec,                                             # W1 chunk
                pl.BlockSpec((1, th), lambda i, h: (0, h)),          # b1 chunk
                w2_spec,                                             # W2 chunk
                pl.BlockSpec((1, C_out), lambda i, h: (0, 0)),       # b2
            ],
            out_specs=pl.BlockSpec((tm_eff, C_out), lambda i, h: (i, 0)),
            scratch_shapes=[pltpu.VMEM((tm_eff, C_out), jnp.float32)],
        ),
        compiler_params=pltpu.CompilerParams(
            dimension_semantics=("parallel", "arbitrary"),
            vmem_limit_bytes=vmem_limit,
        ),
        cost_estimate=cost,
    )(x2d, w1, b1, w2, b2)

    if M_p != M:
        out2d = out2d[:M]
    return out2d.reshape(B, N, C_out)


def _reference(x, w1, b1, w2, b2):
    h = jnp.einsum("bnc,ch->bnh", x, w1) + b1
    h = 0.5 * h * (1.0 + jax.lax.erf(h / jnp.sqrt(2.0)))
    return jnp.einsum("bnh,ho->bno", h, w2) + b2


if __name__ == "__main__":
    key = jax.random.PRNGKey(0)

    def run_case(B, N, c_in, hidden, c_out, case_key, tm=256):
        kx, kw1, kb1, kw2, kb2 = jax.random.split(case_key, 5)
        x = jax.random.normal(kx, (B, N, c_in), jnp.float32)
        w1 = jax.random.normal(kw1, (c_in, hidden), jnp.float32) * 0.02
        b1 = jax.random.normal(kb1, (hidden,), jnp.float32) * 0.02
        w2 = jax.random.normal(kw2, (hidden, c_out), jnp.float32) * 0.02
        b2 = jax.random.normal(kb2, (c_out,), jnp.float32) * 0.02

        params = prepare_mlp_params(w1, b1, w2, b2)   # one-time init cast
        out = jax.block_until_ready(mlp_pallas(x, *params, tm=tm))

        ref = _reference(x, w1, b1, w2, b2)
        assert out.shape == (B, N, c_out)
        # bf16 MXU inputs (f32 accumulation) => slightly looser tolerance.
        assert jnp.allclose(out, ref, atol=5e-3, rtol=2e-2), \
            f"mismatch vs JAX reference for {(B, N, c_in, hidden, c_out)}"
        return out

    k1, k2 = jax.random.split(key)
    # 128-aligned channels (embed_dim=256, mlp_ratio=4): exercises the H
    # reduction axis (grid_h=2) and the 2-step parallel token axis (grid_m=2).
    run_case(B=2, N=256, c_in=256, hidden=1024, c_out=256, case_key=k1)
    # InvPT-like small embed (64, mlp_ratio=4, 8x8 tokens): exercises the
    # unpadded full-channel-dim blocks (no 128 padding, no channel slice).
    run_case(B=2, N=64, c_in=64, hidden=256, c_out=64, case_key=k2)

    print("KERNEL_OK")
</pallas_src>

<mosaic_0001>
module attributes {stable_mosaic.version = 11 : i64} {
  func.func @_mlp_kernel(%arg0: i32, %arg1: i32, %arg2: memref<256x256xf32, #tpu.memory_space<vmem>>, %arg3: memref<256x512xbf16, #tpu.memory_space<vmem>>, %arg4: memref<1x512xf32, #tpu.memory_space<vmem>>, %arg5: memref<512x256xbf16, #tpu.memory_space<vmem>>, %arg6: memref<1x256xf32, #tpu.memory_space<vmem>>, %arg7: memref<256x256xf32, #tpu.memory_space<vmem>>, %arg8: memref<256x256xf32, #tpu.memory_space<vmem>>) attributes {dimension_semantics = [#tpu.dimension_semantics<parallel>, #tpu.dimension_semantics<arbitrary>], iteration_bounds = array<i64: 2, 2>, scalar_prefetch = 0 : i64, scratch_operands = 1 : i64, tpu.core_type = #tpu.core_type<tc>, window_params = [{transform_indices = @transform_0, window_bounds = array<i64: 256, 256>}, {transform_indices = @transform_1, window_bounds = array<i64: 256, 512>}, {transform_indices = @transform_2, window_bounds = array<i64: 1, 512>}, {transform_indices = @transform_3, window_bounds = array<i64: 512, 256>}, {pipeline_mode = #tpu.pipeline_mode<synchronous>, transform_indices = @transform_4, window_bounds = array<i64: 1, 256>}, {transform_indices = @transform_5, window_bounds = array<i64: 256, 256>}]} {
    %c0_i32 = arith.constant 0 : i32
    %0 = arith.cmpi eq, %arg1, %c0_i32 : i32
    %1 = arith.extui %0 : i1 to i32
    %c0_i32_0 = arith.constant 0 : i32
    %2 = arith.cmpi ne, %1, %c0_i32_0 : i32
    scf.if %2 {
      %cst_17 = arith.constant 0.000000e+00 : f32
      %27 = vector.broadcast %cst_17 : f32 to vector<256x256xf32>
      %c0_18 = arith.constant 0 : index
      %c0_19 = arith.constant 0 : index
      %28 = vector.load %arg8[%c0_18, %c0_19] : memref<256x256xf32, #tpu.memory_space<vmem>>, vector<256x256xf32>
      tpu.vector_store %arg8[%c0_18, %c0_19], %27 {strides = array<i32>} : memref<256x256xf32, #tpu.memory_space<vmem>>, vector<256x256xf32>,
    } else {
    }
    %c0 = arith.constant 0 : index
    %c0_1 = arith.constant 0 : index
    %3 = vector.load %arg2[%c0, %c0_1] : memref<256x256xf32, #tpu.memory_space<vmem>>, vector<256x256xf32>
    %4 = arith.truncf %3 : vector<256x256xf32> to vector<256x256xbf16>
    %c0_2 = arith.constant 0 : index
    %c0_3 = arith.constant 0 : index
    %5 = vector.load %arg3[%c0_2, %c0_3] : memref<256x512xbf16, #tpu.memory_space<vmem>>, vector<256x512xbf16>
    %cst = arith.constant dense<0.000000e+00> : vector<256x512xf32>
    %6 = tpu.matmul %4, %5, %cst {dimension_numbers = #tpu.dot_dimension_numbers<[1], [0], [0], [1], [0, 0, 1, 1], [], []>} : vector<256x256xbf16>, vector<256x512xbf16>, vector<256x512xf32> -> vector<256x512xf32>
    %c0_4 = arith.constant 0 : index
    %c0_5 = arith.constant 0 : index
    %7 = vector.load %arg4[%c0_4, %c0_5] : memref<1x512xf32, #tpu.memory_space<vmem>>, vector<1x512xf32>
    %8 = vector.broadcast %7 : vector<1x512xf32> to vector<256x512xf32>
    %9 = arith.addf %6, %8 : vector<256x512xf32>
    %cst_6 = arith.constant 5.000000e-01 : f32
    %10 = vector.broadcast %cst_6 : f32 to vector<256x512xf32>
    %11 = arith.mulf %10, %9 : vector<256x512xf32>
    %cst_7 = arith.constant 0.707106769 : f32
    %12 = vector.broadcast %cst_7 : f32 to vector<256x512xf32>
    %13 = arith.mulf %9, %12 : vector<256x512xf32>
    %14 = math.erf %13 : vector<256x512xf32>
    %cst_8 = arith.constant 1.000000e+00 : f32
    %15 = vector.broadcast %cst_8 : f32 to vector<256x512xf32>
    %16 = arith.addf %15, %14 : vector<256x512xf32>
    %17 = arith.mulf %11, %16 : vector<256x512xf32>
    %c0_9 = arith.constant 0 : index
    %c0_10 = arith.constant 0 : index
    %18 = vector.load %arg8[%c0_9, %c0_10] : memref<256x256xf32, #tpu.memory_space<vmem>>, vector<256x256xf32>
    %19 = arith.truncf %17 : vector<256x512xf32> to vector<256x512xbf16>
    %c0_11 = arith.constant 0 : index
    %c0_12 = arith.constant 0 : index
    %20 = vector.load %arg5[%c0_11, %c0_12] : memref<512x256xbf16, #tpu.memory_space<vmem>>, vector<512x256xbf16>
    %cst_13 = arith.constant dense<0.000000e+00> : vector<256x256xf32>
    %21 = tpu.matmul %19, %20, %cst_13 {dimension_numbers = #tpu.dot_dimension_numbers<[1], [0], [0], [1], [0, 0, 1, 1], [], []>} : vector<256x512xbf16>, vector<512x256xbf16>, vector<256x256xf32> -> vector<256x256xf32>
    %22 = arith.addf %18, %21 : vector<256x256xf32>
    %c0_14 = arith.constant 0 : index
    %c0_15 = arith.constant 0 : index
    %23 = vector.load %arg8[%c0_14, %c0_15] : memref<256x256xf32, #tpu.memory_space<vmem>>, vector<256x256xf32>
    tpu.vector_store %arg8[%c0_14, %c0_15], %22 {strides = array<i32>} : memref<256x256xf32, #tpu.memory_space<vmem>>, vector<256x256xf32>,
    %c1_i32 = arith.constant 1 : i32
    %24 = arith.cmpi eq, %arg1, %c1_i32 : i32
    %25 = arith.extui %24 : i1 to i32
    %c0_i32_16 = arith.constant 0 : i32
    %26 = arith.cmpi ne, %25, %c0_i32_16 : i32
    scf.if %26 {
      %c0_17 = arith.constant 0 : index
      %c0_18 = arith.constant 0 : index
      %27 = vector.load %arg8[%c0_17, %c0_18] : memref<256x256xf32, #tpu.memory_space<vmem>>, vector<256x256xf32>
      %c0_19 = arith.constant 0 : index
      %c0_20 = arith.constant 0 : index
      %28 = vector.load %arg6[%c0_19, %c0_20] : memref<1x256xf32, #tpu.memory_space<vmem>>, vector<1x256xf32>
      %29 = vector.broadcast %28 : vector<1x256xf32> to vector<256x256xf32>
      %30 = arith.addf %27, %29 : vector<256x256xf32>
      %c0_21 = arith.constant 0 : index
      %c0_22 = arith.constant 0 : index
      %31 = vector.load %arg7[%c0_21, %c0_22] : memref<256x256xf32, #tpu.memory_space<vmem>>, vector<256x256xf32>
      tpu.vector_store %arg7[%c0_21, %c0_22], %30 {strides = array<i32>} : memref<256x256xf32, #tpu.memory_space<vmem>>, vector<256x256xf32>,
    } else {
    }
    return
  }
  func.func @transform_0(%arg0: i32, %arg1: i32) -> (i32, i32) {
    %c0_i32 = arith.constant 0 : i32
    %c0_i32_0 = arith.constant 0 : i32
    return %arg0, %c0_i32 : i32, i32
  }
  func.func @transform_1(%arg0: i32, %arg1: i32) -> (i32, i32) {
    %c0_i32 = arith.constant 0 : i32
    %c0_i32_0 = arith.constant 0 : i32
    return %c0_i32, %arg1 : i32, i32
  }
  func.func @transform_2(%arg0: i32, %arg1: i32) -> (i32, i32) {
    %c0_i32 = arith.constant 0 : i32
    %c0_i32_0 = arith.constant 0 : i32
    return %c0_i32, %arg1 : i32, i32
  }
  func.func @transform_3(%arg0: i32, %arg1: i32) -> (i32, i32) {
    %c0_i32 = arith.constant 0 : i32
    %c0_i32_0 = arith.constant 0 : i32
    return %arg1, %c0_i32 : i32, i32
  }
  func.func @transform_4(%arg0: i32, %arg1: i32) -> (i32, i32) {
    %c0_i32 = arith.constant 0 : i32
    %c0_i32_0 = arith.constant 0 : i32
    %c0_i32_1 = arith.constant 0 : i32
    return %c0_i32, %c0_i32_0 : i32, i32
  }
  func.func @transform_5(%arg0: i32, %arg1: i32) -> (i32, i32) {
    %c0_i32 = arith.constant 0 : i32
    %c0_i32_0 = arith.constant 0 : i32
    return %arg0, %c0_i32 : i32, i32
  }
}

</mosaic_0001>

<bundles_post_ra>
// kernel: mlp_pallas.1
= control target key start
LH: loop header
LB: loop body
LE: loop exit
PB: predicated region body
PF: predicated region fallthrough
CT: control target
= control target key end

     0   :  { %s6274_s0 = inlined_call_operand.hbm [shape: f32[512,256], index: 0, kind: input, shape index: {}]   ;;  %s6275_s1 = inlined_call_operand.hbm [shape: bf16[256,1024], index: 1, kind: input, shape index: {}]   ;;  %s6276_s2 = inlined_call_operand.hbm [shape: f32[1,1024], index: 2, kind: input, shape index: {}]   ;;  %s6277_s3 = inlined_call_operand.hbm [shape: bf16[1024,256], index: 3, kind: input, shape index: {}]   ;;  %s6278_s4 = inlined_call_operand.vmem [shape: f32[1,256], index: 4, kind: input, shape index: {}]   ;;  %s6279_s5 = inlined_call_operand.hbm [shape: f32[512,256], index: 5, kind: output, shape index: {}]  }
   0x1   :  { %6299 = sst [smem:[#allocation36_spill]] %s6274_s0 }
   0x2   :  { %6300 = sst [smem:[#allocation37_spill]] %s6275_s1 }
   0x3   :  { %6301 = sst [smem:[#allocation38_spill]] %s6278_s4 }
   0x4   :  { %6302 = sst [smem:[#allocation39_spill]] %s6279_s5 }
   0x5   :  { %10 = vsyncpa [#allocation4], 0 }
   0x6   :  { %12 = vsyncpa [#allocation4 + $0x1], 0 }
   0x7   :  { %13 = vsyncpa [#allocation7], 0 }
   0x8   :  { %15 = vsyncpa [#allocation7 + $0x1], 0 }
   0x9   :  { %16 = vsyncpa [#allocation10], 0 }
   0xa   :  { %18 = vsyncpa [#allocation10 + $0x1], 0 }
   0xb   :  { %19 = vsyncpa [#allocation5], 0 }
   0xc   :  { %21 = vsyncpa [#allocation5 + $0x1], 0  ;;  %s4398_s18 = smov 0   ;;  %s4400_s19 = smov 0  }
   0xd   :  { %s4402_s20 = smov 0   ;;  %s4404_s21 = smov 0  }
   0xe   :  { %s4406_s22 = smov 0   ;;  %s4408_s23 = smov 0  }
   0xf   :  { %s4410_s24 = smov 0   ;;  %s4412_s25 = smov 0  }
  0x10   :  { %s4414_s26 = smov 0   ;;  %s4416_s27 = smov 0  }
  0x11   :  { %s4418_s28 = smov 0  }
  0x12 LB: > { %6303 = sst [smem:[#allocation16_spill]] %s4321_s20  ;;  %p54_p0 = scmp.eq.s32.totalorder %s4353_s28, 0  ;;  %s4353_s28 = sphi %s4418_s28, %s27_s28   ;;  %s4349_s27 = sphi %s4416_s27, %s6369_s27   ;;  %s4345_s26 = sphi %s4414_s26, %s6375_s26   ;;  %s4341_s25 = sphi %s4412_s25, %s6367_s25   ;;  %s4337_s24 = sphi %s4410_s24, %s6374_s24   ;;  %s4333_s23 = sphi %s4408_s23, %s6366_s23   ;;  %s4329_s22 = sphi %s4406_s22, %s6373_s22   ;;  %s4325_s21 = sphi %s4404_s21, %s6372_s21   ;;  %s4321_s20 = sphi %s4402_s20, %s6364_s20   ;;  %s4317_s19 = sphi %s4400_s19, %s6371_s19   ;;  %s4313_s18 = sphi %s4398_s18, %s6370_s18  }
  0x13   : > { %6304 = sst [smem:[#allocation17_spill]] %s4325_s21  ;;  %s72_s29 = sadd.s32 1, %s4321_s20 }
  0x14   : > { %6305 = sst [smem:[#allocation18_spill]] %s4333_s23  ;;  %p79_p1 = scmp.ne.s32.totalorder %s4321_s20, %s4317_s19 }
  0x15   : > { %6306 = sst [smem:[#allocation19_spill]] %s4341_s25  ;;  %p85_p2 = scmp.ne.s32.totalorder %s4317_s19, %s4313_s18 }
  0x16   : > { %6307 = sst [smem:[#allocation20_spill]] %s4349_s27  ;;  %p6285_p3 = scmp.lt.s32.totalorder %s4353_s28, 4 }
  0x17   : > { %6308 = sst [smem:[#allocation21_spill]] %s4353_s28  ;;  %p81_p4 = por %p79_p1, %p54_p0 }
  0x18   : > { %s233_s30 = sand.u32 1, %s4353_s28   ;;  %s4464_s6 = sand.u32 1, %s4321_s20  }
  0x19   : > { %s6280_s7 = sshll.u32 %s4464_s6, 9  ;;  %s3534_s8 = sshll.u32 %s4345_s26, 8 }
  0x1a   : > { %s6309_s1 = sld [smem:[#allocation37_spill]]  ;;  %s237_s12 = scalar_lea.vmem [#allocation6], %s6280_s7 }
  0x1b   : > { %s244_s13 = sshll.u32 %s237_s12, 4  ;;  %p4475_p5 = pnand %p6285_p3, %p81_p4  ;;  %s245_s13 = int_to_ptr.vmem [resolvable:$true] %s244_s13 }
  0x1c   : > { %p3390_p6 = scmp.ge.s32.totalorder %s4353_s28, 1  ;;  %s4480_s15 = scalar_lea.sflag [#allocation7], %s233_s30 }
  0x1d   : > { %p6284_p7 = pneg %p4475_p5  ;;  %s4126_s16 = scalar_lea.vmem %s245_s13, 8192 }
  0x1e   : > { %p4127_p8 = scmp.ne.s32.totalorder %s245_s13, %s4126_s16  ;;  %s4355_s17 = smov [#allocation6]  }
  0x20   : > { %s243_s11 = scalar_lea.hbm %s6309_s1, %s3534_s8  ;;  %p4129_p9 = pnand %p4127_p8, %p6284_p7 }
  0x21   : > { %s4131_s8 = sshll.u32 %s4355_s17, 4  ;;  %s4132_s8 = int_to_ptr.vmem [resolvable:$false] %s4131_s8 }
  0x22   : > { %p4130_p10 = pneg %p4129_p9  ;;  %s4133_s9 = scalar_lea.vmem %s4132_s8, 16384 }
  0x23   : > { %p4134_p11 = scmp.lt.s32.totalorder %s245_s13, %s4132_s8  ;;  %p4135_p12 = scmp.lt.s32.totalorder %s4133_s9, %s4126_s16 }
  0x25   : > { %p4136_p13 = por %p4135_p12, %p4134_p11 }
  0x27   : > { %p4137_p1 = pnand %p4136_p13, %p4130_p10 }
  0x29   : > { %4140 = shalt.err (!%p4137_p1)
}
  0x2a   : > { %s4356_s10 = smov 512   ;;  %s6281_s30 = smov 256  }
  0x2b   : > { %s6282_s12 = smov 16   ;;  %p293_p4 = scmp.lt.s32.totalorder %s4353_s28, 5 }
  0x2c   : > { %3556 = dma.hbm_to_vmem [thread:$0]  (!%p4475_p5), %s243_s11, 8192, %s245_s13, %s4480_s15, %s4356_s10, %s6281_s30, %s6282_s12  }
  0x2d   : > { %p4495_p8 = pnand %p3390_p6, %p293_p4  ;;  %s4500_s17 = sadd.s32 4294967295, %s4353_s28  }
  0x2e   : > { %s3373_s8 = sadd.s32 4294967294, %s4353_s28   ;;  %s36_s9 = sadd.s32 1, %s4345_s26 }
  0x2f   : > { %s39_s7 = sadd.s32 1, %s4349_s27  ;;  %p37_p9 = scmp.ge.s32.totalorder %s36_s9, 2 }
  0x30   : > { %s46_s11 = sadd.s32 1, %s4333_s23  ;;  %p53_p10 = scmp.ne.s32.totalorder %s4333_s23, %s4329_s22 }
  0x31   : > { %p59_p11 = scmp.ne.s32.totalorder %s4329_s22, %s4325_s21  ;;  %s6377_s9 = smov (%p37_p9, %s36_s9), 0 }
  0x32   : > { %6312 = sst [smem:[#allocation22_spill]] %s6377_s9  ;;  %s6379_s7 = smov (!%p37_p9, %s39_s7), %s4349_s27 }
  0x33   : > { %p4518_p6 = por %p54_p0, %p53_p10  ;;  %p60_p12 = scmp.eq.s32.totalorder %s4500_s17, 0 }
  0x34   : > { %p41_p13 = scmp.ge.s32.totalorder %s6379_s7, 2  ;;  %s69_s10 = ssub.s32 %s4345_s26, %s6377_s9 }
  0x35   : > { %p4528_p1 = por %p60_p12, %p59_p11  ;;  %p70_p4 = scmp.eq.s32.totalorder %s69_s10, 0 }
  0x36   : > { %s6381_s7 = smov (%p41_p13, %s6379_s7), 0  ;;  %p4544_p0 = por %p85_p2, %p60_p12 }
  0x37   : > { %6315 = sst [smem:[#allocation23_spill]] %s6381_s7  ;;  %s43_s1 = ssub.s32 %s4349_s27, %s6381_s7 }
  0x38   : > { %s4537_s12 = scalar_select %p70_p4, %s4321_s20, %s72_s29  }
  0x39   : > { %p44_p9 = scmp.eq.s32.totalorder %s43_s1, 0  ;;  %p182_p7 = scmp.eq.s32.totalorder %s4500_s17, 3 }
  0x3a   : > { %6316 = sst [smem:[#allocation24_spill]] %s4537_s12  ;;  %p188_p3 = scmp.eq.s32.totalorder %s3373_s8, 3 }
  0x3b   : > { %s211_s10 = sand.u32 1, %s4333_s23   ;;  %p4556_p13 = por %p182_p7, %p53_p10 }
  0x3c   : > { %s4551_s9 = scalar_select %p44_p9, %s4333_s23, %s46_s11  }
  0x3d   : > { %p4563_p4 = por %p188_p3, %p59_p11  ;;  %s3376_s7 = sshll.u32 %s211_s10, 9 }
  0x3e   : > { %6318 = sst [smem:[#allocation25_spill]] %s4551_s9  ;;  %s3533_s12 = sshll.u32 %s4349_s27, 13 }
  0x3f   : > { %s6320_s18 = scalar_select %p4563_p4, 1, 0 }
  0x40   : > { %s6322_s0 = sld [smem:[#allocation36_spill]]  ;;  %s215_s8 = scalar_lea.vmem [#allocation3], %s3376_s7 }
  0x41   : > { %6321 = sst [smem:[#allocation26_spill]] %s6320_s18  ;;  %s223_s4 = sshll.u32 %s215_s8, 4  ;;  %s224_s4 = int_to_ptr.vmem [resolvable:$true] %s223_s4 }
  0x42   : > { %p6323_p2 = scmp.lt.s32.totalorder %s4353_s28, 4  ;;  %s3383_s9 = sshll.u32 %s4464_s6, 2 }
  0x43   : > { %s3535_s23 = sshll.u32 %s4345_s26, 6  ;;  %s212_s21 = scalar_lea.sflag [#allocation4], %s211_s10 }
  0x44   : > { %p4575_p7 = pnand %p6323_p2, %p4518_p6  ;;  %s4154_s27 = scalar_lea.vmem %s224_s4, 8192 }
  0x45   : > { %p4155_p10 = scmp.ne.s32.totalorder %s224_s4, %s4154_s27  ;;  %s4359_s20 = smov [#allocation3]  }
  0x46   : > { %s222_s1 = scalar_lea.hbm %s6322_s0, %s3533_s12  ;;  %p4143_p3 = pneg %p4575_p7 }
  0x47   : > { %s4159_s25 = sshll.u32 %s4359_s20, 4  ;;  %s4160_s25 = int_to_ptr.vmem [resolvable:$false] %s4159_s25 }
  0x48   : > { %p4157_p11 = pnand %p4155_p10, %p4143_p3  ;;  %s4161_s7 = scalar_lea.vmem %s4160_s25, 16384 }
  0x49   : > { %p4162_p9 = scmp.lt.s32.totalorder %s224_s4, %s4160_s25  ;;  %p4163_p4 = scmp.lt.s32.totalorder %s4161_s7, %s4154_s27 }
  0x4a   : > { %p4158_p12 = pneg %p4157_p11 }
  0x4b   : > { %p4164_p6 = por %p4163_p4, %p4162_p9 }
  0x4d   : > { %p4165_p2 = pnand %p4164_p6, %p4158_p12 }
  0x4f   : > { %4168 = shalt.err (!%p4165_p2)
}
  0x50   : > { %s6325_s12 = smov 16   ;;  %s6326_s13 = smov 256  }
  0x51   : > { %3553 = dma.hbm_to_vmem [thread:$0]  (!%p4575_p7), %s222_s1, 8192, %s224_s4, %s212_s21, %s6326_s13, %s6326_s13, %s6325_s12  }
  0x52   : > { %s264_s0 = scalar_lea.hbm %s6276_s2, %s3535_s23  ;;  %s258_s18 = scalar_lea.vmem [#allocation8], %s3383_s9 }
  0x53   : > { %s266_s20 = sshll.u32 %s258_s18, 4  ;;  %p6327_p4 = pneg %p4475_p5  ;;  %s267_s20 = int_to_ptr.vmem [resolvable:$true] %s266_s20 }
  0x54   : > { %s4182_s28 = scalar_lea.vmem %s267_s20, 64  ;;  %s4360_s27 = smov [#allocation8]  }
  0x55   : > { %p4183_p3 = scmp.ne.s32.totalorder %s267_s20, %s4182_s28  ;;  %s4187_s11 = sshll.u32 %s4360_s27, 4  ;;  %s4188_s11 = int_to_ptr.vmem [resolvable:$false] %s4187_s11 }
  0x56   : > { %s4189_s25 = scalar_lea.vmem %s4188_s11, 128  ;;  %p4190_p12 = scmp.lt.s32.totalorder %s267_s20, %s4188_s11 }
  0x57   : > { %p4185_p10 = pnand %p4183_p3, %p6327_p4  ;;  %p4191_p9 = scmp.lt.s32.totalorder %s4189_s25, %s4182_s28 }
  0x59   : > { %p4186_p11 = pneg %p4185_p10  ;;  %p4192_p7 = por %p4191_p9, %p4190_p12 }
  0x5b   : > { %p4193_p6 = pnand %p4192_p7, %p4186_p11 }
  0x5d   : > { %4196 = shalt.err (!%p4193_p6)
}
  0x5e   : > { %3559 = dma.hbm_to_vmem [thread:$0]  (!%p4475_p5), %s264_s0, 64, %s267_s20, %s4480_s15  }
  0x5f   : > { %s3537_s4 = sshll.u32 %s4345_s26, 13  ;;  %s6328_s18 = sshll.u32 %s4464_s6, 9 }
  0x60   : > { %s284_s9 = scalar_lea.hbm %s6277_s3, %s3537_s4  ;;  %s277_s1 = scalar_lea.vmem [#allocation9], %s6328_s18 }
  0x61   : > { %s285_s7 = sshll.u32 %s277_s1, 4  ;;  %s274_s28 = scalar_lea.sflag [#allocation10], %s4464_s6  ;;  %s286_s7 = int_to_ptr.vmem [resolvable:$true] %s285_s7 }
  0x62   : > { %s4210_s12 = scalar_lea.vmem %s286_s7, 8192  ;;  %p6329_p3 = pmov %p6327_p4 }
  0x63   : > { %p4211_p2 = scmp.ne.s32.totalorder %s286_s7, %s4210_s12  ;;  %s4361_s13 = smov [#allocation9]  }
  0x64   : > { %s4215_s10 = sshll.u32 %s4361_s13, 4  ;;  %s4216_s10 = int_to_ptr.vmem [resolvable:$false] %s4215_s10 }
  0x65   : > { %p4213_p4 = pnand %p4211_p2, %p6329_p3  ;;  %s4217_s0 = scalar_lea.vmem %s4216_s10, 16384 }
  0x66   : > { %p4218_p11 = scmp.lt.s32.totalorder %s286_s7, %s4216_s10  ;;  %p4219_p12 = scmp.lt.s32.totalorder %s4217_s0, %s4210_s12 }
  0x67   : > { %p4214_p10 = pneg %p4213_p4 }
  0x68   : > { %p4220_p9 = por %p4219_p12, %p4218_p11 }
  0x6a   : > { %p4221_p7 = pnand %p4220_p9, %p4214_p10 }
  0x6c   : > { %4224 = shalt.err (!%p4221_p7)
}
  0x6d   : > { %s4362_s15 = smov 128   ;;  %s4363_s8 = smov 8  }
  0x6e   : > { %3562 = dma.hbm_to_vmem [thread:$0]  (!%p4475_p5), %s284_s9, 8192, %s286_s7, %s274_s28, %s4362_s15, %s4362_s15, %s4363_s8  }
  0x6f   : > { %297 = sbr.rel (%p4495_p8) target bundleno = 916 (0x394), region = 40 }
  0x74   : > { %s4612_s6 = sand.u32 1, %s4329_s22  }
  0x75   : > { %s3391_s20 = sshll.u32 %s4612_s6, 9  ;;  %s300_s27 = scalar_lea.sflag [#allocation4], %s4612_s6 }
  0x76   : > { %s4616_s11 = scalar_lea.vmem [#allocation3], %s3391_s20 }
  0x77   : > { %4296 = dma.done.wait (%p4528_p1), %s300_s27, 8192  }
  0x78   : > { %4298 = vsyncadd (%p4528_p1), %s300_s27, 4294959104  ;;  %s308_s14 = sand.u32 1, %s4500_s17   ;;  %s310_s16 = sand.u32 1, %s4317_s19  }
  0x79   : > { %s3392_s25 = sshll.u32 %s310_s16, 9  ;;  %s309_s4 = scalar_lea.sflag [#allocation7], %s308_s14 }
  0x7a   : > { %s4624_s21 = scalar_lea.vmem [#allocation6], %s3392_s25 }
  0x7b   : > { %4300 = dma.done.wait (%p4544_p0), %s309_s4, 8256  }
  0x7c   : > { %4302 = vsyncadd (%p4544_p0), %s309_s4, 4294959040  ;;  %s3393_s23 = sshll.u32 %s310_s16, 2  ;;  %s327_s30 = scalar_lea.sflag [#allocation10], %s310_s16 }
  0x7d   : > { %s4630_s9 = scalar_lea.vmem [#allocation8], %s3393_s23  ;;  %s4632_s18 = scalar_lea.vmem [#allocation9], %s3392_s25 }
  0x7e   : > { %4304 = dma.done.wait (%p4544_p0), %s327_s30, 8192  }
  0x7f   : > { %4306 = vsyncadd (%p4544_p0), %s327_s30, 4294959104  ;;  %s4638_s17 = scalar_lea.vmem [#allocation11], %s3391_s20  ;;  %p3396_p5 = scmp.ne.s32.totalorder %s4337_s24, 0 }
  0x81   : > { %380 = sbr.rel (%p3396_p5) target bundleno = 167 (0xa7), region = 60 }
  0x86   : > { %v4364_v0 = vmov 0.0  }
  0x87   : > { %381 = vst [vmem:[#allocation2 + $0xb0] sm:$0xff] %v4364_v0  ;;  %382 = vst [vmem:[#allocation2 + $0x1b0] sm:$0xff] %v4364_v0 }
  0x88   : > { %383 = vst [vmem:[#allocation2 + $0xd8] sm:$0xff] %v4364_v0  ;;  %384 = vst [vmem:[#allocation2 + $0x18] sm:$0xff] %v4364_v0 }
  0x89   : > { %385 = vst [vmem:[#allocation2 + $0x50] sm:$0xff] %v4364_v0  ;;  %386 = vst [vmem:[#allocation2 + $0x168] sm:$0xff] %v4364_v0 }
  0x8a   : > { %387 = vst [vmem:[#allocation2 + $0x130] sm:$0xff] %v4364_v0  ;;  %388 = vst [vmem:[#allocation2 + $0x48] sm:$0xff] %v4364_v0 }
  0x8b   : > { %389 = vst [vmem:[#allocation2 + $0x180] sm:$0xff] %v4364_v0  ;;  %390 = vst [vmem:[#allocation2 + $0x110] sm:$0xff] %v4364_v0 }
  0x8c   : > { %391 = vst [vmem:[#allocation2 + $0x118] sm:$0xff] %v4364_v0  ;;  %392 = vst [vmem:[#allocation2 + $0x98] sm:$0xff] %v4364_v0 }
  0x8d   : > { %393 = vst [vmem:[#allocation2 + $0x120] sm:$0xff] %v4364_v0  ;;  %394 = vst [vmem:[#allocation2 + $0x150] sm:$0xff] %v4364_v0 }
  0x8e   : > { %395 = vst [vmem:[#allocation2 + $0x108] sm:$0xff] %v4364_v0  ;;  %396 = vst [vmem:[#allocation2 + $0x60] sm:$0xff] %v4364_v0 }
  0x8f   : > { %397 = vst [vmem:[#allocation2 + $0xe0] sm:$0xff] %v4364_v0  ;;  %398 = vst [vmem:[#allocation2 + $0x188] sm:$0xff] %v4364_v0 }
  0x90   : > { %399 = vst [vmem:[#allocation2 + $0x138] sm:$0xff] %v4364_v0  ;;  %400 = vst [vmem:[#allocation2 + $0x140] sm:$0xff] %v4364_v0 }
  0x91   : > { %401 = vst [vmem:[#allocation2 + $0x80] sm:$0xff] %v4364_v0  ;;  %402 = vst [vmem:[#allocation2 + $0x1a8] sm:$0xff] %v4364_v0 }
  0x92   : > { %403 = vst [vmem:[#allocation2 + $0x1b8] sm:$0xff] %v4364_v0  ;;  %404 = vst [vmem:[#allocation2 + $0x28] sm:$0xff] %v4364_v0 }
  0x93   : > { %405 = vst [vmem:[#allocation2 + $0x1e8] sm:$0xff] %v4364_v0  ;;  %406 = vst [vmem:[#allocation2 + $0xf8] sm:$0xff] %v4364_v0 }
  0x94   : > { %407 = vst [vmem:[#allocation2 + $0x160] sm:$0xff] %v4364_v0  ;;  %408 = vst [vmem:[#allocation2 + $0x30] sm:$0xff] %v4364_v0 }
  0x95   : > { %409 = vst [vmem:[#allocation2 + $0x1e0] sm:$0xff] %v4364_v0  ;;  %410 = vst [vmem:[#allocation2] sm:$0xff] %v4364_v0 }
  0x96   : > { %411 = vst [vmem:[#allocation2 + $0xf0] sm:$0xff] %v4364_v0  ;;  %412 = vst [vmem:[#allocation2 + $0x8] sm:$0xff] %v4364_v0 }
  0x97   : > { %413 = vst [vmem:[#allocation2 + $0x148] sm:$0xff] %v4364_v0  ;;  %414 = vst [vmem:[#allocation2 + $0x1d0] sm:$0xff] %v4364_v0 }
  0x98   : > { %415 = vst [vmem:[#allocation2 + $0x100] sm:$0xff] %v4364_v0  ;;  %416 = vst [vmem:[#allocation2 + $0xc8] sm:$0xff] %v4364_v0 }
  0x99   : > { %417 = vst [vmem:[#allocation2 + $0x40] sm:$0xff] %v4364_v0  ;;  %418 = vst [vmem:[#allocation2 + $0x1f8] sm:$0xff] %v4364_v0 }
  0x9a   : > { %419 = vst [vmem:[#allocation2 + $0x20] sm:$0xff] %v4364_v0  ;;  %420 = vst [vmem:[#allocation2 + $0x128] sm:$0xff] %v4364_v0 }
  0x9b   : > { %421 = vst [vmem:[#allocation2 + $0x1a0] sm:$0xff] %v4364_v0  ;;  %422 = vst [vmem:[#allocation2 + $0x1f0] sm:$0xff] %v4364_v0 }
  0x9c   : > { %423 = vst [vmem:[#allocation2 + $0xe8] sm:$0xff] %v4364_v0  ;;  %424 = vst [vmem:[#allocation2 + $0x78] sm:$0xff] %v4364_v0 }
  0x9d   : > { %425 = vst [vmem:[#allocation2 + $0x70] sm:$0xff] %v4364_v0  ;;  %426 = vst [vmem:[#allocation2 + $0x90] sm:$0xff] %v4364_v0 }
  0x9e   : > { %427 = vst [vmem:[#allocation2 + $0x1d8] sm:$0xff] %v4364_v0  ;;  %428 = vst [vmem:[#allocation2 + $0xd0] sm:$0xff] %v4364_v0 }
  0x9f   : > { %429 = vst [vmem:[#allocation2 + $0xb8] sm:$0xff] %v4364_v0  ;;  %430 = vst [vmem:[#allocation2 + $0x88] sm:$0xff] %v4364_v0 }
  0xa0   : > { %431 = vst [vmem:[#allocation2 + $0xa8] sm:$0xff] %v4364_v0  ;;  %432 = vst [vmem:[#allocation2 + $0x1c8] sm:$0xff] %v4364_v0 }
  0xa1   : > { %433 = vst [vmem:[#allocation2 + $0x170] sm:$0xff] %v4364_v0  ;;  %434 = vst [vmem:[#allocation2 + $0x178] sm:$0xff] %v4364_v0 }
  0xa2   : > { %435 = vst [vmem:[#allocation2 + $0x68] sm:$0xff] %v4364_v0  ;;  %436 = vst [vmem:[#allocation2 + $0x190] sm:$0xff] %v4364_v0 }
  0xa3   : > { %437 = vst [vmem:[#allocation2 + $0x198] sm:$0xff] %v4364_v0  ;;  %438 = vst [vmem:[#allocation2 + $0x38] sm:$0xff] %v4364_v0 }
  0xa4   : > { %439 = vst [vmem:[#allocation2 + $0xc0] sm:$0xff] %v4364_v0  ;;  %440 = vst [vmem:[#allocation2 + $0x1c0] sm:$0xff] %v4364_v0 }
  0xa5   : > { %441 = vst [vmem:[#allocation2 + $0x158] sm:$0xff] %v4364_v0  ;;  %442 = vst [vmem:[#allocation2 + $0x10] sm:$0xff] %v4364_v0 }
  0xa6   : > { %443 = vst [vmem:[#allocation2 + $0x58] sm:$0xff] %v4364_v0  ;;  %444 = vst [vmem:[#allocation2 + $0xa0] sm:$0xff] %v4364_v0 }
  0xa7 PF: > { %v3665_v1 = vld [vmem:[%s4624_s21 + $0xe4] ss:$16 sps:$4 sm:$0xff]   ;;  %v3667_v2 = vld [vmem:[%s4624_s21 + $0xec] ss:$16 sps:$4 sm:$0xff]   ;;  %v3669_v3 = vld [vmem:[%s4624_s21 + $0xe0] ss:$16 sps:$4 sm:$0xff]  }
  0xa8   : > { %947 = vmatprep.subr.bf16.mxu0 %v3665_v1  ;;  %v3670_v4 = vld [vmem:[%s4624_s21 + $0xe8] ss:$16 sps:$4 sm:$0xff]   ;;  %1140 = vmatprep.subr.bf16.mxu1 %v3667_v2  ;;  %v3671_v5 = vld [vmem:[%s4624_s21 + $0xc4] ss:$16 sps:$4 sm:$0xff]   ;;  %v3673_v6 = vld [vmem:[%s4624_s21 + $0xcc] ss:$16 sps:$4 sm:$0xff]  }
  0xa9   : > { %948 = vmatpush1.bf16.msra.mxu0 %v3669_v3  ;;  %1141 = vmatpush1.bf16.msra.mxu1 %v3670_v4  ;;  %v3675_v7 = vld [vmem:[%s4624_s21 + $0xc0] ss:$16 sps:$4 sm:$0xff]   ;;  %v3676_v8 = vld [vmem:[%s4624_s21 + $0xc8] ss:$16 sps:$4 sm:$0xff]   ;;  %v3677_v9 = vld [vmem:[%s4624_s21 + $0xa4] ss:$16 sps:$4 sm:$0xff]  }
  0xaa   : > { %949 = vmatprep.subr.bf16.mxu0 %v3671_v5  ;;  %1142 = vmatprep.subr.bf16.mxu1 %v3673_v6  ;;  %v3679_v10 = vld [vmem:[%s4624_s21 + $0xac] ss:$16 sps:$4 sm:$0xff]   ;;  %v3681_v11 = vld [vmem:[%s4624_s21 + $0xa0] ss:$16 sps:$4 sm:$0xff]   ;;  %v3682_v12 = vld [vmem:[%s4624_s21 + $0xa8] ss:$16 sps:$4 sm:$0xff]  }
  0xab   : > { %v3683_v13 = vld [vmem:[%s4624_s21 + $0x84] ss:$16 sps:$4 sm:$0xff]   ;;  %v3685_v14 = vld [vmem:[%s4624_s21 + $0x8c] ss:$16 sps:$4 sm:$0xff]   ;;  %v3687_v15 = vld [vmem:[%s4624_s21 + $0x80] ss:$16 sps:$4 sm:$0xff]  }
  0xac   : > { %v3688_v16 = vld [vmem:[%s4624_s21 + $0x88] ss:$16 sps:$4 sm:$0xff]   ;;  %v3689_v17 = vld [vmem:[%s4624_s21 + $0x64] ss:$16 sps:$4 sm:$0xff]   ;;  %v3691_v18 = vld [vmem:[%s4624_s21 + $0x6c] ss:$16 sps:$4 sm:$0xff]  }
  0xad   : > { %950 = vmatpush1.bf16.msra.mxu0 %v3675_v7  ;;  %1143 = vmatpush1.bf16.msra.mxu1 %v3676_v8  ;;  %v3693_v19 = vld [vmem:[%s4624_s21 + $0x60] ss:$16 sps:$4 sm:$0xff]   ;;  %v3694_v20 = vld [vmem:[%s4624_s21 + $0x68] ss:$16 sps:$4 sm:$0xff]   ;;  %v3695_v21 = vld [vmem:[%s4624_s21 + $0x44] ss:$16 sps:$4 sm:$0xff]  }
  0xae   : > { %951 = vmatprep.subr.bf16.mxu0 %v3677_v9  ;;  %1144 = vmatprep.subr.bf16.mxu1 %v3679_v10  ;;  %v3697_v22 = vld [vmem:[%s4624_s21 + $0x4c] ss:$16 sps:$4 sm:$0xff]   ;;  %v3699_v23 = vld [vmem:[%s4624_s21 + $0x40] ss:$16 sps:$4 sm:$0xff]   ;;  %v3700_v24 = vld [vmem:[%s4624_s21 + $0x48] ss:$16 sps:$4 sm:$0xff]  }
  0xaf   : > { %v3701_v25 = vld [vmem:[%s4624_s21 + $0x24] ss:$16 sps:$4 sm:$0xff]   ;;  %v3703_v26 = vld [vmem:[%s4624_s21 + $0x2c] ss:$16 sps:$4 sm:$0xff]   ;;  %v3705_v27 = vld [vmem:[%s4624_s21 + $0x20] ss:$16 sps:$4 sm:$0xff]  }
  0xb0   : > { %v3706_v28 = vld [vmem:[%s4624_s21 + $0x28] ss:$16 sps:$4 sm:$0xff]   ;;  %v3707_v29 = vld [vmem:[%s4624_s21 + $0x4] ss:$16 sps:$4 sm:$0xff]   ;;  %v3709_v30 = vld [vmem:[%s4624_s21 + $0xc] ss:$16 sps:$4 sm:$0xff]  }
  0xb1   : > { %952 = vmatpush1.bf16.msra.mxu0 %v3681_v11  ;;  %1145 = vmatpush1.bf16.msra.mxu1 %v3682_v12  ;;  %v3711_v31 = vld [vmem:[%s4624_s21] ss:$16 sps:$4 sm:$0xff]   ;;  %v3712_v32 = vld [vmem:[%s4624_s21 + $0x8] ss:$16 sps:$4 sm:$0xff]   ;;  %v3713_v33 = vld [vmem:[%s4624_s21 + $0x1e4] ss:$16 sps:$4 sm:$0xff]  }
  0xb2   : > { %953 = vmatprep.subr.bf16.mxu0 %v3683_v13  ;;  %1146 = vmatprep.subr.bf16.mxu1 %v3685_v14  ;;  %v3715_v34 = vld [vmem:[%s4624_s21 + $0x1ec] ss:$16 sps:$4 sm:$0xff]   ;;  %v3717_v35 = vld [vmem:[%s4624_s21 + $0x1e0] ss:$16 sps:$4 sm:$0xff]   ;;  %v3718_v36 = vld [vmem:[%s4624_s21 + $0x1e8] ss:$16 sps:$4 sm:$0xff]  }
  0xb3   : > { %v3719_v37 = vld [vmem:[%s4624_s21 + $0x1c4] ss:$16 sps:$4 sm:$0xff]   ;;  %v3721_v38 = vld [vmem:[%s4624_s21 + $0x1cc] ss:$16 sps:$4 sm:$0xff]   ;;  %v3723_v39 = vld [vmem:[%s4624_s21 + $0x1c0] ss:$16 sps:$4 sm:$0xff]  }
  0xb4   : > { %v3724_v40 = vld [vmem:[%s4624_s21 + $0x1c8] ss:$16 sps:$4 sm:$0xff]   ;;  %v3725_v41 = vld [vmem:[%s4624_s21 + $0x1a4] ss:$16 sps:$4 sm:$0xff]   ;;  %v3727_v42 = vld [vmem:[%s4624_s21 + $0x1ac] ss:$16 sps:$4 sm:$0xff]  }
  0xb5   : > { %954 = vmatpush1.bf16.msra.mxu0 %v3687_v15  ;;  %1147 = vmatpush1.bf16.msra.mxu1 %v3688_v16  ;;  %v3729_v43 = vld [vmem:[%s4624_s21 + $0x1a0] ss:$16 sps:$4 sm:$0xff]   ;;  %v3730_v44 = vld [vmem:[%s4624_s21 + $0x1a8] ss:$16 sps:$4 sm:$0xff]   ;;  %v3731_v45 = vld [vmem:[%s4624_s21 + $0x184] ss:$16 sps:$4 sm:$0xff]  }
  0xb6   : > { %955 = vmatprep.subr.bf16.mxu0 %v3689_v17  ;;  %1148 = vmatprep.subr.bf16.mxu1 %v3691_v18  ;;  %v3733_v46 = vld [vmem:[%s4624_s21 + $0x18c] ss:$16 sps:$4 sm:$0xff]   ;;  %v3735_v49 = vld [vmem:[%s4624_s21 + $0x180] ss:$16 sps:$4 sm:$0xff]   ;;  %v3736_v50 = vld [vmem:[%s4624_s21 + $0x188] ss:$16 sps:$4 sm:$0xff]  }
  0xb7   : > { %v446_v47 = vld [vmem:[%s4616_s11 + $0x8] sm:$0xff]  ;;  %v448_v48 = vld [vmem:[%s4616_s11 + $0x18] sm:$0xff]  ;;  %v3737_v52 = vld [vmem:[%s4624_s21 + $0x164] ss:$16 sps:$4 sm:$0xff]   ;;  %p3525_p8 = scmp.ne.s32.totalorder %s4337_s24, 1 }
  0xb8   : > { %v510_v51 = vpack.c.bf16 %v448_v48, %v446_v47  ;;  %v3739_v53 = vld [vmem:[%s4624_s21 + $0x16c] ss:$16 sps:$4 sm:$0xff]   ;;  %v3741_v54 = vld [vmem:[%s4624_s21 + $0x160] ss:$16 sps:$4 sm:$0xff]   ;;  %v3742_v55 = vld [vmem:[%s4624_s21 + $0x168] ss:$16 sps:$4 sm:$0xff]  }
  0xb9   : > { %956 = vmatpush1.bf16.msra.mxu0 %v3693_v19  ;;  %1149 = vmatpush1.bf16.msra.mxu1 %v3694_v20  ;;  %v3743_v56 = vld [vmem:[%s4624_s21 + $0x144] ss:$16 sps:$4 sm:$0xff]   ;;  %v3745_v57 = vld [vmem:[%s4624_s21 + $0x14c] ss:$16 sps:$4 sm:$0xff]   ;;  %v3747_v58 = vld [vmem:[%s4624_s21 + $0x140] ss:$16 sps:$4 sm:$0xff]  }
  0xba   : > { %957 = vmatprep.subr.bf16.mxu0 %v3695_v21  ;;  %1150 = vmatprep.subr.bf16.mxu1 %v3697_v22  ;;  %v3748_v59 = vld [vmem:[%s4624_s21 + $0x148] ss:$16 sps:$4 sm:$0xff]   ;;  %v3749_v60 = vld [vmem:[%s4624_s21 + $0x124] ss:$16 sps:$4 sm:$0xff]   ;;  %v3751_v61 = vld [vmem:[%s4624_s21 + $0x12c] ss:$16 sps:$4 sm:$0xff]  }
  0xbb   : > { %979 = vmatprep.mubr.bf16.mxu0 %v510_v51  ;;  %1172 = vmatprep.mubr.bf16.mxu1 %v510_v51  ;;  %v3753_v62 = vld [vmem:[%s4624_s21 + $0x120] ss:$16 sps:$4 sm:$0xff]   ;;  %v3754_v63 = vld [vmem:[%s4624_s21 + $0x128] ss:$16 sps:$4 sm:$0xff]   ;;  %v3755_v0 = vld [vmem:[%s4624_s21 + $0x104] ss:$16 sps:$4 sm:$0xff]  }
  0xbc   : > { %v3757_v1 = vld [vmem:[%s4624_s21 + $0x10c] ss:$16 sps:$4 sm:$0xff]   ;;  %v3759_v2 = vld [vmem:[%s4624_s21 + $0x100] ss:$16 sps:$4 sm:$0xff]   ;;  %v3760_v3 = vld [vmem:[%s4624_s21 + $0x108] ss:$16 sps:$4 sm:$0xff]  }
  0xbd   : > { %958 = vmatpush1.bf16.msra.mxu0 %v3699_v23  ;;  %1151 = vmatpush1.bf16.msra.mxu1 %v3700_v24  ;;  %v445_v4 = vld [vmem:[%s4616_s11] sm:$0xff]  ;;  %v447_v5 = vld [vmem:[%s4616_s11 + $0x10] sm:$0xff]  ;;  %v450_v6 = vld [vmem:[%s4616_s11 + $0x28] sm:$0xff]  ;;  %s6353_s7 = sld [smem:[#allocation38_spill]] (!%p3525_p8) }
  0xbe   : > { %959 = vmatprep.subr.bf16.mxu0 %v3701_v25  ;;  %1152 = vmatprep.subr.bf16.mxu1 %v3703_v26  ;;  %v452_v7 = vld [vmem:[%s4616_s11 + $0x38] sm:$0xff]  ;;  %v509_v10 = vpack.c.bf16 %v447_v5, %v445_v4  ;;  %v449_v14 = vld [vmem:[%s4616_s11 + $0x20] sm:$0xff]  ;;  %v3769_v15 = vld [vmem:[%s4632_s18 + $0x64] ss:$8 sps:$4 sm:$0xff]  }
  0xbf   : > { %v3763_v8 = vld [vmem:[%s4632_s18 + $0x74] ss:$8 sps:$4 sm:$0xff]   ;;  %v512_v11 = vpack.c.bf16 %v452_v7, %v450_v6  ;;  %v3761_v12 = vld [vmem:[%s4632_s18 + $0x70] ss:$8 sps:$4 sm:$0xff]   ;;  %v3772_v16 = vld [vmem:[%s4632_s18 + $0x164] ss:$8 sps:$4 sm:$0xff]  }
  0xc0   : > { %v3766_v9 = vld [vmem:[%s4632_s18 + $0x174] ss:$8 sps:$4 sm:$0xff]   ;;  %v3764_v13 = vld [vmem:[%s4632_s18 + $0x170] ss:$8 sps:$4 sm:$0xff]   ;;  %v451_v17 = vld [vmem:[%s4616_s11 + $0x30] sm:$0xff] }
  0xc1   : > { %960 = vmatpush1.bf16.msra.mxu0 %v3705_v27  ;;  %1153 = vmatpush1.bf16.msra.mxu1 %v3706_v28  ;;  %v454_v18 = vld [vmem:[%s4616_s11 + $0x48] sm:$0xff]  ;;  %v456_v19 = vld [vmem:[%s4616_s11 + $0x58] sm:$0xff]  ;;  %v511_v24 = vpack.c.bf16 %v451_v17, %v449_v14  ;;  %v453_v28 = vld [vmem:[%s4616_s11 + $0x40] sm:$0xff] }
  0xc2   : > { %961 = vmatprep.subr.bf16.mxu0 %v3707_v29  ;;  %1154 = vmatprep.subr.bf16.mxu1 %v3709_v30  ;;  %v3767_v20 = vld [vmem:[%s4632_s18 + $0x60] ss:$8 sps:$4 sm:$0xff]   ;;  %v3775_v22 = vld [vmem:[%s4632_s18 + $0x54] ss:$8 sps:$4 sm:$0xff]   ;;  %v514_v25 = vpack.c.bf16 %v456_v19, %v454_v18  ;;  %v3773_v26 = vld [vmem:[%s4632_s18 + $0x50] ss:$8 sps:$4 sm:$0xff]  }
  0xc3   : > { %v3770_v21 = vld [vmem:[%s4632_s18 + $0x160] ss:$8 sps:$4 sm:$0xff]   ;;  %v3778_v23 = vld [vmem:[%s4632_s18 + $0x154] ss:$8 sps:$4 sm:$0xff]   ;;  %v3776_v27 = vld [vmem:[%s4632_s18 + $0x150] ss:$8 sps:$4 sm:$0xff]  }
  0xc4   : > { %v455_v29 = vld [vmem:[%s4616_s11 + $0x50] sm:$0xff]  ;;  %v464_v47 = vld [vmem:[%s4616_s11 + $0x98] sm:$0xff]  ;;  %v465_v6 = vld [vmem:[%s4616_s11 + $0xa0] sm:$0xff] }
  0xc5   : > { %962 = vmatpush1.bf16.msra.mxu0 %v3711_v31  ;;  %1155 = vmatpush1.bf16.msra.mxu1 %v3712_v32  ;;  %v3781_v30 = vld [vmem:[%s4632_s18 + $0x44] ss:$8 sps:$4 sm:$0xff]   ;;  %v3791_v48 = vld [vmem:[%s4632_s18 + $0x20] ss:$8 sps:$4 sm:$0xff]   ;;  %v3802_v51 = vld [vmem:[%s4632_s18 + $0x114] ss:$8 sps:$4 sm:$0xff]  }
  0xc6   : > { %963 = vmatprep.subr.bf16.mxu0 %v3713_v33  ;;  %1156 = vmatprep.subr.bf16.mxu1 %v3715_v34  ;;  %v3784_v31 = vld [vmem:[%s4632_s18 + $0x144] ss:$8 sps:$4 sm:$0xff]   ;;  %v460_v33 = vld [vmem:[%s4616_s11 + $0x78] sm:$0xff]  ;;  %v3779_v34 = vld [vmem:[%s4632_s18 + $0x40] ss:$8 sps:$4 sm:$0xff]  }
  0xc7   : > { %v458_v32 = vld [vmem:[%s4616_s11 + $0x68] sm:$0xff]  ;;  %v3809_v4 = vld [vmem:[%s4632_s18 + $0xf0] ss:$8 sps:$4 sm:$0xff]   ;;  %v467_v7 = vld [vmem:[%s4616_s11 + $0xb0] sm:$0xff] }
  0xc8   : > { %v3812_v5 = vld [vmem:[%s4632_s18 + $0x1f0] ss:$8 sps:$4 sm:$0xff]   ;;  %v3823_v14 = vld [vmem:[%s4632_s18 + $0xd4] ss:$8 sps:$4 sm:$0xff]  }
  0xc9   : > { %964 = vmatpush2.bf16.msra.mxu0 %v3717_v35  ;;  %1157 = vmatpush2.bf16.msra.mxu1 %v3718_v36  ;;  %v3782_v35 = vld [vmem:[%s4632_s18 + $0x140] ss:$8 sps:$4 sm:$0xff]   ;;  %v3787_v36 = vld [vmem:[%s4632_s18 + $0x34] ss:$8 sps:$4 sm:$0xff]   ;;  %v3821_v18 = vld [vmem:[%s4632_s18 + $0xd0] ss:$8 sps:$4 sm:$0xff]  }
  0xca   : > { %965 = vmatprep.subr.bf16.mxu0 %v3719_v37  ;;  %1158 = vmatprep.subr.bf16.mxu1 %v3721_v38  ;;  %v3790_v37 = vld [vmem:[%s4632_s18 + $0x134] ss:$8 sps:$4 sm:$0xff]   ;;  %v513_v38 = vpack.c.bf16 %v455_v29, %v453_v28  ;;  %v3824_v19 = vld [vmem:[%s4632_s18 + $0x1d0] ss:$8 sps:$4 sm:$0xff]  }
  0xcb   : > { %v3835_v28 = vld [vmem:[%s4632_s18 + $0xb4] ss:$8 sps:$4 sm:$0xff]  }
  0xcc   : > { %v3838_v29 = vld [vmem:[%s4632_s18 + $0x1b4] ss:$8 sps:$4 sm:$0xff]  }
  0xcd   : > { %966 = vmatpush2.bf16.msra.mxu0 %v3723_v39  ;;  %1159 = vmatpush2.bf16.msra.mxu1 %v3724_v40  ;;  %v516_v39 = vpack.c.bf16 %v460_v33, %v458_v32  ;;  %v3785_v40 = vld [vmem:[%s4632_s18 + $0x30] ss:$8 sps:$4 sm:$0xff]  }
  0xce   : > { %967 = vmatprep.subr.bf16.mxu0 %v3725_v41  ;;  %1160 = vmatprep.subr.bf16.mxu1 %v3727_v42  ;;  %v3788_v41 = vld [vmem:[%s4632_s18 + $0x130] ss:$8 sps:$4 sm:$0xff]  }
  0xcf   : > { %v457_v42 = vld [vmem:[%s4616_s11 + $0x60] sm:$0xff] }
  0xd0   : > { %v3833_v32 = vld [vmem:[%s4632_s18 + $0xb0] ss:$8 sps:$4 sm:$0xff]  }
  0xd1   : > { %968 = vmatpush2.bf16.msra.mxu0 %v3729_v43  ;;  %1161 = vmatpush2.bf16.msra.mxu1 %v3730_v44  ;;  %v459_v43 = vld [vmem:[%s4616_s11 + $0x70] sm:$0xff]  ;;  %v3836_v33 = vld [vmem:[%s4632_s18 + $0x1b0] ss:$8 sps:$4 sm:$0xff]  }
  0xd2   : > { %969 = vmatprep.subr.bf16.mxu0 %v3731_v45  ;;  %1162 = vmatprep.subr.bf16.mxu1 %v3733_v46  ;;  %v3793_v44 = vld [vmem:[%s4632_s18 + $0x24] ss:$8 sps:$4 sm:$0xff]  }
  0xd3   : > { %v3796_v45 = vld [vmem:[%s4632_s18 + $0x124] ss:$8 sps:$4 sm:$0xff]  }
  0xd4   : > { %v462_v46 = vld [vmem:[%s4616_s11 + $0x88] sm:$0xff] }
  0xd5   : > { %970 = vmatpush2.bf16.msra.mxu0 %v3735_v49  ;;  %1163 = vmatpush2.bf16.msra.mxu1 %v3736_v50  ;;  %v3794_v49 = vld [vmem:[%s4632_s18 + $0x120] ss:$8 sps:$4 sm:$0xff]   ;;  %v3799_v50 = vld [vmem:[%s4632_s18 + $0x14] ss:$8 sps:$4 sm:$0xff]  }
  0xd6   : > { %971 = vmatprep.subr.bf16.mxu0 %v3737_v52  ;;  %1164 = vmatprep.subr.bf16.mxu1 %v3739_v53  ;;  %v515_v52 = vpack.c.bf16 %v459_v43, %v457_v42  ;;  %v518_v53 = vpack.c.bf16 %v464_v47, %v462_v46  ;;  %v482_v42 = vld [vmem:[%s4616_s11 + $0x128] sm:$0xff]  ;;  %v484_v43 = vld [vmem:[%s4616_s11 + $0x138] sm:$0xff]  ;;  %v481_v46 = vld [vmem:[%s4616_s11 + $0x120] sm:$0xff] }
  0xd7   : > { %v483_v47 = vld [vmem:[%s4616_s11 + $0x130] sm:$0xff] }
  0xd9   : > { %972 = vmatpush2.bf16.msra.mxu0 %v3741_v54  ;;  %1165 = vmatpush2.bf16.msra.mxu1 %v3742_v55  ;;  %v3797_v54 = vld [vmem:[%s4632_s18 + $0x10] ss:$8 sps:$4 sm:$0xff]  }
  0xda   : > { %973 = vmatprep.subr.bf16.mxu0 %v3743_v56  ;;  %1166 = vmatprep.subr.bf16.mxu1 %v3745_v57  ;;  %v3800_v55 = vld [vmem:[%s4632_s18 + $0x110] ss:$8 sps:$4 sm:$0xff]   ;;  %v463_v57 = vld [vmem:[%s4616_s11 + $0x90] sm:$0xff] }
  0xdb   : > { %v461_v56 = vld [vmem:[%s4616_s11 + $0x80] sm:$0xff] }
  0xdd   : > { %974 = vmatpush2.bf16.msra.mxu0 %v3747_v58  ;;  %1167 = vmatpush2.bf16.msra.mxu1 %v3748_v59  ;;  %v3805_v58 = vld [vmem:[%s4632_s18 + $0x4] ss:$8 sps:$4 sm:$0xff]  }
  0xde   : > { %975 = vmatprep.subr.bf16.mxu0 %v3749_v60  ;;  %1168 = vmatprep.subr.bf16.mxu1 %v3751_v61  ;;  %v3808_v59 = vld [vmem:[%s4632_s18 + $0x104] ss:$8 sps:$4 sm:$0xff]   ;;  %v468_v61 = vld [vmem:[%s4616_s11 + $0xb8] sm:$0xff] }
  0xdf   : > { %v466_v60 = vld [vmem:[%s4616_s11 + $0xa8] sm:$0xff] }
  0xe1   : > { %976 = vmatpush2.bf16.msra.mxu0 %v3753_v62  ;;  %1169 = vmatpush2.bf16.msra.mxu1 %v3754_v63  ;;  %v3803_v62 = vld [vmem:[%s4632_s18] ss:$8 sps:$4 sm:$0xff]  }
  0xe2   : > { %977 = vmatprep.subr.bf16.mxu0 %v3755_v0  ;;  %1170 = vmatprep.subr.bf16.mxu1 %v3757_v1  ;;  %v3806_v63 = vld [vmem:[%s4632_s18 + $0x100] ss:$8 sps:$4 sm:$0xff]   ;;  %v3811_v0 = vld [vmem:[%s4632_s18 + $0xf4] ss:$8 sps:$4 sm:$0xff]  }
  0xe3   : > { %v3814_v1 = vld [vmem:[%s4632_s18 + $0x1f4] ss:$8 sps:$4 sm:$0xff]  }
  0xe5   : > { %978 = vmatpush2.bf16.msra.mxu0 %v3759_v2  ;;  %1171 = vmatpush2.bf16.msra.mxu1 %v3760_v3  ;;  %v517_v2 = vpack.c.bf16 %v463_v57, %v461_v56  ;;  %v520_v3 = vpack.c.bf16 %v468_v61, %v466_v60  ;;  %v494_v60 = vld [vmem:[%s4616_s11 + $0x188] sm:$0xff]  ;;  %v496_v61 = vld [vmem:[%s4616_s11 + $0x198] sm:$0xff] }
  0xe6   : > { %2485 = vmatprep.subr.bf16.mxu0 %v3763_v8  ;;  %2678 = vmatprep.subr.bf16.mxu1 %v3766_v9  ;;  %v3817_v8 = vld [vmem:[%s4632_s18 + $0xe4] ss:$8 sps:$4 sm:$0xff]  }
  0xe7   : > { %v3820_v9 = vld [vmem:[%s4632_s18 + $0x1e4] ss:$8 sps:$4 sm:$0xff]  }
  0xe8   : > { %980 = vmatmul.mubr.bf16.vlgmr.msra.gmra.mxu0 %v509_v10  ;;  %1173 = vmatmul.mubr.bf16.vlgmr.msra.gmra.mxu1 %v509_v10  ;;  %v470_v10 = vld [vmem:[%s4616_s11 + $0xc8] sm:$0xff] }
  0xe9   : > { %989 = vmatprep.mubr.bf16.mxu0 %v512_v11  ;;  %1182 = vmatprep.mubr.bf16.mxu1 %v512_v11  ;;  %v472_v11 = vld [vmem:[%s4616_s11 + $0xd8] sm:$0xff] }
  0xea   : > { %2486 = vmatpush1.bf16.msra.mxu0 %v3761_v12  ;;  %2679 = vmatpush1.bf16.msra.mxu1 %v3764_v13  ;;  %v3815_v12 = vld [vmem:[%s4632_s18 + $0xe0] ss:$8 sps:$4 sm:$0xff]   ;;  %v522_v17 = vpack.c.bf16 %v472_v11, %v470_v10  ;;  %v3845_v10 = vld [vmem:[%s4632_s18 + $0x90] ss:$8 sps:$4 sm:$0xff]  }
  0xeb   : > { %2487 = vmatprep.subr.bf16.mxu0 %v3769_v15  ;;  %2680 = vmatprep.subr.bf16.mxu1 %v3772_v16  ;;  %v3818_v13 = vld [vmem:[%s4632_s18 + $0x1e0] ss:$8 sps:$4 sm:$0xff]   ;;  %v3826_v15 = vld [vmem:[%s4632_s18 + $0x1d4] ss:$8 sps:$4 sm:$0xff]   ;;  %v519_v16 = vpack.c.bf16 %v467_v7, %v465_v6  ;;  %v3848_v11 = vld [vmem:[%s4632_s18 + $0x190] ss:$8 sps:$4 sm:$0xff]  }
  0xec   : > { %v498_v6 = vld [vmem:[%s4616_s11 + $0x1a8] sm:$0xff]  ;;  %v3847_v7 = vld [vmem:[%s4632_s18 + $0x94] ss:$8 sps:$4 sm:$0xff]  }
  0xee   : > { %2488 = vmatpush1.bf16.msra.mxu0 %v3767_v20  ;;  %2681 = vmatpush1.bf16.msra.mxu1 %v3770_v21  ;;  %v3829_v20 = vld [vmem:[%s4632_s18 + $0xc4] ss:$8 sps:$4 sm:$0xff]  }
  0xef   : > { %2489 = vmatprep.subr.bf16.mxu0 %v3775_v22  ;;  %2682 = vmatprep.subr.bf16.mxu1 %v3778_v23  ;;  %v3832_v21 = vld [vmem:[%s4632_s18 + $0x1c4] ss:$8 sps:$4 sm:$0xff]   ;;  %v469_v22 = vld [vmem:[%s4616_s11 + $0xc0] sm:$0xff] }
  0xf0   : > { %990 = vmatmul.mubr.bf16.gmra.mxu0 %v511_v24  ;;  %1183 = vmatmul.mubr.bf16.gmra.mxu1 %v511_v24  ;;  %v471_v23 = vld [vmem:[%s4616_s11 + $0xd0] sm:$0xff]  ;;  %v474_v24 = vld [vmem:[%s4616_s11 + $0xe8] sm:$0xff] }
  0xf1   : > { %999 = vmatprep.mubr.bf16.mxu0 %v514_v25  ;;  %1192 = vmatprep.mubr.bf16.mxu1 %v514_v25  ;;  %v476_v25 = vld [vmem:[%s4616_s11 + $0xf8] sm:$0xff] }
  0xf2   : > { %2490 = vmatpush1.bf16.msra.mxu0 %v3773_v26  ;;  %2683 = vmatpush1.bf16.msra.mxu1 %v3776_v27  ;;  %v3827_v26 = vld [vmem:[%s4632_s18 + $0xc0] ss:$8 sps:$4 sm:$0xff]  }
  0xf3   : > { %2491 = vmatprep.subr.bf16.mxu0 %v3781_v30  ;;  %2684 = vmatprep.subr.bf16.mxu1 %v3784_v31  ;;  %v3830_v27 = vld [vmem:[%s4632_s18 + $0x1c0] ss:$8 sps:$4 sm:$0xff]   ;;  %v521_v30 = vpack.c.bf16 %v471_v23, %v469_v22  ;;  %v524_v31 = vpack.c.bf16 %v476_v25, %v474_v24  ;;  %v501_v24 = vld [vmem:[%s4616_s11 + $0x1c0] sm:$0xff] }
  0xf4   : > { %v3854_v22 = vld [vmem:[%s4632_s18 + $0x180] ss:$8 sps:$4 sm:$0xff]  }
  0xf5   : > { %v503_v25 = vld [vmem:[%s4616_s11 + $0x1d0] sm:$0xff] }
  0xf6   : > { %2492 = vmatpush1.bf16.msra.mxu0 %v3779_v34  ;;  %2685 = vmatpush1.bf16.msra.mxu1 %v3782_v35  ;;  %v473_v34 = vld [vmem:[%s4616_s11 + $0xe0] sm:$0xff]  ;;  %v475_v35 = vld [vmem:[%s4616_s11 + $0xf0] sm:$0xff] }
  0xf7   : > { %2493 = vmatprep.subr.bf16.mxu0 %v3787_v36  ;;  %2686 = vmatprep.subr.bf16.mxu1 %v3790_v37  ;;  %v478_v36 = vld [vmem:[%s4616_s11 + $0x108] sm:$0xff]  ;;  %v480_v37 = vld [vmem:[%s4616_s11 + $0x118] sm:$0xff] }
  0xf8   : > { %1000 = vmatmul.mubr.bf16.gmra.mxu0 %v513_v38  ;;  %1193 = vmatmul.mubr.bf16.gmra.mxu1 %v513_v38  ;;  %v523_v38 = vpack.c.bf16 %v475_v35, %v473_v34 }
  0xf9   : > { %1009 = vmatprep.mubr.bf16.mxu0 %v516_v39  ;;  %1202 = vmatprep.mubr.bf16.mxu1 %v516_v39  ;;  %v526_v39 = vpack.c.bf16 %v480_v37, %v478_v36  ;;  %v605_v36 = vld [vmem:[%s4630_s9] sm:$0xf] }
  0xfa   : > { %2494 = vmatpush1.bf16.msra.mxu0 %v3785_v40  ;;  %2687 = vmatpush1.bf16.msra.mxu1 %v3788_v41  ;;  %v477_v40 = vld [vmem:[%s4616_s11 + $0x100] sm:$0xff]  ;;  %v479_v41 = vld [vmem:[%s4616_s11 + $0x110] sm:$0xff] }
  0xfb   : > { %2495 = vmatprep.subr.bf16.mxu0 %v3793_v44  ;;  %2688 = vmatprep.subr.bf16.mxu1 %v3796_v45  ;;  %v525_v44 = vpack.c.bf16 %v479_v41, %v477_v40  ;;  %v528_v45 = vpack.c.bf16 %v484_v43, %v482_v42 }
  0xfe   : > { %2496 = vmatpush1.bf16.msra.mxu0 %v3791_v48  ;;  %2689 = vmatpush1.bf16.msra.mxu1 %v3794_v49  ;;  %v486_v48 = vld [vmem:[%s4616_s11 + $0x148] sm:$0xff]  ;;  %v488_v49 = vld [vmem:[%s4616_s11 + $0x158] sm:$0xff] }
  0xff   : > { %2497 = vmatprep.subr.bf16.mxu0 %v3799_v50  ;;  %2690 = vmatprep.subr.bf16.mxu1 %v3802_v51  ;;  %v527_v50 = vpack.c.bf16 %v483_v47, %v481_v46  ;;  %v530_v51 = vpack.c.bf16 %v488_v49, %v486_v48 }
 0x100   : > { %1010 = vmatmul.mubr.bf16.gmra.mxu0 %v515_v52  ;;  %1203 = vmatmul.mubr.bf16.gmra.mxu1 %v515_v52  ;;  %v485_v52 = vld [vmem:[%s4616_s11 + $0x140] sm:$0xff] }
 0x101   : > { %1019 = vmatprep.mubr.bf16.mxu0 %v518_v53  ;;  %1212 = vmatprep.mubr.bf16.mxu1 %v518_v53  ;;  %v487_v53 = vld [vmem:[%s4616_s11 + $0x150] sm:$0xff] }
 0x102   : > { %2498 = vmatpush1.bf16.msra.mxu0 %v3797_v54  ;;  %2691 = vmatpush1.bf16.msra.mxu1 %v3800_v55  ;;  %v490_v54 = vld [vmem:[%s4616_s11 + $0x168] sm:$0xff]  ;;  %v492_v55 = vld [vmem:[%s4616_s11 + $0x178] sm:$0xff]  ;;  %v529_v56 = vpack.c.bf16 %v487_v53, %v485_v52 }
 0x103   : > { %2499 = vmatprep.subr.bf16.mxu0 %v3805_v58  ;;  %2692 = vmatprep.subr.bf16.mxu1 %v3808_v59  ;;  %v532_v57 = vpack.c.bf16 %v492_v55, %v490_v54  ;;  %v489_v58 = vld [vmem:[%s4616_s11 + $0x160] sm:$0xff]  ;;  %v491_v59 = vld [vmem:[%s4616_s11 + $0x170] sm:$0xff] }
 0x106   : > { %2500 = vmatpush1.bf16.msra.mxu0 %v3803_v62  ;;  %2693 = vmatpush1.bf16.msra.mxu1 %v3806_v63  ;;  %v531_v62 = vpack.c.bf16 %v491_v59, %v489_v58  ;;  %v3841_v63 = vld [vmem:[%s4632_s18 + $0xa4] ss:$8 sps:$4 sm:$0xff]  }
 0x107   : > { %2501 = vmatprep.subr.bf16.mxu0 %v3811_v0  ;;  %2694 = vmatprep.subr.bf16.mxu1 %v3814_v1  ;;  %v3844_v0 = vld [vmem:[%s4632_s18 + $0x1a4] ss:$8 sps:$4 sm:$0xff]   ;;  %v534_v1 = vpack.c.bf16 %v496_v61, %v494_v60 }
 0x108   : > { %1020 = vmatmul.mubr.bf16.gmra.mxu0 %v517_v2  ;;  %1213 = vmatmul.mubr.bf16.gmra.mxu1 %v517_v2  ;;  %v3839_v2 = vld [vmem:[%s4632_s18 + $0xa0] ss:$8 sps:$4 sm:$0xff]  }
 0x109   : > { %1029 = vmatprep.mubr.bf16.mxu0 %v520_v3  ;;  %1222 = vmatprep.mubr.bf16.mxu1 %v520_v3  ;;  %v3842_v3 = vld [vmem:[%s4632_s18 + $0x1a0] ss:$8 sps:$4 sm:$0xff]  }
 0x10a   : > { %2502 = vmatpush2.bf16.msra.mxu0 %v3809_v4  ;;  %2695 = vmatpush2.bf16.msra.mxu1 %v3812_v5  ;;  %v493_v4 = vld [vmem:[%s4616_s11 + $0x180] sm:$0xff]  ;;  %v495_v5 = vld [vmem:[%s4616_s11 + $0x190] sm:$0xff] }
 0x10b   : > { %2503 = vmatprep.subr.bf16.mxu0 %v3817_v8  ;;  %2696 = vmatprep.subr.bf16.mxu1 %v3820_v9  ;;  %v3850_v8 = vld [vmem:[%s4632_s18 + $0x194] ss:$8 sps:$4 sm:$0xff]  }
 0x10c   : > { %v500_v9 = vld [vmem:[%s4616_s11 + $0x1b8] sm:$0xff] }
 0x10e   : > { %2504 = vmatpush2.bf16.msra.mxu0 %v3815_v12  ;;  %2697 = vmatpush2.bf16.msra.mxu1 %v3818_v13  ;;  %v533_v12 = vpack.c.bf16 %v495_v5, %v493_v4  ;;  %v536_v13 = vpack.c.bf16 %v500_v9, %v498_v6 }
 0x10f   : > { %2505 = vmatprep.subr.bf16.mxu0 %v3823_v14  ;;  %2698 = vmatprep.subr.bf16.mxu1 %v3826_v15  ;;  %v497_v14 = vld [vmem:[%s4616_s11 + $0x1a0] sm:$0xff]  ;;  %v499_v15 = vld [vmem:[%s4616_s11 + $0x1b0] sm:$0xff] }
 0x110   : > { %1030 = vmatmul.mubr.bf16.gmra.mxu0 %v519_v16  ;;  %1223 = vmatmul.mubr.bf16.gmra.mxu1 %v519_v16  ;;  %v502_v16 = vld [vmem:[%s4616_s11 + $0x1c8] sm:$0xff] }
 0x111   : > { %1039 = vmatprep.mubr.bf16.mxu0 %v522_v17  ;;  %1232 = vmatprep.mubr.bf16.mxu1 %v522_v17  ;;  %v504_v17 = vld [vmem:[%s4616_s11 + $0x1d8] sm:$0xff] }
 0x112   : > { %2506 = vmatpush2.bf16.msra.mxu0 %v3821_v18  ;;  %2699 = vmatpush2.bf16.msra.mxu1 %v3824_v19  ;;  %v3853_v18 = vld [vmem:[%s4632_s18 + $0x84] ss:$8 sps:$4 sm:$0xff]   ;;  %v538_v23 = vpack.c.bf16 %v504_v17, %v502_v16 }
 0x113   : > { %2507 = vmatprep.subr.bf16.mxu0 %v3829_v20  ;;  %2700 = vmatprep.subr.bf16.mxu1 %v3832_v21  ;;  %v3856_v19 = vld [vmem:[%s4632_s18 + $0x184] ss:$8 sps:$4 sm:$0xff]   ;;  %v535_v20 = vpack.c.bf16 %v499_v15, %v497_v14  ;;  %v3851_v21 = vld [vmem:[%s4632_s18 + $0x80] ss:$8 sps:$4 sm:$0xff]  }
 0x116   : > { %2508 = vmatpush2.bf16.msra.mxu0 %v3827_v26  ;;  %2701 = vmatpush2.bf16.msra.mxu1 %v3830_v27  ;;  %v506_v26 = vld [vmem:[%s4616_s11 + $0x1e8] sm:$0xff]  ;;  %v508_v27 = vld [vmem:[%s4616_s11 + $0x1f8] sm:$0xff] }
 0x117   : > { %2509 = vmatprep.subr.bf16.mxu0 %v3835_v28  ;;  %2702 = vmatprep.subr.bf16.mxu1 %v3838_v29  ;;  %v537_v28 = vpack.c.bf16 %v503_v25, %v501_v24  ;;  %v540_v29 = vpack.c.bf16 %v508_v27, %v506_v26 }
 0x118   : > { %1040 = vmatmul.mubr.bf16.gmra.mxu0 %v521_v30  ;;  %1233 = vmatmul.mubr.bf16.gmra.mxu1 %v521_v30  ;;  %v505_v30 = vld [vmem:[%s4616_s11 + $0x1e0] sm:$0xff] }
 0x119   : > { %1049 = vmatprep.mubr.bf16.mxu0 %v524_v31  ;;  %1242 = vmatprep.mubr.bf16.mxu1 %v524_v31  ;;  %v507_v31 = vld [vmem:[%s4616_s11 + $0x1f0] sm:$0xff] }
 0x11a   : > { %2510 = vmatpush2.bf16.msra.mxu0 %v3833_v32  ;;  %2703 = vmatpush2.bf16.msra.mxu1 %v3836_v33  ;;  %v539_v32 = vpack.c.bf16 %v507_v31, %v505_v30  ;;  %v607_v33 = vlaneseq }
 0x11b   : > { %2511 = vmatprep.subr.bf16.mxu0 %v3841_v63  ;;  %2704 = vmatprep.subr.bf16.mxu1 %v3844_v0 }
 0x11c   : > { %v4897_v34 = vshrl.u32 %v607_v33, 7 }
 0x11e   : > { %2512 = vmatpush2.bf16.msra.mxu0 %v3839_v2  ;;  %2705 = vmatpush2.bf16.msra.mxu1 %v3842_v3  ;;  %6330 = vst [vmem:[#allocation27_spill] sm:$0xff] %v4897_v34  ;;  %v6296_v35 = vsub.s32 0, %v4897_v34  ;;  %v617_v37 = vsub.s32 2, %v4897_v34 }
 0x11f   : > { %2513 = vmatprep.subr.bf16.mxu0 %v3847_v7  ;;  %2706 = vmatprep.subr.bf16.mxu1 %v3850_v8 }
 0x120   : > { %1050 = vmatmul.mubr.bf16.gmra.mxu0 %v523_v38  ;;  %1243 = vmatmul.mubr.bf16.gmra.mxu1 %v523_v38  ;;  %v6295_v38 = vsub.s32 1, %v4897_v34  ;;  %v4906_v40 = vrot.slane %v605_v36, %v6296_v35  ;;  %v4908_v43 = vrot.slane %v605_v36, %v617_v37 }
 0x121   : > { %1059 = vmatprep.mubr.bf16.mxu0 %v526_v39  ;;  %1252 = vmatprep.mubr.bf16.mxu1 %v526_v39  ;;  %v621_v39 = vsub.s32 3, %v4897_v34 }
 0x122   : > { %2514 = vmatpush2.bf16.msra.mxu0 %v3845_v10  ;;  %2707 = vmatpush2.bf16.msra.mxu1 %v3848_v11 }
 0x123   : > { %2515 = vmatprep.subr.bf16.mxu0 %v3853_v18  ;;  %2708 = vmatprep.subr.bf16.mxu1 %v3856_v19  ;;  %v4914_v47 = vrot.slane %v605_v36, %v621_v39 }
 0x126   : > { %2516 = vmatpush2.bf16.msra.mxu0 %v3851_v21  ;;  %2709 = vmatpush2.bf16.msra.mxu1 %v3854_v22 }
 0x128   : > { %1060 = vmatmul.mubr.bf16.gmra.mxu0 %v525_v44  ;;  %1253 = vmatmul.mubr.bf16.gmra.mxu1 %v525_v44  ;;  %v4912_v44 = vrot.slane %v605_v36, %v6295_v38 }
 0x129   : > { %1069 = vmatprep.mubr.bf16.mxu0 %v528_v45  ;;  %1262 = vmatprep.mubr.bf16.mxu1 %v528_v45 }
 0x130   : > { %1070 = vmatmul.mubr.bf16.gmra.mxu0 %v527_v50  ;;  %1263 = vmatmul.mubr.bf16.gmra.mxu1 %v527_v50 }
 0x131   : > { %1079 = vmatprep.mubr.bf16.mxu0 %v530_v51  ;;  %1272 = vmatprep.mubr.bf16.mxu1 %v530_v51 }
 0x138   : > { %1080 = vmatmul.mubr.bf16.gmra.mxu0 %v529_v56  ;;  %1273 = vmatmul.mubr.bf16.gmra.mxu1 %v529_v56 }
 0x139   : > { %1089 = vmatprep.mubr.bf16.mxu0 %v532_v57  ;;  %1282 = vmatprep.mubr.bf16.mxu1 %v532_v57 }
 0x140   : > { %1090 = vmatmul.mubr.bf16.gmra.mxu0 %v531_v62  ;;  %1283 = vmatmul.mubr.bf16.gmra.mxu1 %v531_v62 }
 0x141   : > { %1099 = vmatprep.mubr.bf16.mxu0 %v534_v1  ;;  %1292 = vmatprep.mubr.bf16.mxu1 %v534_v1 }
 0x148   : > { %1100 = vmatmul.mubr.bf16.gmra.mxu0 %v533_v12  ;;  %1293 = vmatmul.mubr.bf16.gmra.mxu1 %v533_v12 }
 0x149   : > { %1109 = vmatprep.mubr.bf16.mxu0 %v536_v13  ;;  %1302 = vmatprep.mubr.bf16.mxu1 %v536_v13 }
 0x150   : > { %1110 = vmatmul.mubr.bf16.gmra.mxu0 %v535_v20  ;;  %1303 = vmatmul.mubr.bf16.gmra.mxu1 %v535_v20 }
 0x151   : > { %1119 = vmatprep.mubr.bf16.mxu0 %v538_v23  ;;  %1312 = vmatprep.mubr.bf16.mxu1 %v538_v23 }
 0x158   : > { %1120 = vmatmul.mubr.bf16.gmra.mxu0 %v537_v28  ;;  %1313 = vmatmul.mubr.bf16.gmra.mxu1 %v537_v28 }
 0x159   : > { %1129 = vmatprep.mubr.bf16.mxu0 %v540_v29  ;;  %1322 = vmatprep.mubr.bf16.mxu1 %v540_v29 }
 0x160   : > { %1130 = vmatmul.mubr.bf16.gmra.mxu0 %v539_v32  ;;  %1323 = vmatmul.mubr.bf16.gmra.mxu1 %v539_v32 }
 0x1a8   : > { %v981_v41 = vpop.f32.mrf.mxu0  ;;  %v1174_v42 = vpop.f32.mrf.mxu1 }
 0x1a9   : > { %v982_v48 = vadd.f32 %v981_v41, %v4906_v40  ;;  %v1175_v51 = vadd.f32 %v1174_v42, %v4908_v43 }
 0x1aa   : > { %v983_v45 = vpop.f32.mrf.mxu0  ;;  %v1176_v46 = vpop.f32.mrf.mxu1 }
 0x1ab   : > { %v984_v52 = vadd.f32 %v983_v45, %v4912_v44  ;;  %v1177_v55 = vadd.f32 %v1176_v46, %v4914_v47  ;;  %v1461_v56 = vmul.f32 0.70710677, %v982_v48  ;;  %v1463_v60 = vmul.f32 0.70710677, %v1175_v51 }
 0x1ac   : > { %v985_v49 = vpop.f32.mrf.mxu0  ;;  %v1178_v50 = vpop.f32.mrf.mxu1  ;;  %v1333_v30 = vmul.f32 0.5, %v982_v48  ;;  %v1335_v33 = vmul.f32 0.5, %v1175_v51 }
 0x1ad   : > { %v986_v57 = vadd.f32 %v985_v49, %v4906_v40  ;;  %v1462_v61 = vmul.f32 0.70710677, %v984_v52  ;;  %v1179_v62 = vadd.f32 %v1178_v50, %v4908_v43  ;;  %v1464_v1 = vmul.f32 0.70710677, %v1177_v55 }
 0x1ae   : > { %v987_v53 = vpop.f32.mrf.mxu0  ;;  %v1180_v54 = vpop.f32.mrf.mxu1  ;;  %3857 = verf.f32 %v1461_v56  ;;  %v1334_v36 = vmul.f32 0.5, %v984_v52  ;;  %v4937_v37 = vmul.f32 0.5, %v1177_v55 }
 0x1af   : > { %v988_v2 = vadd.f32 %v987_v53, %v4912_v44  ;;  %v1465_v3 = vmul.f32 0.70710677, %v986_v57  ;;  %v1181_v4 = vadd.f32 %v1180_v54, %v4914_v47  ;;  %3859 = verf.f32 %v1463_v60 }
 0x1b0   : > { %v991_v58 = vpop.f32.mrf.mxu0  ;;  %v1184_v59 = vpop.f32.mrf.mxu1  ;;  %3861 = verf.f32 %v1462_v61  ;;  %v1467_v8 = vmul.f32 0.70710677, %v1179_v62  ;;  %v4944_v46 = vmul.f32 0.5, %v986_v57  ;;  %v4946_v49 = vmul.f32 0.5, %v1179_v62 }
 0x1b1   : > { %v992_v7 = vadd.f32 %v991_v58, %v4906_v40  ;;  %v1185_v9 = vadd.f32 %v1184_v59, %v4908_v43  ;;  %3863 = verf.f32 %v1464_v1  ;;  %v1466_v12 = vmul.f32 0.70710677, %v988_v2 }
 0x1b2   : > { %v993_v63 = vpop.f32.mrf.mxu0  ;;  %v1186_v0 = vpop.f32.mrf.mxu1  ;;  %3865 = verf.f32 %v1465_v3  ;;  %v1468_v14 = vmul.f32 0.70710677, %v1181_v4  ;;  %v4949_v53 = vmul.f32 0.5, %v988_v2  ;;  %v4951_v51 = vmul.f32 0.5, %v1181_v4 }
 0x1b3   : > { %v994_v13 = vadd.f32 %v993_v63, %v4912_v44  ;;  %v1469_v17 = vmul.f32 0.70710677, %v992_v7  ;;  %v1187_v18 = vadd.f32 %v1186_v0, %v4914_v47  ;;  %3867 = verf.f32 %v1467_v8 }
 0x1b4   : > { %v995_v5 = vpop.f32.mrf.mxu0  ;;  %v1188_v6 = vpop.f32.mrf.mxu1  ;;  %v1471_v19 = vmul.f32 0.70710677, %v1185_v9  ;;  %3869 = verf.f32 %v1466_v12  ;;  %v4953_v52 = vmul.f32 0.5, %v992_v7  ;;  %v4959_v57 = vmul.f32 0.5, %v1185_v9 }
 0x1b5   : > { %v1470_v22 = vmul.f32 0.70710677, %v994_v13  ;;  %v996_v23 = vadd.f32 %v995_v5, %v4906_v40  ;;  %3871 = verf.f32 %v1468_v14  ;;  %v1472_v26 = vmul.f32 0.70710677, %v1187_v18 }
 0x1b6   : > { %v997_v10 = vpop.f32.mrf.mxu0  ;;  %v1190_v11 = vpop.f32.mrf.mxu1  ;;  %3873 = verf.f32 %v1469_v17  ;;  %v1189_v27 = vadd.f32 %v1188_v6, %v4908_v43  ;;  %v4962_v62 = vmul.f32 0.5, %v994_v13  ;;  %v4964_v63 = vmul.f32 0.5, %v1187_v18 }
 0x1b7   : > { %3875 = verf.f32 %v1471_v19  ;;  %v1473_v31 = vmul.f32 0.70710677, %v996_v23  ;;  %v998_v32 = vadd.f32 %v997_v10, %v4912_v44  ;;  %v1191_v39 = vadd.f32 %v1190_v11, %v4914_v47 }
 0x1b8   : > { %v1001_v15 = vpop.f32.mrf.mxu0  ;;  %v1194_v16 = vpop.f32.mrf.mxu1  ;;  %3877 = verf.f32 %v1470_v22  ;;  %v1475_v54 = vmul.f32 0.70710677, %v1189_v27  ;;  %v4966_v0 = vmul.f32 0.5, %v996_v23  ;;  %v4972_v6 = vmul.f32 0.5, %v1189_v27 }
 0x1b9   : > { %3879 = verf.f32 %v1472_v26  ;;  %v1002_v48 = vadd.f32 %v1001_v15, %v4906_v40  ;;  %v1474_v59 = vmul.f32 0.70710677, %v998_v32  ;;  %v1195_v60 = vadd.f32 %v1194_v16, %v4908_v43 }
 0x1ba   : > { %v1003_v20 = vpop.f32.mrf.mxu0  ;;  %v1196_v21 = vpop.f32.mrf.mxu1  ;;  %3881 = verf.f32 %v1473_v31  ;;  %v1476_v1 = vmul.f32 0.70710677, %v1191_v39  ;;  %v4975_v11 = vmul.f32 0.5, %v998_v32  ;;  %v4982_v22 = vmul.f32 0.5, %v1191_v39 }
 0x1bb   : > { %v3858_v45 = vpop.eup %3857  ;;  %v1477_v7 = vmul.f32 0.70710677, %v1002_v48  ;;  %v1004_v8 = vadd.f32 %v1003_v20, %v4912_v44  ;;  %3883 = verf.f32 %v1475_v54  ;;  %v1479_v16 = vmul.f32 0.70710677, %v1195_v60 }
 0x1bc   : > { %v1005_v24 = vpop.f32.mrf.mxu0  ;;  %v4929_v25 = vpop.f32.mrf.mxu1  ;;  %v1717_v5 = vadd.f32 1.0, %v3858_v45  ;;  %3885 = verf.f32 %v1474_v59  ;;  %v1197_v17 = vadd.f32 %v1196_v21, %v4914_v47  ;;  %v4991_v32 = vmul.f32 0.5, %v1002_v48 }
 0x1bd   : > { %v3860_v50 = vpop.eup %3859  ;;  %3887 = verf.f32 %v1476_v1  ;;  %v1006_v20 = vadd.f32 %v1005_v24, %v4906_v40  ;;  %v1478_v45 = vmul.f32 0.70710677, %v1004_v8  ;;  %v1199_v1 = vadd.f32 %v4929_v25, %v4908_v43 }
 0x1be   : > { %v4932_v28 = vpop.f32.mrf.mxu0  ;;  %v4934_v29 = vpop.f32.mrf.mxu1  ;;  %v1719_v9 = vadd.f32 1.0, %v3860_v50  ;;  %v4989_v31 = vmul.f32 %v1717_v5, %v1333_v30  ;;  %3889 = verf.f32 %v1477_v7  ;;  %v1480_v48 = vmul.f32 0.70710677, %v1197_v17 }
 0x1bf   : > { %v3862_v58 = vpop.eup %3861  ;;  %3891 = verf.f32 %v1479_v16  ;;  %v1008_v5 = vadd.f32 %v4932_v28, %v4912_v44  ;;  %v5023_v25 = vadd.f32 %v4934_v29, %v4914_v47  ;;  %v5028_v16 = vmul.f32 0.5, %v1006_v20 }
 0x1c0   : > { %v4940_v41 = vpop.f32.mrf.mxu0  ;;  %v4942_v42 = vpop.f32.mrf.mxu1  ;;  %v1718_v10 = vadd.f32 1.0, %v3862_v58  ;;  %v4993_v21 = vmul.f32 %v1719_v9, %v1335_v33  ;;  %v4997_v58 = vmul.f32 0.5, %v1195_v60  ;;  %v1481_v60 = vmul.f32 0.70710677, %v1006_v20 }
 0x1c1   : > { %v3864_v61 = vpop.eup %3863  ;;  %3893 = verf.f32 %v1478_v45  ;;  %v1482_v35 = vmul.f32 0.70710677, %v1008_v5 }
 0x1c2   : > { %v4955_v55 = vpop.f32.mrf.mxu0  ;;  %v4957_v56 = vpop.f32.mrf.mxu1  ;;  %v1720_v15 = vadd.f32 1.0, %v3864_v61  ;;  %v4995_v54 = vmul.f32 %v1718_v10, %v1334_v36  ;;  %v5019_v10 = vmul.f32 0.5, %v1197_v17  ;;  %3895 = verf.f32 %v1480_v48 }
 0x1c3   : > { %v3866_v4 = vpop.eup %3865  ;;  %v1483_v17 = vmul.f32 0.70710677, %v1199_v1  ;;  %3897 = verf.f32 %v1481_v60  ;;  %v5048_v48 = vadd.f32 %v4942_v42, %v4908_v43 }
 0x1c4   : > { %v4968_v2 = vpop.f32.mrf.mxu0  ;;  %v4970_v3 = vpop.f32.mrf.mxu1  ;;  %v1721_v19 = vadd.f32 1.0, %v3866_v4  ;;  %v5004_v30 = vmul.f32 %v1720_v15, %v4937_v37  ;;  %v5011_v4 = vmul.f32 0.5, %v1004_v8 }
 0x1c5   : > { %v3868_v14 = vpop.eup %3867  ;;  %3899 = verf.f32 %v1483_v17 }
 0x1c6   : > { %v4977_v12 = vpop.f32.mrf.mxu0  ;;  %v4979_v13 = vpop.f32.mrf.mxu1  ;;  %v1723_v39 = vadd.f32 1.0, %v3868_v14  ;;  %v5009_v36 = vmul.f32 %v1721_v19, %v4944_v46 }
 0x1c7   : > { %v3870_v18 = vpop.eup %3869  ;;  %3901 = verf.f32 %v1482_v35 }
 0x1c8   : > { %v4985_v23 = vpop.f32.mrf.mxu0  ;;  %v4987_v26 = vpop.f32.mrf.mxu1  ;;  %v1722_v37 = vadd.f32 1.0, %v3870_v18  ;;  %v5026_v8 = vmul.f32 %v1723_v39, %v4946_v49  ;;  %v2037_v29 = vpack.c.bf16 %v5009_v36, %v4989_v31  ;;  %v5038_v49 = vadd.f32 %v4940_v41, %v4906_v40 }
 0x1c9   : > { %v3872_v27 = vpop.eup %3871  ;;  %v5058_v36 = vadd.f32 %v4955_v55, %v4912_v44 }
 0x1ca   : > { %v3874_v50 = vpop.eup %3873  ;;  %v4999_v24 = vpop.f32.mrf.mxu0  ;;  %v1724_v14 = vadd.f32 1.0, %v3872_v27  ;;  %v2039_v31 = vpack.c.bf16 %v5026_v8, %v4993_v21  ;;  %v1485_v55 = vmul.f32 0.70710677, %v5038_v49  ;;  %v5075_v8 = vadd.f32 %v4957_v56, %v4914_v47 }
 0x1cb   : > { %v5001_v59 = vpop.f32.mrf.mxu1  ;;  %v3876_v61 = vpop.eup %3875  ;;  %v1725_v15 = vadd.f32 1.0, %v3874_v50  ;;  %v1850_v50 = vmul.f32 %v1722_v37, %v4949_v53  ;;  %v1016_v56 = vadd.f32 %v4968_v2, %v4906_v40 }
 0x1cc   : > { %v3878_v33 = vpop.eup %3877  ;;  %v5015_v7 = vpop.f32.mrf.mxu0  ;;  %v1727_v18 = vadd.f32 1.0, %v3876_v61  ;;  %v1484_v61 = vmul.f32 0.70710677, %v5023_v25  ;;  %v1488_v2 = vmul.f32 0.70710677, %v5075_v8 }
 0x1cd   : > { %v5017_v9 = vpop.f32.mrf.mxu1  ;;  %v3880_v46 = vpop.eup %3879  ;;  %v1726_v45 = vadd.f32 1.0, %v3878_v33  ;;  %v1852_v33 = vmul.f32 %v1724_v14, %v4951_v51  ;;  %v5054_v41 = vmul.f32 %v1725_v15, %v4953_v52  ;;  %v5070_v52 = vmul.f32 0.5, %v1199_v1 }
 0x1ce   : > { %v5030_v28 = vpop.f32.mrf.mxu0  ;;  %v3882_v38 = vpop.eup %3881  ;;  %v1728_v39 = vadd.f32 1.0, %v3880_v46  ;;  %v5065_v42 = vmul.f32 %v1727_v18, %v4959_v57  ;;  %3903 = verf.f32 %v1484_v61  ;;  %v2038_v1 = vpack.c.bf16 %v1850_v50, %v4995_v54 }
 0x1cf   : > { %v5032_v19 = vpop.f32.mrf.mxu1  ;;  %v3884_v37 = vpop.eup %3883  ;;  %v5068_v46 = vmul.f32 %v1726_v45, %v4962_v62  ;;  %v1729_v21 = vadd.f32 1.0, %v3882_v38  ;;  %v1487_v38 = vmul.f32 0.70710677, %v5048_v48  ;;  %v1486_v45 = vmul.f32 0.70710677, %v5058_v36 }
 0x1d0   : > { %v5040_v20 = vpop.f32.mrf.mxu0  ;;  %v3886_v51 = vpop.eup %3885  ;;  %v5082_v62 = vmul.f32 %v1728_v39, %v4964_v63  ;;  %v1731_v18 = vadd.f32 1.0, %v3884_v37  ;;  %v2040_v17 = vpack.c.bf16 %v1852_v33, %v5004_v30  ;;  %v5097_v61 = vmul.f32 0.5, %v1008_v5  ;;  %2517 = vmatprep.mubr.bf16.mxu0 %v2038_v1 }
 0x1d1   : > { %v5042_v27 = vpop.f32.mrf.mxu1  ;;  %v3888_v57 = vpop.eup %3887  ;;  %v5095_v63 = vmul.f32 %v1729_v21, %v4966_v0  ;;  %v1730_v39 = vadd.f32 1.0, %v3886_v51  ;;  %v5101_v54 = vadd.f32 %v4970_v3, %v4908_v43  ;;  %3905 = verf.f32 %v1485_v55  ;;  %2518 = vmatmul.mubr.bf16.vlgmr.msra.gmra.mxu0 %v2037_v29 }
 0x1d2   : > { %v5060_v53 = vpop.f32.mrf.mxu0  ;;  %v3890_v35 = vpop.eup %3889  ;;  %v1732_v37 = vadd.f32 1.0, %v3888_v57  ;;  %v5106_v30 = vadd.f32 %v4977_v12, %v4912_v44  ;;  %2710 = vmatprep.mubr.bf16.mxu1 %v2040_v17  ;;  %v5113_v3 = vmul.f32 0.5, %v5023_v25  ;;  %3907 = verf.f32 %v1487_v38 }
 0x1d3   : > { %v5062_v60 = vpop.f32.mrf.mxu1  ;;  %v3892_v50 = vpop.eup %3891  ;;  %v1733_v33 = vadd.f32 1.0, %v3890_v35  ;;  %v5117_v21 = vadd.f32 %v4979_v13, %v4914_v47  ;;  %2711 = vmatmul.mubr.bf16.vlgmr.msra.gmra.mxu1 %v2039_v31  ;;  %v5120_v12 = vmul.f32 %v1731_v18, %v4972_v6  ;;  %3909 = verf.f32 %v1486_v45 }
 0x1d4   : > { %v5077_v14 = vpop.f32.mrf.mxu0  ;;  %v3894_v51 = vpop.eup %3893  ;;  %v1489_v29 = vmul.f32 0.70710677, %v1016_v56  ;;  %v5124_v55 = vadd.f32 %v4985_v23, %v4906_v40  ;;  %v1858_v38 = vmul.f32 %v1730_v39, %v4975_v11  ;;  %v1735_v1 = vadd.f32 1.0, %v3892_v50 }
 0x1d5   : > { %v5079_v15 = vpop.f32.mrf.mxu1  ;;  %v5132_v13 = vmul.f32 0.5, %v5038_v49  ;;  %v1491_v31 = vmul.f32 0.70710677, %v5101_v54  ;;  %v3896_v6 = vpop.eup %3895  ;;  %v1860_v35 = vmul.f32 %v1732_v37, %v4982_v22  ;;  %v5137_v18 = vmul.f32 0.5, %v5048_v48 }
 0x1d6   : > { %6331 = vst [vmem:[#allocation28_spill] sm:$0xff] %v5079_v15  ;;  %v5090_v34 = vpop.f32.mrf.mxu0  ;;  %3911 = verf.f32 %v1488_v2  ;;  %v1490_v23 = vmul.f32 0.70710677, %v5106_v30  ;;  %v3898_v11 = vpop.eup %3897  ;;  %v5145_v39 = vmul.f32 %v1733_v33, %v4991_v32  ;;  %v1734_v49 = vadd.f32 1.0, %v3894_v51 }
 0x1d7   : > { %v5092_v15 = vpop.f32.mrf.mxu1  ;;  %v1492_v50 = vmul.f32 0.70710677, %v5117_v21  ;;  %v1215_v22 = vadd.f32 %v4987_v26, %v4908_v43  ;;  %v5151_v48 = vmul.f32 0.5, %v5058_v36  ;;  %3913 = verf.f32 %v1489_v29  ;;  %v3900_v36 = vpop.eup %3899 }
 0x1d8   : > { %v5108_v0 = vpop.f32.mrf.mxu0  ;;  %v1493_v37 = vmul.f32 0.70710677, %v5124_v55  ;;  %v1024_v2 = vadd.f32 %v4999_v24, %v4912_v44  ;;  %v5161_v32 = vmul.f32 %v1735_v1, %v4997_v58  ;;  %v1736_v33 = vadd.f32 1.0, %v3896_v6  ;;  %v3902_v58 = vpop.eup %3901 }
 0x1d9   : > { %v5110_v5 = vpop.f32.mrf.mxu1  ;;  %3915 = verf.f32 %v1491_v31  ;;  %v5165_v26 = vadd.f32 %v5001_v59, %v4914_v47  ;;  %v1737_v51 = vadd.f32 1.0, %v3898_v11  ;;  %v5168_v29 = vmul.f32 0.5, %v5075_v8 }
 0x1da   : > { %v5126_v57 = vpop.f32.mrf.mxu0  ;;  %3917 = verf.f32 %v1490_v23  ;;  %v5177_v1 = vmul.f32 %v1734_v49, %v5011_v4  ;;  %v1495_v31 = vmul.f32 0.70710677, %v1215_v22  ;;  %v2042_v59 = vpack.c.bf16 %v1858_v38, %v5068_v46 }
 0x1db   : > { %v5128_v25 = vpop.f32.mrf.mxu1  ;;  %3919 = verf.f32 %v1492_v50  ;;  %v3904_v6 = vpop.eup %3903  ;;  %v1494_v11 = vmul.f32 0.70710677, %v1024_v2  ;;  %v1026_v8 = vadd.f32 %v5015_v7, %v4906_v40  ;;  %v5184_v23 = vmul.f32 %v1736_v33, %v5019_v10 }
 0x1dc   : > { %6332 = vst [vmem:[#allocation29_spill] sm:$0xff] %v5128_v25  ;;  %v5140_v45 = vpop.f32.mrf.mxu0  ;;  %v5170_v25 = vmul.f32 0.5, %v1016_v56  ;;  %3921 = verf.f32 %v1493_v37  ;;  %v2044_v56 = vpack.c.bf16 %v1860_v35, %v5082_v62  ;;  %v1496_v4 = vmul.f32 0.70710677, %v5165_v26  ;;  %2527 = vmatprep.mubr.bf16.mxu0 %v2042_v59 }
 0x1dd   : > { %6333 = vst [vmem:[#allocation30_spill] sm:$0xff] %v5140_v45  ;;  %v5142_v17 = vpop.f32.mrf.mxu1  ;;  %v1219_v49 = vadd.f32 %v5017_v9, %v4908_v43  ;;  %v5193_v46 = vmul.f32 %v1737_v51, %v5028_v16  ;;  %v1739_v38 = vadd.f32 1.0, %v3900_v36  ;;  %v5196_v7 = vmul.f32 0.5, %v5106_v30 }
 0x1de   : > { %6334 = vst [vmem:[#allocation31_spill] sm:$0xff] %v5142_v17  ;;  %v5156_v17 = vpop.f32.mrf.mxu0  ;;  %v1028_v10 = vadd.f32 %v5030_v28, %v4912_v44  ;;  %2720 = vmatprep.mubr.bf16.mxu1 %v2044_v56  ;;  %v3906_v35 = vpop.eup %3905  ;;  %v1738_v50 = vadd.f32 1.0, %v3902_v58  ;;  %v1740_v37 = vadd.f32 1.0, %v3904_v6  ;;  %v5205_v9 = vmul.f32 0.5, %v5117_v21 }
 0x1df   : > { %v5158_v45 = vpop.f32.mrf.mxu1  ;;  %3923 = verf.f32 %v1495_v31  ;;  %v3908_v16 = vpop.eup %3907  ;;  %v1497_v33 = vmul.f32 0.70710677, %v1026_v8  ;;  %v1221_v30 = vadd.f32 %v5032_v19, %v4914_v47  ;;  %v2041_v28 = vpack.c.bf16 %v5095_v63, %v5054_v41 }
 0x1e0   : > { %6335 = vst [vmem:[#allocation32_spill] sm:$0xff] %v5158_v45  ;;  %v5172_v24 = vpop.f32.mrf.mxu0  ;;  %3925 = verf.f32 %v1494_v11  ;;  %v3910_v36 = vpop.eup %3909  ;;  %v1499_v51 = vmul.f32 0.70710677, %v1219_v49  ;;  %v1032_v58 = vadd.f32 %v5040_v20, %v4906_v40  ;;  %v2043_v21 = vpack.c.bf16 %v5120_v12, %v5065_v42 }
 0x1e1   : > { %v5174_v45 = vpop.f32.mrf.mxu1  ;;  %3927 = verf.f32 %v1496_v4  ;;  %v5216_v31 = vmul.f32 %v1739_v38, %v5070_v52  ;;  %v5219_v59 = vmul.f32 0.5, %v5124_v55  ;;  %v5221_v6 = vmul.f32 0.5, %v1215_v22  ;;  %2528 = vmatmul.mubr.bf16.gmra.mxu0 %v2041_v28 }
 0x1e2   : > { %6336 = vst [vmem:[#allocation33_spill] sm:$0xff] %v5174_v45  ;;  %v5187_v45 = vmul.f32 0.5, %v5101_v54  ;;  %v5200_v62 = vpop.f32.mrf.mxu0  ;;  %v1498_v19 = vmul.f32 0.70710677, %v1028_v10  ;;  %v1866_v20 = vmul.f32 %v1738_v50, %v5097_v61  ;;  %v1741_v56 = vadd.f32 1.0, %v3906_v35  ;;  %2721 = vmatmul.mubr.bf16.gmra.mxu1 %v2043_v21 }
 0x1e3   : > { %v5202_v54 = vpop.f32.mrf.mxu1  ;;  %v3912_v11 = vpop.eup %3911  ;;  %v1743_v4 = vadd.f32 1.0, %v3908_v16  ;;  %v5228_v42 = vmul.f32 0.5, %v1024_v2  ;;  %v1742_v52 = vadd.f32 1.0, %v3910_v36  ;;  %3929 = verf.f32 %v1497_v33 }
 0x1e4   : > { %v5223_v41 = vpop.f32.mrf.mxu0  ;;  %v1500_v12 = vmul.f32 0.70710677, %v1221_v30  ;;  %v1225_v55 = vadd.f32 %v5042_v27, %v4908_v43  ;;  %v3914_v22 = vpop.eup %3913  ;;  %v1868_v38 = vmul.f32 %v1740_v37, %v5113_v3  ;;  %v5234_v28 = vmul.f32 0.5, %v5165_v26 }
 0x1e5   : > { %v5225_v63 = vpop.f32.mrf.mxu1  ;;  %3931 = verf.f32 %v1499_v51  ;;  %v1744_v35 = vadd.f32 1.0, %v3912_v11  ;;  %v5236_v50 = vmul.f32 0.5, %v1026_v8  ;;  %v1034_v2 = vadd.f32 %v5060_v53, %v4912_v44 }
 0x1e6   : > { %6337 = vst [vmem:[#allocation34_spill] sm:$0xff] %v5225_v63  ;;  %v1501_v63 = vmul.f32 0.70710677, %v1032_v58  ;;  %v3916_v61 = vpop.eup %3915  ;;  %3933 = verf.f32 %v1498_v19  ;;  %v5240_v16 = vpop.f32.mrf.mxu0  ;;  %v5245_v3 = vmul.f32 %v1741_v56, %v5132_v13  ;;  %v5248_v26 = vmul.f32 %v1743_v4, %v5137_v18 }
 0x1e7   : > { %v5242_v33 = vpop.f32.mrf.mxu1  ;;  %v3918_v27 = vpop.eup %3917  ;;  %v5250_v37 = vmul.f32 0.5, %v1219_v49  ;;  %v2046_v8 = vpack.c.bf16 %v1866_v20, %v5177_v1  ;;  %v5254_v51 = vmul.f32 %v1742_v52, %v5151_v48  ;;  %v5256_v53 = vmul.f32 0.5, %v1028_v10 }
 0x1e8   : > { %6338 = vst [vmem:[#allocation35_spill] sm:$0xff] %v5242_v33  ;;  %v3920_v36 = vpop.eup %3919  ;;  %3935 = verf.f32 %v1500_v12  ;;  %v1503_v21 = vmul.f32 0.70710677, %v1225_v55  ;;  %v1745_v11 = vadd.f32 1.0, %v3914_v22  ;;  %v5258_v33 = vmul.f32 0.5, %v1221_v30  ;;  %v5267_v10 = vpop.f32.mrf.mxu0 }
 0x1e9   : > { %v3922_v19 = vpop.eup %3921  ;;  %3937 = verf.f32 %v1501_v63  ;;  %v1227_v13 = vadd.f32 %v5062_v60, %v4914_v47  ;;  %2537 = vmatprep.mubr.bf16.mxu0 %v2046_v8  ;;  %v5263_v18 = vmul.f32 %v1744_v35, %v5168_v29  ;;  %v1747_v1 = vadd.f32 1.0, %v3916_v61  ;;  %v5269_v20 = vpop.f32.mrf.mxu1  ;;  %v6339_v29 = vld [vmem:[#allocation28_spill] sm:$0xff] }
 0x1ea   : > { %v1502_v49 = vmul.f32 0.70710677, %v1034_v2  ;;  %v1036_v48 = vadd.f32 %v5077_v14, %v4906_v40  ;;  %v1746_v56 = vadd.f32 1.0, %v3918_v27  ;;  %v1748_v30 = vadd.f32 1.0, %v3920_v36 }
 0x1eb   : > { %v5271_v4 = vmul.f32 0.5, %v1032_v58  ;;  %v2048_v63 = vpack.c.bf16 %v1868_v38, %v5184_v23  ;;  %v1749_v52 = vadd.f32 1.0, %v3922_v19  ;;  %3939 = verf.f32 %v1503_v21 }
 0x1ec   : > { %v3924_v60 = vpop.eup %3923  ;;  %v1229_v12 = vadd.f32 %v6339_v29, %v4908_v43  ;;  %v2045_v22 = vpack.c.bf16 %v5193_v46, %v5145_v39  ;;  %v5279_v61 = vmul.f32 %v1745_v11, %v5170_v25  ;;  %v1504_v35 = vmul.f32 0.70710677, %v1227_v13  ;;  %v5289_v46 = vpop.f32.mrf.mxu0 }
 0x1ed   : > { %v3926_v14 = vpop.eup %3925  ;;  %v1038_v58 = vadd.f32 %v5090_v34, %v4912_v44  ;;  %2730 = vmatprep.mubr.bf16.mxu1 %v2048_v63  ;;  %v2047_v23 = vpack.c.bf16 %v5216_v31, %v5161_v32  ;;  %v5285_v27 = vmul.f32 0.5, %v1225_v55  ;;  %3941 = verf.f32 %v1502_v49  ;;  %v5291_v25 = vpop.f32.mrf.mxu1 }
 0x1ee   : > { %v3928_v38 = vpop.eup %3927  ;;  %v1505_v8 = vmul.f32 0.70710677, %v1036_v48  ;;  %v1231_v39 = vadd.f32 %v5092_v15, %v4914_v47  ;;  %2538 = vmatmul.mubr.bf16.gmra.mxu0 %v2045_v22  ;;  %v5294_v36 = vmul.f32 %v1747_v1, %v5187_v45  ;;  %v1874_v34 = vmul.f32 %v1746_v56, %v5196_v7  ;;  %v5309_v56 = vpop.f32.mrf.mxu0 }
 0x1ef   : > { %v1876_v32 = vmul.f32 %v1748_v30, %v5205_v9  ;;  %v1751_v31 = vadd.f32 1.0, %v3924_v60  ;;  %2731 = vmatmul.mubr.bf16.gmra.mxu1 %v2047_v23  ;;  %v5299_v55 = vmul.f32 %v1749_v52, %v5219_v59  ;;  %v1750_v21 = vadd.f32 1.0, %v3926_v14 }
 0x1f0   : > { %v5301_v19 = vmul.f32 0.5, %v1034_v2  ;;  %v1507_v15 = vmul.f32 0.70710677, %v1229_v12  ;;  %v3930_v11 = vpop.eup %3929  ;;  %v1752_v49 = vadd.f32 1.0, %v3928_v38  ;;  %3943 = verf.f32 %v1504_v35  ;;  %v5311_v2 = vpop.f32.mrf.mxu1 }
 0x1f1   : > { %v1506_v63 = vmul.f32 0.70710677, %v1038_v58  ;;  %v1042_v45 = vadd.f32 %v5108_v0, %v4906_v40  ;;  %v5305_v7 = vmul.f32 0.5, %v1227_v13  ;;  %3945 = verf.f32 %v1505_v8  ;;  %v5331_v8 = vpop.f32.mrf.mxu0 }
 0x1f2   : > { %v3932_v1 = vpop.eup %3931  ;;  %v1508_v9 = vmul.f32 0.70710677, %v1231_v39  ;;  %v1235_v59 = vadd.f32 %v5110_v5, %v4908_v43  ;;  %v5314_v60 = vmul.f32 %v1751_v31, %v5221_v6  ;;  %v5316_v52 = vmul.f32 0.5, %v1036_v48  ;;  %v6340_v5 = vld [vmem:[#allocation29_spill] sm:$0xff] }
 0x1f3   : > { %v3934_v30 = vpop.eup %3933  ;;  %v1044_v0 = vadd.f32 %v5126_v57, %v4912_v44  ;;  %v2050_v13 = vpack.c.bf16 %v1874_v34, %v5254_v51  ;;  %v5322_v29 = vmul.f32 %v1750_v21, %v5228_v42  ;;  %v1753_v22 = vadd.f32 1.0, %v3930_v11  ;;  %v5333_v34 = vpop.f32.mrf.mxu1 }
 0x1f4   : > { %3947 = verf.f32 %v1507_v15  ;;  %v1237_v14 = vadd.f32 %v6340_v5, %v4914_v47  ;;  %v5327_v23 = vmul.f32 %v1752_v49, %v5234_v28  ;;  %v5329_v6 = vmul.f32 0.5, %v1229_v12  ;;  %v6341_v49 = vld [vmem:[#allocation30_spill] sm:$0xff] }
 0x1f5   : > { %v3936_v35 = vpop.eup %3935  ;;  %3949 = verf.f32 %v1506_v63  ;;  %v1509_v48 = vmul.f32 0.70710677, %v1042_v45  ;;  %2547 = vmatprep.mubr.bf16.mxu0 %v2050_v13  ;;  %v1755_v38 = vadd.f32 1.0, %v3932_v1  ;;  %v1754_v51 = vadd.f32 1.0, %v3934_v30 }
 0x1f6   : > { %v3938_v57 = vpop.eup %3937  ;;  %3951 = verf.f32 %v1508_v9  ;;  %v1511_v42 = vmul.f32 0.70710677, %v1235_v59  ;;  %v5335_v31 = vmul.f32 0.5, %v1038_v58  ;;  %v5337_v21 = vmul.f32 0.5, %v1231_v39  ;;  %v6342_v58 = vld [vmem:[#allocation31_spill] sm:$0xff] }
 0x1f7   : > { %v1510_v28 = vmul.f32 0.70710677, %v1044_v0  ;;  %v2052_v12 = vpack.c.bf16 %v1876_v32, %v5263_v18  ;;  %v5341_v15 = vmul.f32 %v1753_v22, %v5236_v50  ;;  %v1512_v11 = vmul.f32 0.70710677, %v1237_v14  ;;  %v5355_v22 = vpop.f32.mrf.mxu0 }
 0x1f8   : > { %v1046_v63 = vadd.f32 %v6341_v49, %v4906_v40  ;;  %v2049_v1 = vpack.c.bf16 %v5279_v61, %v5245_v3  ;;  %v3940_v9 = vpop.eup %3939  ;;  %v1756_v30 = vadd.f32 1.0, %v3936_v35  ;;  %v1757_v13 = vadd.f32 1.0, %v3938_v57  ;;  %v5357_v3 = vpop.f32.mrf.mxu1  ;;  %v6343_v35 = vld [vmem:[#allocation32_spill] sm:$0xff] }
 0x1f9   : > { %3953 = verf.f32 %v1509_v48  ;;  %v1239_v39 = vadd.f32 %v6342_v58, %v4908_v43  ;;  %2740 = vmatprep.mubr.bf16.mxu1 %v2052_v12  ;;  %v5350_v18 = vmul.f32 %v1755_v38, %v5250_v37  ;;  %v1882_v50 = vmul.f32 %v1754_v51, %v5256_v53 }
 0x1fa   : > { %3955 = verf.f32 %v1511_v42  ;;  %v1048_v32 = vadd.f32 %v5156_v17, %v4912_v44  ;;  %2548 = vmatmul.mubr.bf16.gmra.mxu0 %v2049_v1  ;;  %v3942_v61 = vpop.eup %3941  ;;  %v5359_v5 = vmul.f32 0.5, %v1042_v45  ;;  %v1241_v48 = vadd.f32 %v6343_v35, %v4914_v47  ;;  %v5379_v1 = vpop.f32.mrf.mxu0 }
 0x1fb   : > { %3957 = verf.f32 %v1510_v28  ;;  %v2051_v37 = vpack.c.bf16 %v5294_v36, %v5248_v26  ;;  %v1759_v53 = vadd.f32 1.0, %v3940_v9  ;;  %v1513_v57 = vmul.f32 0.70710677, %v1046_v63  ;;  %v6344_v36 = vld [vmem:[#allocation33_spill] sm:$0xff] }
 0x1fc   : > { %3959 = verf.f32 %v1512_v11  ;;  %v5367_v17 = vadd.f32 %v5172_v24, %v4906_v40  ;;  %v1884_v38 = vmul.f32 %v1756_v30, %v5258_v33  ;;  %v5371_v51 = vmul.f32 %v1757_v13, %v5271_v4  ;;  %v5381_v24 = vpop.f32.mrf.mxu1 }
 0x1fd   : > { %v5373_v45 = vmul.f32 0.5, %v1235_v59  ;;  %v1515_v42 = vmul.f32 0.70710677, %v1239_v39  ;;  %2741 = vmatmul.mubr.bf16.gmra.mxu1 %v2051_v37  ;;  %v3944_v28 = vpop.eup %3943  ;;  %v1758_v12 = vadd.f32 1.0, %v3942_v61  ;;  %v5375_v49 = vmul.f32 0.5, %v1044_v0  ;;  %6345 = vst [vmem:[#allocation28_spill] sm:$0xff] %v5381_v24 }
 0x1fe   : > { %v1514_v26 = vmul.f32 0.70710677, %v1048_v32  ;;  %v1245_v11 = vadd.f32 %v6344_v36, %v4908_v43  ;;  %v3946_v33 = vpop.eup %3945  ;;  %v5383_v9 = vmul.f32 0.5, %v1237_v14  ;;  %v5385_v4 = vmul.f32 0.5, %v1046_v63  ;;  %v5407_v36 = vpop.f32.mrf.mxu1 }
 0x1ff   : > { %v1516_v59 = vmul.f32 0.70710677, %v1241_v48  ;;  %v5389_v30 = vadd.f32 %v5200_v62, %v4912_v44  ;;  %v5392_v0 = vmul.f32 %v1759_v53, %v5285_v27  ;;  %3961 = verf.f32 %v1513_v57  ;;  %v5405_v57 = vpop.f32.mrf.mxu0  ;;  %6346 = vst [vmem:[#allocation29_spill] sm:$0xff] %v5407_v36 }
 0x200   : > { %v1517_v13 = vmul.f32 0.70710677, %v5367_v17  ;;  %v5397_v58 = vadd.f32 %v5202_v54, %v4914_v47  ;;  %v1760_v14 = vadd.f32 1.0, %v3944_v28  ;;  %v5399_v35 = vmul.f32 0.5, %v1239_v39 }
 0x201   : > { %v3948_v61 = vpop.eup %3947  ;;  %3963 = verf.f32 %v1515_v42  ;;  %v2054_v63 = vpack.c.bf16 %v1882_v50, %v5322_v29  ;;  %v5403_v62 = vmul.f32 %v1758_v12, %v5301_v19  ;;  %v1761_v27 = vadd.f32 1.0, %v3946_v33  ;;  %v6347_v50 = vld [vmem:[#allocation34_spill] sm:$0xff] }
 0x202   : > { %v3950_v37 = vpop.eup %3949  ;;  %3965 = verf.f32 %v1514_v26  ;;  %v1519_v53 = vmul.f32 0.70710677, %v1245_v11  ;;  %v5409_v24 = vmul.f32 0.5, %v1048_v32  ;;  %v1518_v39 = vmul.f32 0.70710677, %v5389_v30 }
 0x203   : > { %v3952_v54 = vpop.eup %3951  ;;  %3967 = verf.f32 %v1516_v59  ;;  %v1056_v29 = vadd.f32 %v5223_v41, %v4906_v40  ;;  %2557 = vmatprep.mubr.bf16.mxu0 %v2054_v63  ;;  %v1520_v19 = vmul.f32 0.70710677, %v5397_v58  ;;  %v1249_v42 = vadd.f32 %v6347_v50, %v4908_v43  ;;  %v5427_v63 = vpop.f32.mrf.mxu0 }
 0x204   : > { %3969 = verf.f32 %v1517_v13  ;;  %v2056_v28 = vpack.c.bf16 %v1884_v38, %v5327_v23  ;;  %v5419_v12 = vmul.f32 %v1760_v14, %v5305_v7  ;;  %v1763_v32 = vadd.f32 1.0, %v3948_v61  ;;  %v5429_v23 = vpop.f32.mrf.mxu1 }
 0x205   : > { %v1762_v26 = vadd.f32 1.0, %v3950_v37  ;;  %v1058_v33 = vadd.f32 %v5240_v16, %v4912_v44  ;;  %v1764_v36 = vadd.f32 1.0, %v3952_v54  ;;  %3971 = verf.f32 %v1519_v53  ;;  %v6348_v16 = vld [vmem:[#allocation35_spill] sm:$0xff] }
 0x206   : > { %v3954_v59 = vpop.eup %3953  ;;  %2750 = vmatprep.mubr.bf16.mxu1 %v2056_v28  ;;  %v2053_v41 = vpack.c.bf16 %v5341_v15, %v5299_v55  ;;  %v2055_v13 = vpack.c.bf16 %v5350_v18, %v5314_v60  ;;  %v5431_v38 = vmul.f32 0.5, %v1241_v48  ;;  %3973 = verf.f32 %v1518_v39  ;;  %v5452_v28 = vpop.f32.mrf.mxu1 }
 0x207   : > { %v3956_v7 = vpop.eup %3955  ;;  %v1521_v61 = vmul.f32 0.70710677, %v1056_v29  ;;  %v1251_v14 = vadd.f32 %v6348_v16, %v4914_v47  ;;  %v5436_v53 = vmul.f32 %v1761_v27, %v5316_v52  ;;  %v5439_v55 = vmul.f32 0.5, %v5367_v17 }
 0x208   : > { %v3958_v37 = vpop.eup %3957  ;;  %3975 = verf.f32 %v1520_v19  ;;  %v1523_v60 = vmul.f32 0.70710677, %v1249_v42  ;;  %2558 = vmatmul.mubr.bf16.gmra.mxu0 %v2053_v41  ;;  %2751 = vmatmul.mubr.bf16.gmra.mxu1 %v2055_v13  ;;  %v5442_v18 = vmul.f32 %v1763_v32, %v5329_v6  ;;  %v1765_v48 = vadd.f32 1.0, %v3954_v59  ;;  %v5450_v19 = vpop.f32.mrf.mxu0 }
 0x209   : > { %v3960_v15 = vpop.eup %3959  ;;  %v5444_v54 = vmul.f32 0.5, %v1245_v11  ;;  %v1522_v39 = vmul.f32 0.70710677, %v1058_v33  ;;  %v1890_v50 = vmul.f32 %v1762_v26, %v5335_v31  ;;  %v1892_v52 = vmul.f32 %v1764_v36, %v5337_v21 }
 0x20a   : > { %v1767_v27 = vadd.f32 1.0, %v3956_v7  ;;  %v1062_v17 = vadd.f32 %v5267_v10, %v4906_v40  ;;  %v1766_v41 = vadd.f32 1.0, %v3958_v37  ;;  %3977 = verf.f32 %v1521_v61  ;;  %v5478_v61 = vpop.f32.mrf.mxu0 }
 0x20b   : > { %v1524_v6 = vmul.f32 0.70710677, %v1251_v14  ;;  %v5456_v11 = vadd.f32 %v5269_v20, %v4908_v43  ;;  %v1768_v32 = vadd.f32 1.0, %v3960_v15  ;;  %v5459_v31 = vmul.f32 0.5, %v5389_v30 }
 0x20c   : > { %v5462_v21 = vmul.f32 0.5, %v5397_v58  ;;  %3979 = verf.f32 %v1523_v60  ;;  %v3962_v10 = vpop.eup %3961  ;;  %v5465_v36 = vmul.f32 %v1765_v48, %v5359_v5  ;;  %v5467_v26 = vmul.f32 0.5, %v1056_v29  ;;  %v5480_v5 = vpop.f32.mrf.mxu1 }
 0x20d   : > { %3981 = verf.f32 %v1522_v39  ;;  %v1064_v59 = vadd.f32 %v5289_v46, %v4912_v44  ;;  %v5472_v13 = vmul.f32 %v1767_v27, %v5373_v45  ;;  %v5474_v30 = vmul.f32 0.5, %v1249_v42 }
 0x20e   : > { %v3964_v20 = vpop.eup %3963  ;;  %v1525_v7 = vmul.f32 0.70710677, %v1062_v17  ;;  %v1257_v58 = vadd.f32 %v5291_v25, %v4914_v47  ;;  %v5483_v16 = vmul.f32 %v1766_v41, %v5375_v49  ;;  %v5485_v37 = vmul.f32 0.5, %v1058_v33 }
 0x20f   : > { %v3966_v29 = vpop.eup %3965  ;;  %3983 = verf.f32 %v1524_v6  ;;  %v1527_v46 = vmul.f32 0.70710677, %v5456_v11  ;;  %v5489_v42 = vmul.f32 %v1768_v32, %v5383_v9  ;;  %v1769_v60 = vadd.f32 1.0, %v3962_v10  ;;  %v5503_v32 = vpop.f32.mrf.mxu1 }
 0x210   : > { %v3968_v45 = vpop.eup %3967  ;;  %v5491_v15 = vmul.f32 0.5, %v1251_v14  ;;  %v1066_v25 = vadd.f32 %v5309_v56, %v4906_v40  ;;  %v1771_v39 = vadd.f32 1.0, %v3964_v20  ;;  %v1526_v27 = vmul.f32 0.70710677, %v1064_v59  ;;  %v5501_v14 = vpop.f32.mrf.mxu0  ;;  %6349 = vst [vmem:[#allocation30_spill] sm:$0xff] %v5503_v32 }
 0x211   : > { %v3970_v48 = vpop.eup %3969  ;;  %v1259_v49 = vadd.f32 %v5311_v2, %v4908_v43  ;;  %v2058_v33 = vpack.c.bf16 %v1890_v50, %v5403_v62  ;;  %3985 = verf.f32 %v1525_v7  ;;  %v1528_v41 = vmul.f32 0.70710677, %v1257_v58 }
 0x212   : > { %v1068_v9 = vadd.f32 %v5331_v8, %v4912_v44  ;;  %v2060_v6 = vpack.c.bf16 %v1892_v52, %v5419_v12  ;;  %v3972_v56 = vpop.eup %3971  ;;  %v1770_v10 = vadd.f32 1.0, %v3966_v29  ;;  %v1772_v20 = vadd.f32 1.0, %v3968_v45  ;;  %v5519_v45 = vpop.f32.mrf.mxu0 }
 0x213   : > { %3987 = verf.f32 %v1527_v46  ;;  %2567 = vmatprep.mubr.bf16.mxu0 %v2058_v33  ;;  %v2057_v2 = vpack.c.bf16 %v5436_v53, %v5371_v51  ;;  %v3974_v62 = vpop.eup %3973  ;;  %v5508_v50 = vmul.f32 %v1769_v60, %v5385_v4  ;;  %v1773_v7 = vadd.f32 1.0, %v3970_v48  ;;  %v5521_v60 = vpop.f32.mrf.mxu1 }
 0x214   : > { %v1529_v8 = vmul.f32 0.70710677, %v1066_v25  ;;  %2760 = vmatprep.mubr.bf16.mxu1 %v2060_v6  ;;  %v2059_v12 = vpack.c.bf16 %v5442_v18, %v5392_v0  ;;  %v5513_v32 = vmul.f32 %v1771_v39, %v5399_v35  ;;  %v5515_v29 = vmul.f32 0.5, %v1062_v17 }
 0x215   : > { %v3976_v52 = vpop.eup %3975  ;;  %3989 = verf.f32 %v1526_v27  ;;  %v1531_v46 = vmul.f32 0.70710677, %v1259_v49  ;;  %2568 = vmatmul.mubr.bf16.gmra.mxu0 %v2057_v2  ;;  %v1775_v51 = vadd.f32 1.0, %v3972_v56  ;;  %v1530_v53 = vmul.f32 0.70710677, %v1068_v9  ;;  %v5544_v56 = vpop.f32.mrf.mxu0 }
 0x216   : > { %3991 = verf.f32 %v1528_v41  ;;  %v1261_v4 = vadd.f32 %v5333_v34, %v4914_v47  ;;  %2761 = vmatmul.mubr.bf16.gmra.mxu1 %v2059_v12  ;;  %v1898_v0 = vmul.f32 %v1770_v10, %v5409_v24  ;;  %v1900_v35 = vmul.f32 %v1772_v20, %v5431_v38  ;;  %v5546_v10 = vpop.f32.mrf.mxu1 }
 0x217   : > { %v1774_v18 = vadd.f32 1.0, %v3974_v62  ;;  %v5526_v17 = vmul.f32 0.5, %v5456_v11  ;;  %v3978_v48 = vpop.eup %3977  ;;  %v5529_v39 = vmul.f32 %v1773_v7, %v5439_v55  ;;  %v1776_v27 = vadd.f32 1.0, %v3976_v52  ;;  %v6350_v52 = vld [vmem:[#allocation28_spill] sm:$0xff] }
 0x218   : > { %v5531_v33 = vmul.f32 0.5, %v1064_v59  ;;  %3993 = verf.f32 %v1529_v8  ;;  %v5533_v41 = vmul.f32 0.5, %v1257_v58  ;;  %v5535_v6 = vmul.f32 0.5, %v1066_v25 }
 0x219   : > { %v3980_v34 = vpop.eup %3979  ;;  %3995 = verf.f32 %v1531_v46  ;;  %v1072_v24 = vadd.f32 %v5355_v22, %v4906_v40  ;;  %v5540_v11 = vmul.f32 %v1775_v51, %v5444_v54  ;;  %v1532_v55 = vmul.f32 0.70710677, %v1261_v4  ;;  %v5568_v51 = vpop.f32.mrf.mxu0 }
 0x21a   : > { %v3982_v38 = vpop.eup %3981  ;;  %3997 = verf.f32 %v1530_v53  ;;  %v1265_v59 = vadd.f32 %v5357_v3, %v4908_v43  ;;  %v5549_v58 = vmul.f32 %v1774_v18, %v5459_v31  ;;  %v1777_v25 = vadd.f32 1.0, %v3978_v48  ;;  %v6351_v18 = vld [vmem:[#allocation29_spill] sm:$0xff] }
 0x21b   : > { %v5551_v20 = vmul.f32 0.5, %v1259_v49  ;;  %v1074_v22 = vadd.f32 %v5379_v1, %v4912_v44  ;;  %v5556_v2 = vmul.f32 %v1776_v27, %v5462_v21  ;;  %v1779_v62 = vadd.f32 1.0, %v3980_v34 }
 0x21c   : > { %v3984_v54 = vpop.eup %3983  ;;  %v5558_v7 = vmul.f32 0.5, %v1068_v9  ;;  %v2062_v3 = vpack.c.bf16 %v1898_v0, %v5483_v16  ;;  %v1778_v8 = vadd.f32 1.0, %v3982_v38  ;;  %v5561_v12 = vmul.f32 0.5, %v1261_v4  ;;  %v5570_v9 = vpop.f32.mrf.mxu1 }
 0x21d   : > { %v1533_v31 = vmul.f32 0.70710677, %v1072_v24  ;;  %v1267_v49 = vadd.f32 %v6350_v52, %v4914_v47  ;;  %3999 = verf.f32 %v1532_v55  ;;  %v1535_v46 = vmul.f32 0.70710677, %v1265_v59 }
 0x21e   : > { %v1076_v1 = vadd.f32 %v5405_v57, %v4906_v40  ;;  %2577 = vmatprep.mubr.bf16.mxu0 %v2062_v3  ;;  %v2064_v21 = vpack.c.bf16 %v1900_v35, %v5489_v42  ;;  %v3986_v16 = vpop.eup %3985  ;;  %v5573_v53 = vmul.f32 %v1777_v25, %v5467_v26  ;;  %v1780_v4 = vadd.f32 1.0, %v3984_v54 }
 0x21f   : > { %v1534_v0 = vmul.f32 0.70710677, %v1074_v22  ;;  %v1269_v48 = vadd.f32 %v6351_v18, %v4908_v43  ;;  %v5578_v34 = vmul.f32 %v1779_v62, %v5474_v30  ;;  %v1078_v57 = vadd.f32 %v5427_v63, %v4912_v44  ;;  %v5591_v62 = vpop.f32.mrf.mxu0 }
 0x220   : > { %v3988_v27 = vpop.eup %3987  ;;  %2770 = vmatprep.mubr.bf16.mxu1 %v2064_v21  ;;  %v2061_v42 = vpack.c.bf16 %v5508_v50, %v5465_v36  ;;  %v2063_v26 = vpack.c.bf16 %v5513_v32, %v5472_v13  ;;  %v1906_v35 = vmul.f32 %v1778_v8, %v5485_v37  ;;  %4001 = verf.f32 %v1533_v31  ;;  %v5593_v36 = vpop.f32.mrf.mxu1 }
 0x221   : > { %v1536_v38 = vmul.f32 0.70710677, %v1267_v49  ;;  %v1271_v55 = vadd.f32 %v5429_v23, %v4914_v47  ;;  %v1781_v30 = vadd.f32 1.0, %v3986_v16  ;;  %v5589_v54 = vmul.f32 0.5, %v1072_v24 }
 0x222   : > { %v3990_v25 = vpop.eup %3989  ;;  %4003 = verf.f32 %v1535_v46  ;;  %v1537_v63 = vmul.f32 0.70710677, %v1076_v1  ;;  %2578 = vmatmul.mubr.bf16.gmra.mxu0 %v2061_v42  ;;  %2771 = vmatmul.mubr.bf16.gmra.mxu1 %v2063_v26  ;;  %v1908_v37 = vmul.f32 %v1780_v4, %v5491_v15  ;;  %v1783_v32 = vadd.f32 1.0, %v3988_v27 }
 0x223   : > { %v3992_v13 = vpop.eup %3991  ;;  %4005 = verf.f32 %v1534_v0  ;;  %v1539_v50 = vmul.f32 0.70710677, %v1269_v48  ;;  %v5596_v3 = vmul.f32 0.5, %v1265_v59  ;;  %v5598_v23 = vmul.f32 0.5, %v1074_v22  ;;  %v5609_v59 = vpop.f32.mrf.mxu0 }
 0x224   : > { %v1538_v24 = vmul.f32 0.70710677, %v1078_v57  ;;  %v1082_v8 = vadd.f32 %v5450_v19, %v4906_v40  ;;  %v1782_v52 = vadd.f32 1.0, %v3990_v25  ;;  %v5602_v46 = vmul.f32 0.5, %v1267_v49  ;;  %v5611_v22 = vpop.f32.mrf.mxu1 }
 0x225   : > { %v3994_v31 = vpop.eup %3993  ;;  %4007 = verf.f32 %v1536_v38  ;;  %v1540_v21 = vmul.f32 0.70710677, %v1271_v55  ;;  %v5605_v15 = vmul.f32 %v1781_v30, %v5515_v29  ;;  %v1784_v4 = vadd.f32 1.0, %v3992_v13 }
 0x226   : > { %v3996_v16 = vpop.eup %3995  ;;  %v5607_v0 = vmul.f32 0.5, %v1076_v1  ;;  %4009 = verf.f32 %v1537_v63  ;;  %v5614_v19 = vmul.f32 %v1783_v32, %v5526_v17  ;;  %v5616_v49 = vmul.f32 0.5, %v1269_v48  ;;  %v5633_v63 = vpop.f32.mrf.mxu0 }
 0x227   : > { %v3998_v18 = vpop.eup %3997  ;;  %4011 = verf.f32 %v1539_v50  ;;  %v1275_v27 = vadd.f32 %v5452_v28, %v4908_v43  ;;  %v1785_v29 = vadd.f32 1.0, %v3994_v31  ;;  %v1541_v42 = vmul.f32 0.70710677, %v1082_v8  ;;  %v5635_v13 = vpop.f32.mrf.mxu1 }
 0x228   : > { %4013 = verf.f32 %v1538_v24  ;;  %v1084_v1 = vadd.f32 %v5478_v61, %v4912_v44  ;;  %v5623_v26 = vmul.f32 %v1782_v52, %v5531_v33  ;;  %v1277_v17 = vadd.f32 %v5480_v5, %v4914_v47 }
 0x229   : > { %4015 = verf.f32 %v1540_v21  ;;  %v2066_v48 = vpack.c.bf16 %v1906_v35, %v5549_v58  ;;  %v5629_v38 = vmul.f32 %v1784_v4, %v5533_v41  ;;  %v1787_v25 = vadd.f32 1.0, %v3996_v16  ;;  %v6352_v35 = vld [vmem:[#allocation30_spill] sm:$0xff]  ;;  %v5665_v16 = vpop.f32.mrf.mxu1 }
 0x22a   : > { %v1786_v28 = vadd.f32 1.0, %v3998_v18  ;;  %v5631_v30 = vmul.f32 0.5, %v1078_v57  ;;  %v4000_v61 = vpop.eup %3999  ;;  %v5637_v33 = vmul.f32 0.5, %v1271_v55  ;;  %v1543_v32 = vmul.f32 0.70710677, %v1275_v27 }
 0x22b   : > { %v1086_v5 = vadd.f32 %v5501_v14, %v4906_v40  ;;  %2587 = vmatprep.mubr.bf16.mxu0 %v2066_v48  ;;  %v2068_v58 = vpack.c.bf16 %v1908_v37, %v5556_v2  ;;  %v5643_v41 = vmul.f32 %v1785_v29, %v5535_v6  ;;  %4017 = verf.f32 %v1541_v42 }
 0x22c   : > { %v1542_v57 = vmul.f32 0.70710677, %v1084_v1  ;;  %v1279_v50 = vadd.f32 %v6352_v35, %v4908_v43  ;;  %v1544_v24 = vmul.f32 0.70710677, %v1277_v17  ;;  %v5649_v55 = vadd.f32 %v5519_v45, %v4912_v44  ;;  %v5663_v45 = vpop.f32.mrf.mxu0 }
 0x22d   : > { %2780 = vmatprep.mubr.bf16.mxu1 %v2068_v58  ;;  %v2065_v14 = vpack.c.bf16 %v5573_v53, %v5529_v39  ;;  %v2067_v2 = vpack.c.bf16 %v5578_v34, %v5540_v11  ;;  %v4002_v37 = vpop.eup %4001  ;;  %v5656_v6 = vmul.f32 %v1787_v25, %v5551_v20  ;;  %v1914_v31 = vmul.f32 %v1786_v28, %v5558_v7 }
 0x22e   : > { %v1788_v52 = vadd.f32 1.0, %v4000_v61  ;;  %v5661_v21 = vadd.f32 %v5521_v60, %v4914_v47  ;;  %v5667_v39 = vmul.f32 0.5, %v1082_v8  ;;  %4019 = verf.f32 %v1543_v32  ;;  %v5688_v28 = vpop.f32.mrf.mxu0 }
 0x22f   : > { %v4004_v4 = vpop.eup %4003  ;;  %v1545_v11 = vmul.f32 0.70710677, %v1086_v5  ;;  %v5671_v20 = vadd.f32 %v5544_v56, %v4906_v40  ;;  %2588 = vmatmul.mubr.bf16.gmra.mxu0 %v2065_v14  ;;  %2781 = vmatmul.mubr.bf16.gmra.mxu1 %v2067_v2  ;;  %v5673_v53 = vmul.f32 0.5, %v1275_v27  ;;  %4021 = verf.f32 %v1542_v57 }
 0x230   : > { %v4006_v7 = vpop.eup %4005  ;;  %v1547_v60 = vmul.f32 0.70710677, %v1279_v50  ;;  %v5677_v34 = vadd.f32 %v5546_v10, %v4908_v43  ;;  %v1789_v18 = vadd.f32 1.0, %v4002_v37  ;;  %4023 = verf.f32 %v1544_v24  ;;  %v5690_v10 = vpop.f32.mrf.mxu1 }
 0x231   : > { %v1546_v8 = vmul.f32 0.70710677, %v5649_v55  ;;  %v5682_v29 = vadd.f32 %v5568_v51, %v4912_v44  ;;  %v1916_v42 = vmul.f32 %v1788_v52, %v5561_v12  ;;  %v1791_v48 = vadd.f32 1.0, %v4004_v4 }
 0x232   : > { %v4008_v56 = vpop.eup %4007  ;;  %v5685_v27 = vmul.f32 0.5, %v1084_v1  ;;  %v1548_v25 = vmul.f32 0.70710677, %v5661_v21  ;;  %v1790_v32 = vadd.f32 1.0, %v4006_v7  ;;  %v5692_v58 = vmul.f32 0.5, %v1277_v17 }
 0x233   : > { %v4010_v61 = vpop.eup %4009  ;;  %4025 = verf.f32 %v1545_v11  ;;  %v1549_v51 = vmul.f32 0.70710677, %v5671_v20  ;;  %v5695_v35 = vmul.f32 0.5, %v1086_v5  ;;  %v1551_v12 = vmul.f32 0.70710677, %v5677_v34  ;;  %v5714_v11 = vpop.f32.mrf.mxu1 }
 0x234   : > { %v4012_v57 = vpop.eup %4011  ;;  %4027 = verf.f32 %v1547_v60  ;;  %v1287_v1 = vadd.f32 %v5570_v9, %v4914_v47  ;;  %v5701_v14 = vmul.f32 %v1789_v18, %v5589_v54  ;;  %v5703_v2 = vmul.f32 0.5, %v1279_v50  ;;  %v5712_v9 = vpop.f32.mrf.mxu0 }
 0x235   : > { %v4014_v24 = vpop.eup %4013  ;;  %4029 = verf.f32 %v1546_v8  ;;  %v1550_v17 = vmul.f32 0.70710677, %v5682_v29  ;;  %v5707_v52 = vmul.f32 %v1791_v48, %v5596_v3  ;;  %v1096_v5 = vadd.f32 %v5591_v62, %v4906_v40 }
 0x236   : > { %v4016_v37 = vpop.eup %4015  ;;  %4031 = verf.f32 %v1548_v25  ;;  %v2070_v4 = vpack.c.bf16 %v1914_v31, %v5623_v26  ;;  %v5717_v54 = vmul.f32 %v1790_v32, %v5598_v23  ;;  %v1792_v50 = vadd.f32 1.0, %v4008_v56 }
 0x237   : > { %v1793_v7 = vadd.f32 1.0, %v4010_v61  ;;  %4033 = verf.f32 %v1549_v51  ;;  %v1795_v60 = vadd.f32 1.0, %v4012_v57  ;;  %v1552_v3 = vmul.f32 0.70710677, %v1287_v1 }
 0x238   : > { %4035 = verf.f32 %v1551_v12  ;;  %2597 = vmatprep.mubr.bf16.mxu0 %v2070_v4  ;;  %v2072_v18 = vpack.c.bf16 %v1916_v42, %v5629_v38  ;;  %v4018_v8 = vpop.eup %4017  ;;  %v1794_v62 = vadd.f32 1.0, %v4014_v24  ;;  %v1796_v48 = vadd.f32 1.0, %v4016_v37  ;;  %v5730_v38 = vpop.f32.mrf.mxu0 }
 0x239   : > { %4037 = verf.f32 %v1550_v17  ;;  %v1289_v26 = vadd.f32 %v5593_v36, %v4908_v43  ;;  %v1553_v31 = vmul.f32 0.70710677, %v1096_v5  ;;  %v5724_v23 = vadd.f32 %v5609_v59, %v4912_v44  ;;  %v5732_v42 = vpop.f32.mrf.mxu1 }
 0x23a   : > { %2790 = vmatprep.mubr.bf16.mxu1 %v2072_v18  ;;  %v2069_v56 = vpack.c.bf16 %v5643_v41, %v5605_v15  ;;  %v2071_v25 = vpack.c.bf16 %v5656_v6, %v5614_v19  ;;  %v5735_v61 = vmul.f32 %v1792_v50, %v5602_v46  ;;  %v5738_v36 = vmul.f32 %v1793_v7, %v5607_v0  ;;  %v5766_v12 = vpop.f32.mrf.mxu0 }
 0x23b   : > { %v5741_v59 = vmul.f32 0.5, %v5649_v55  ;;  %v5745_v32 = vadd.f32 %v5611_v22, %v4914_v47  ;;  %v4020_v15 = vpop.eup %4019  ;;  %v5748_v19 = vmul.f32 %v1795_v60, %v5616_v49  ;;  %v5751_v41 = vmul.f32 0.5, %v5661_v21  ;;  %v5768_v24 = vpop.f32.mrf.mxu1 }
 0x23c   : > { %v5754_v46 = vmul.f32 0.5, %v5671_v20  ;;  %4039 = verf.f32 %v1552_v3  ;;  %2598 = vmatmul.mubr.bf16.gmra.mxu0 %v2069_v56  ;;  %2791 = vmatmul.mubr.bf16.gmra.mxu1 %v2071_v25  ;;  %v4022_v0 = vpop.eup %4021  ;;  %v1922_v55 = vmul.f32 %v1794_v62, %v5631_v30  ;;  %v1797_v6 = vadd.f32 1.0, %v4018_v8 }
 0x23d   : > { %v5758_v22 = vmul.f32 0.5, %v5677_v34  ;;  %v1555_v51 = vmul.f32 0.70710677, %v1289_v26  ;;  %v4024_v57 = vpop.eup %4023  ;;  %v1924_v49 = vmul.f32 %v1796_v48, %v5637_v33  ;;  %4041 = verf.f32 %v1553_v31 }
 0x23e   : > { %v1554_v21 = vmul.f32 0.70710677, %v5724_v23  ;;  %v5764_v20 = vadd.f32 %v5633_v63, %v4906_v40  ;;  %v1799_v30 = vadd.f32 1.0, %v4020_v15  ;;  %v5771_v17 = vmul.f32 0.5, %v5682_v29 }
 0x23f   : > { %v1556_v34 = vmul.f32 0.70710677, %v5745_v32  ;;  %v5776_v33 = vadd.f32 %v5635_v13, %v4908_v43  ;;  %v1798_v4 = vadd.f32 1.0, %v4022_v0  ;;  %v5778_v50 = vmul.f32 0.5, %v1287_v1 }
 0x240   : > { %v4026_v37 = vpop.eup %4025  ;;  %v5780_v63 = vmul.f32 0.5, %v1096_v5  ;;  %v5784_v7 = vadd.f32 %v5663_v45, %v4912_v44  ;;  %v5787_v29 = vmul.f32 %v1797_v6, %v5667_v39  ;;  %v1800_v3 = vadd.f32 1.0, %v4024_v57  ;;  %v5800_v5 = vpop.f32.mrf.mxu0 }
 0x241   : > { %v4028_v60 = vpop.eup %4027  ;;  %4043 = verf.f32 %v1555_v51  ;;  %v5791_v13 = vadd.f32 %v5688_v28, %v4906_v40  ;;  %v5793_v8 = vmul.f32 0.5, %v1289_v26  ;;  %v1557_v1 = vmul.f32 0.70710677, %v5764_v20  ;;  %v5802_v39 = vpop.f32.mrf.mxu1 }
 0x242   : > { %v4030_v18 = vpop.eup %4029  ;;  %4045 = verf.f32 %v1554_v21  ;;  %v5798_v45 = vadd.f32 %v5690_v10, %v4908_v43  ;;  %v5805_v48 = vmul.f32 %v1799_v30, %v5673_v53  ;;  %v1559_v28 = vmul.f32 0.70710677, %v5776_v33  ;;  %v1117_v30 = vpop.f32.mrf.mxu0 }
 0x243   : > { %v4032_v62 = vpop.eup %4031  ;;  %4047 = verf.f32 %v1556_v34  ;;  %v2074_v26 = vpack.c.bf16 %v1922_v55, %v5717_v54  ;;  %v5810_v56 = vmul.f32 %v1798_v4, %v5685_v27  ;;  %v1801_v25 = vadd.f32 1.0, %v4026_v37  ;;  %v1310_v34 = vpop.f32.mrf.mxu1 }
 0x244   : > { %v4034_v31 = vpop.eup %4033  ;;  %v1803_v10 = vadd.f32 1.0, %v4028_v60  ;;  %v1558_v15 = vmul.f32 0.70710677, %v5784_v7  ;;  %v5814_v6 = vmul.f32 %v1800_v3, %v5692_v58  ;;  %v1297_v53 = vadd.f32 %v5665_v16, %v4914_v47 }
 0x245   : > { %v4036_v0 = vpop.eup %4035  ;;  %v1561_v51 = vmul.f32 0.70710677, %v5791_v13  ;;  %2607 = vmatprep.mubr.bf16.mxu0 %v2074_v26  ;;  %v2076_v54 = vpack.c.bf16 %v1924_v49, %v5735_v61  ;;  %v1802_v57 = vadd.f32 1.0, %v4030_v18  ;;  %v5821_v27 = vmul.f32 0.5, %v5724_v23 }
 0x246   : > { %v4038_v55 = vpop.eup %4037  ;;  %4049 = verf.f32 %v1557_v1  ;;  %v1563_v21 = vmul.f32 0.70710677, %v5798_v45  ;;  %v1804_v58 = vadd.f32 1.0, %v4032_v62  ;;  %v2073_v16 = vpack.c.bf16 %v5738_v36, %v5701_v14 }
 0x247   : > { %4051 = verf.f32 %v1559_v28  ;;  %2800 = vmatprep.mubr.bf16.mxu1 %v2076_v54  ;;  %v2075_v37 = vpack.c.bf16 %v5748_v19, %v5707_v52  ;;  %v5829_v61 = vmul.f32 %v1801_v25, %v5695_v35  ;;  %v5832_v23 = vmul.f32 %v1803_v10, %v5703_v2  ;;  %v5842_v2 = vpop.f32.mrf.mxu0 }
 0x248   : > { %v5835_v49 = vmul.f32 0.5, %v5745_v32  ;;  %4053 = verf.f32 %v1558_v15  ;;  %v1805_v60 = vadd.f32 1.0, %v4034_v31  ;;  %v1560_v3 = vmul.f32 0.70710677, %v1297_v53  ;;  %2608 = vmatmul.mubr.bf16.gmra.mxu0 %v2073_v16  ;;  %v5844_v32 = vpop.f32.mrf.mxu1 }
 0x249   : > { %v4040_v4 = vpop.eup %4039  ;;  %4055 = verf.f32 %v1561_v51  ;;  %v1108_v14 = vadd.f32 %v5712_v9, %v4912_v44  ;;  %2801 = vmatmul.mubr.bf16.gmra.mxu1 %v2075_v37  ;;  %v1807_v52 = vadd.f32 1.0, %v4036_v0  ;;  %v1806_v36 = vadd.f32 1.0, %v4038_v55 }
 0x24a   : > { %v5840_v35 = vmul.f32 0.5, %v5764_v20  ;;  %4057 = verf.f32 %v1563_v21  ;;  %v4042_v19 = vpop.eup %4041  ;;  %v1930_v18 = vmul.f32 %v1802_v57, %v5741_v59  ;;  %v1932_v1 = vmul.f32 %v1804_v58, %v5751_v41  ;;  %v1316_v0 = vpop.f32.mrf.mxu1 }
 0x24b   : > { %v5849_v62 = vmul.f32 0.5, %v5776_v33  ;;  %v1301_v9 = vadd.f32 %v5714_v11, %v4914_v47  ;;  %v1808_v28 = vadd.f32 1.0, %v4040_v4  ;;  %v5854_v20 = vmul.f32 0.5, %v5784_v7 }
 0x24c   : > { %v5856_v26 = vmul.f32 0.5, %v1297_v53  ;;  %v5860_v31 = vadd.f32 %v5730_v38, %v4906_v40  ;;  %v5863_v59 = vmul.f32 %v1805_v60, %v5754_v46  ;;  %4059 = verf.f32 %v1560_v3  ;;  %v1123_v38 = vpop.f32.mrf.mxu0 }
 0x24d   : > { %v5866_v41 = vmul.f32 0.5, %v5791_v13  ;;  %v1562_v33 = vmul.f32 0.70710677, %v1108_v14  ;;  %v5869_v11 = vmul.f32 %v1807_v52, %v5758_v22  ;;  %v5872_v7 = vmul.f32 %v1806_v36, %v5771_v17 }
 0x24e   : > { %v4044_v25 = vpop.eup %4043  ;;  %v1809_v10 = vadd.f32 1.0, %v4042_v19  ;;  %v5875_v15 = vmul.f32 0.5, %v5798_v45  ;;  %v1564_v53 = vmul.f32 0.70710677, %v1301_v9  ;;  %v1114_v13 = vadd.f32 %v5766_v12, %v4912_v44  ;;  %v1125_v37 = vpop.f32.mrf.mxu0 }
 0x24f   : > { %v4046_v46 = vpop.eup %4045  ;;  %v5880_v51 = vadd.f32 %v1117_v30, %v4912_v44  ;;  %v5883_v22 = vadd.f32 %v1310_v34, %v4914_v47  ;;  %v5886_v17 = vmul.f32 %v1808_v28, %v5778_v50  ;;  %v1565_v45 = vmul.f32 0.70710677, %v5860_v31 }
 0x250   : > { %v4048_v54 = vpop.eup %4047  ;;  %v1307_v55 = vadd.f32 %v5768_v24, %v4914_v47  ;;  %v2078_v57 = vpack.c.bf16 %v1930_v18, %v5810_v56  ;;  %v1811_v21 = vadd.f32 1.0, %v4044_v25  ;;  %4061 = verf.f32 %v1562_v33  ;;  %v1318_v24 = vpop.f32.mrf.mxu1 }
 0x251   : > { %v5894_v12 = vadd.f32 %v5732_v42, %v4908_v43  ;;  %v1570_v30 = vmul.f32 0.70710677, %v5880_v51  ;;  %v1810_v34 = vadd.f32 1.0, %v4046_v46  ;;  %v5897_v58 = vmul.f32 0.5, %v1108_v14 }
 0x252   : > { %v1572_v50 = vmul.f32 0.70710677, %v5883_v22  ;;  %2617 = vmatprep.mubr.bf16.mxu0 %v2078_v57  ;;  %v2080_v16 = vpack.c.bf16 %v1932_v1, %v5814_v6  ;;  %v1812_v56 = vadd.f32 1.0, %v4048_v54  ;;  %4063 = verf.f32 %v1564_v53 }
 0x253   : > { %v4050_v4 = vpop.eup %4049  ;;  %v1566_v60 = vmul.f32 0.70710677, %v1114_v13  ;;  %v1116_v42 = vadd.f32 %v5800_v5, %v4906_v40  ;;  %4065 = verf.f32 %v1565_v45  ;;  %v1568_v52 = vmul.f32 0.70710677, %v1307_v55 }
 0x254   : > { %v4052_v3 = vpop.eup %4051  ;;  %v1309_v14 = vadd.f32 %v5802_v39, %v4908_v43  ;;  %2810 = vmatprep.mubr.bf16.mxu1 %v2080_v16  ;;  %v2077_v36 = vpack.c.bf16 %v5829_v61, %v5787_v29  ;;  %v5908_v19 = vmul.f32 %v1809_v10, %v5780_v63  ;;  %v5910_v18 = vmul.f32 0.5, %v1301_v9  ;;  %v1127_v39 = vpop.f32.mrf.mxu0 }
 0x255   : > { %v4054_v6 = vpop.eup %4053  ;;  %v1567_v1 = vmul.f32 0.70710677, %v5894_v12  ;;  %4067 = verf.f32 %v1570_v30  ;;  %v5914_v28 = vmul.f32 %v1811_v21, %v5793_v8  ;;  %v5917_v33 = vmul.f32 %v1810_v34, %v5821_v27  ;;  %v1320_v63 = vpop.f32.mrf.mxu1 }
 0x256   : > { %v4056_v5 = vpop.eup %4055  ;;  %4069 = verf.f32 %v1572_v50  ;;  %2618 = vmatmul.mubr.bf16.gmra.mxu0 %v2077_v36  ;;  %v2079_v29 = vpack.c.bf16 %v5832_v23, %v5805_v48  ;;  %v1813_v9 = vadd.f32 1.0, %v4050_v4  ;;  %v1569_v25 = vmul.f32 0.70710677, %v1116_v42  ;;  %v5934_v30 = vpop.f32.mrf.mxu0 }
 0x257   : > { %v4058_v61 = vpop.eup %4057  ;;  %4071 = verf.f32 %v1566_v60  ;;  %v5922_v10 = vadd.f32 %v1123_v38, %v4912_v44  ;;  %v1940_v8 = vmul.f32 %v1812_v56, %v5835_v49  ;;  %v1571_v46 = vmul.f32 0.70710677, %v1309_v14  ;;  %v5936_v49 = vpop.f32.mrf.mxu1 }
 0x258   : > { %4073 = verf.f32 %v1568_v52  ;;  %2811 = vmatmul.mubr.bf16.gmra.mxu1 %v2079_v29  ;;  %v5926_v27 = vadd.f32 %v1316_v0, %v4914_v47  ;;  %v1815_v53 = vadd.f32 1.0, %v4052_v3  ;;  %v5928_v48 = vmul.f32 0.5, %v1114_v13 }
 0x259   : > { %4075 = verf.f32 %v1567_v1  ;;  %v5930_v23 = vmul.f32 0.5, %v1307_v55  ;;  %v4060_v54 = vpop.eup %4059  ;;  %v1814_v45 = vadd.f32 1.0, %v4054_v6  ;;  %v1817_v57 = vadd.f32 1.0, %v4056_v5  ;;  %v1326_v36 = vpop.f32.mrf.mxu1 }
 0x25a   : > { %v1819_v21 = vadd.f32 1.0, %v4058_v61  ;;  %v5932_v38 = vmul.f32 0.5, %v1116_v42  ;;  %v5939_v34 = vmul.f32 %v1813_v9, %v5840_v35  ;;  %4077 = verf.f32 %v1569_v25 }
 0x25b   : > { %v5941_v0 = vmul.f32 0.5, %v1309_v14  ;;  %v1574_v13 = vmul.f32 0.70710677, %v5922_v10  ;;  %4079 = verf.f32 %v1571_v46  ;;  %v5946_v55 = vadd.f32 %v5842_v2, %v4906_v40  ;;  %v1133_v14 = vpop.f32.mrf.mxu0 }
 0x25c   : > { %v1576_v50 = vmul.f32 0.70710677, %v5926_v27  ;;  %v5950_v16 = vadd.f32 %v1127_v39, %v4912_v44  ;;  %v5953_v4 = vmul.f32 %v1815_v53, %v5849_v62  ;;  %v1816_v35 = vadd.f32 1.0, %v4060_v54 }
 0x25d   : > { %v5956_v56 = vadd.f32 %v1125_v37, %v4906_v40  ;;  %v5959_v60 = vadd.f32 %v1320_v63, %v4914_v47  ;;  %v4062_v42 = vpop.eup %4061  ;;  %v5962_v3 = vmul.f32 %v1814_v45, %v5854_v20  ;;  %v5965_v2 = vmul.f32 %v1817_v57, %v5866_v41 }
 0x25e   : > { %v5968_v52 = vmul.f32 %v1819_v21, %v5875_v15  ;;  %v5971_v62 = vadd.f32 %v1318_v24, %v4908_v43  ;;  %v5975_v37 = vadd.f32 %v5844_v32, %v4908_v43  ;;  %4081 = verf.f32 %v1574_v13 }
 0x25f   : > { %v1578_v6 = vmul.f32 0.70710677, %v5950_v16  ;;  %v1580_v20 = vmul.f32 0.70710677, %v5959_v60  ;;  %v4064_v1 = vpop.eup %4063  ;;  %v1573_v41 = vmul.f32 0.70710677, %v5946_v55  ;;  %4083 = verf.f32 %v1576_v50 }
 0x260   : > { %v2082_v15 = vpack.c.bf16 %v5917_v33, %v5872_v7  ;;  %v2084_v24 = vpack.c.bf16 %v1940_v8, %v5886_v17  ;;  %v4066_v5 = vpop.eup %4065  ;;  %v5984_v29 = vmul.f32 %v1816_v35, %v5856_v26  ;;  %v1818_v32 = vadd.f32 1.0, %v4062_v42  ;;  %v1135_v7 = vpop.f32.mrf.mxu0 }
 0x261   : > { %v1577_v39 = vmul.f32 0.70710677, %v5956_v56  ;;  %4085 = verf.f32 %v1578_v6  ;;  %v1442_v61 = vmul.f32 0.5, %v5880_v51  ;;  %v1444_v9 = vmul.f32 0.5, %v5883_v22  ;;  %v1328_v17 = vpop.f32.mrf.mxu1 }
 0x262   : > { %v4068_v63 = vpop.eup %4067  ;;  %v1579_v25 = vmul.f32 0.70710677, %v5971_v62  ;;  %4087 = verf.f32 %v1580_v20  ;;  %2627 = vmatprep.mubr.bf16.mxu0 %v2082_v15  ;;  %2820 = vmatprep.mubr.bf16.mxu1 %v2084_v24  ;;  %v2085_v26 = vpack.c.bf16 %v5965_v2, %v5939_v34  ;;  %v2087_v8 = vpack.c.bf16 %v5968_v52, %v5953_v4 }
 0x263   : > { %v4070_v33 = vpop.eup %4069  ;;  %v1820_v46 = vadd.f32 1.0, %v4064_v1  ;;  %v1575_v53 = vmul.f32 0.70710677, %v5975_v37  ;;  %4089 = verf.f32 %v1573_v41  ;;  %v2081_v22 = vpack.c.bf16 %v5908_v19, %v5863_v59  ;;  %v1330_v19 = vpop.f32.mrf.mxu1 }
 0x264   : > { %v4072_v51 = vpop.eup %4071  ;;  %v2083_v54 = vpack.c.bf16 %v5914_v28, %v5869_v11  ;;  %v6000_v45 = vadd.f32 %v1133_v14, %v4912_v44  ;;  %v1946_v21 = vmul.f32 %v1818_v32, %v5897_v58  ;;  %4091 = verf.f32 %v1577_v39  ;;  %v1137_v11 = vpop.f32.mrf.mxu0 }
 0x265   : > { %v4074_v57 = vpop.eup %4073  ;;  %v6004_v13 = vadd.f32 %v1326_v36, %v4914_v47  ;;  %v6007_v50 = vadd.f32 %v1135_v7, %v4906_v40  ;;  %v1826_v42 = vadd.f32 1.0, %v4068_v63  ;;  %v1828_v6 = vadd.f32 1.0, %v4070_v33  ;;  %2628 = vmatmul.mubr.bf16.gmra.mxu0 %v2081_v22 }
 0x266   : > { %v4076_v35 = vpop.eup %4075  ;;  %4093 = verf.f32 %v1579_v25  ;;  %2821 = vmatmul.mubr.bf16.gmra.mxu1 %v2083_v54  ;;  %v1582_v59 = vmul.f32 0.70710677, %v6000_v45  ;;  %v1948_v28 = vmul.f32 %v1820_v46, %v5910_v18  ;;  %v1822_v58 = vadd.f32 1.0, %v4072_v51 }
 0x267   : > { %4095 = verf.f32 %v1575_v53  ;;  %v1584_v14 = vmul.f32 0.70710677, %v6004_v13  ;;  %v4078_v36 = vpop.eup %4077  ;;  %v1824_v20 = vadd.f32 1.0, %v4074_v57  ;;  %v6014_v1 = vadd.f32 %v5934_v30, %v4906_v40 }
 0x268   : > { %v1585_v41 = vmul.f32 0.70710677, %v6007_v50  ;;  %v6018_v15 = vadd.f32 %v1328_v17, %v4908_v43  ;;  %v4080_v24 = vpop.eup %4079  ;;  %v6022_v32 = vadd.f32 %v5936_v49, %v4908_v43  ;;  %4097 = verf.f32 %v1582_v59 }
 0x269   : > { %v6025_v18 = vadd.f32 %v1137_v11, %v4912_v44  ;;  %v6028_v39 = vadd.f32 %v1330_v19, %v4914_v47  ;;  %v1821_v63 = vadd.f32 1.0, %v4066_v5  ;;  %v1954_v40 = vmul.f32 %v1826_v42, %v1442_v61 }
 0x26a   : > { %v1956_v30 = vmul.f32 %v1828_v6, %v1444_v9  ;;  %v1587_v25 = vmul.f32 0.70710677, %v6018_v15  ;;  %v1950_v7 = vmul.f32 %v1822_v58, %v5928_v48  ;;  %v1825_v17 = vadd.f32 1.0, %v4078_v36 }
 0x26b   : > { %4099 = verf.f32 %v1584_v14  ;;  %v1586_v33 = vmul.f32 0.70710677, %v6025_v18  ;;  %v4082_v43 = vpop.eup %4081  ;;  %v1952_v49 = vmul.f32 %v1824_v20, %v5930_v23  ;;  %v1827_v46 = vadd.f32 1.0, %v4080_v24 }
 0x26c   : > { %v1581_v44 = vmul.f32 0.70710677, %v6014_v1  ;;  %4101 = verf.f32 %v1585_v41  ;;  %v4084_v47 = vpop.eup %4083  ;;  %v1583_v5 = vmul.f32 0.70710677, %v6022_v32  ;;  %v1588_v61 = vmul.f32 0.70710677, %v6028_v39 }
 0x26d   : > { %4103 = verf.f32 %v1586_v33  ;;  %v2086_v9 = vpack.c.bf16 %v1946_v21, %v5962_v3  ;;  %v2088_v53 = vpack.c.bf16 %v1948_v28, %v5984_v29  ;;  %v2090_v51 = vpack.c.bf16 %v1954_v40, %v1950_v7 }
 0x26e   : > { %v4086_v48 = vpop.eup %4085  ;;  %4105 = verf.f32 %v1587_v25  ;;  %v2092_v22 = vpack.c.bf16 %v1956_v30, %v1952_v49  ;;  %v1830_v23 = vadd.f32 1.0, %v4082_v43  ;;  %v1450_v57 = vmul.f32 0.5, %v5950_v16 }
 0x26f   : > { %v4088_v54 = vpop.eup %4087  ;;  %v1834_v42 = vadd.f32 1.0, %v4086_v48  ;;  %4107 = verf.f32 %v1588_v61  ;;  %2637 = vmatprep.mubr.bf16.mxu0 %v2086_v9  ;;  %v1832_v6 = vadd.f32 1.0, %v4084_v47  ;;  %v1452_v59 = vmul.f32 0.5, %v5959_v60  ;;  %2830 = vmatprep.mubr.bf16.mxu1 %v2088_v53 }
 0x270   : > { %v1836_v11 = vadd.f32 1.0, %v4088_v54  ;;  %4109 = verf.f32 %v1581_v44  ;;  %2638 = vmatmul.mubr.bf16.gmra.mxu0 %v2085_v26  ;;  %v4090_v3 = vpop.eup %4089  ;;  %v1823_v29 = vadd.f32 1.0, %v4076_v35  ;;  %v1446_v21 = vmul.f32 0.5, %v5922_v10  ;;  %2831 = vmatmul.mubr.bf16.gmra.mxu1 %v2087_v8 }
 0x271   : > { %v1962_v19 = vmul.f32 %v1834_v42, %v1450_v57  ;;  %4111 = verf.f32 %v1583_v5  ;;  %2647 = vmatprep.mubr.bf16.mxu0 %v2090_v51  ;;  %v4092_v16 = vpop.eup %4091  ;;  %v1437_v60 = vmul.f32 0.5, %v5860_v31  ;;  %v1953_v28 = vmul.f32 %v1825_v17, %v5932_v38  ;;  %2840 = vmatprep.mubr.bf16.mxu1 %v2092_v22 }
 0x272   : > { %v1448_v58 = vmul.f32 0.5, %v5926_v27  ;;  %v1964_v34 = vmul.f32 %v1836_v11, %v1452_v59  ;;  %v1439_v26 = vmul.f32 0.5, %v5894_v12  ;;  %v1955_v10 = vmul.f32 %v1827_v46, %v5941_v0 }
 0x273   : > { %v4094_v2 = vpop.eup %4093  ;;  %v1958_v35 = vmul.f32 %v1830_v23, %v1446_v21  ;;  %v1949_v36 = vmul.f32 %v1821_v63, %v1437_v60  ;;  %v1833_v31 = vadd.f32 1.0, %v4092_v16  ;;  %v1829_v30 = vadd.f32 1.0, %v4090_v3 }
 0x274   : > { %v4096_v14 = vpop.eup %4095  ;;  %v1960_v4 = vmul.f32 %v1832_v6, %v1448_v58  ;;  %v1951_v52 = vmul.f32 %v1823_v29, %v1439_v26  ;;  %v1835_v24 = vadd.f32 1.0, %v4094_v2  ;;  %v1449_v7 = vmul.f32 0.5, %v5956_v56 }
 0x275   : > { %v2094_v8 = vpack.c.bf16 %v1962_v19, %v1958_v35  ;;  %v4098_v20 = vpop.eup %4097  ;;  %v2089_v41 = vpack.c.bf16 %v1953_v28, %v1949_v36  ;;  %v1831_v25 = vadd.f32 1.0, %v4096_v14  ;;  %v1451_v12 = vmul.f32 0.5, %v5971_v62  ;;  %v1974_v36 = vld [vmem:[#allocation2 + $0x1b0] sm:$0xff] }
 0x276   : > { %v2096_v38 = vpack.c.bf16 %v1964_v34, %v1960_v4  ;;  %v2091_v40 = vpack.c.bf16 %v1955_v10, %v1951_v52  ;;  %v1838_v17 = vadd.f32 1.0, %v4098_v20  ;;  %v1445_v33 = vmul.f32 0.5, %v5946_v55  ;;  %v1973_v10 = vld [vmem:[#allocation2 + $0xb0] sm:$0xff]  ;;  %v1975_v20 = vld [vmem:[#allocation2 + $0xd8] sm:$0xff] }
 0x277   : > { %v1447_v43 = vmul.f32 0.5, %v5975_v37  ;;  %v1961_v49 = vmul.f32 %v1833_v31, %v1449_v7  ;;  %v1963_v46 = vmul.f32 %v1835_v24, %v1451_v12  ;;  %v1454_v47 = vmul.f32 0.5, %v6000_v45  ;;  %v1977_v12 = vld [vmem:[#allocation2 + $0x50] sm:$0xff] }
 0x278   : > { %v4100_v27 = vpop.eup %4099  ;;  %2648 = vmatmul.mubr.bf16.gmra.mxu0 %v2089_v41  ;;  %2841 = vmatmul.mubr.bf16.gmra.mxu1 %v2091_v40  ;;  %v1458_v56 = vmul.f32 0.5, %v6025_v18  ;;  %v1957_v9 = vmul.f32 %v1829_v30, %v1445_v33  ;;  %v1456_v53 = vmul.f32 0.5, %v6004_v13  ;;  %v1460_v37 = vmul.f32 0.5, %v6028_v39  ;;  %v1978_v33 = vld [vmem:[#allocation2 + $0x168] sm:$0xff] }
 0x279   : > { %v4102_v0 = vpop.eup %4101  ;;  %2657 = vmatprep.mubr.bf16.mxu0 %v2094_v8  ;;  %2850 = vmatprep.mubr.bf16.mxu1 %v2096_v38  ;;  %v1840_v5 = vadd.f32 1.0, %v4100_v27  ;;  %v1959_v48 = vmul.f32 %v1831_v25, %v1447_v43  ;;  %v1966_v22 = vmul.f32 %v1838_v17, %v1454_v47  ;;  %v1457_v29 = vmul.f32 0.5, %v6007_v50  ;;  %v1976_v38 = vld [vmem:[#allocation2 + $0x18] sm:$0xff]  ;;  %v1979_v47 = vld [vmem:[#allocation2 + $0x130] sm:$0xff] }
 0x27a   : > { %v4104_v63 = vpop.eup %4103  ;;  %v2093_v57 = vpack.c.bf16 %v1961_v49, %v1957_v9  ;;  %v1841_v6 = vadd.f32 1.0, %v4102_v0  ;;  %v1459_v13 = vmul.f32 0.5, %v6018_v15  ;;  %v1453_v39 = vmul.f32 0.5, %v6014_v1  ;;  %v1980_v9 = vld [vmem:[#allocation2 + $0x48] sm:$0xff] }
 0x27b   : > { %v4106_v44 = vpop.eup %4105  ;;  %v1842_v62 = vadd.f32 1.0, %v4104_v63  ;;  %v2095_v42 = vpack.c.bf16 %v1963_v46, %v1959_v48  ;;  %v1968_v45 = vmul.f32 %v1840_v5, %v1456_v53  ;;  %v1455_v60 = vmul.f32 0.5, %v6022_v32 }
 0x27c   : > { %v4108_v61 = vpop.eup %4107  ;;  %v1843_v59 = vadd.f32 1.0, %v4106_v44  ;;  %v1969_v16 = vmul.f32 %v1841_v6, %v1457_v29 }
 0x27d   : > { %v4110_v51 = vpop.eup %4109  ;;  %v1970_v55 = vmul.f32 %v1842_v62, %v1458_v56  ;;  %v1844_v54 = vadd.f32 1.0, %v4108_v61 }
 0x27e   : > { %v4112_v23 = vpop.eup %4111  ;;  %v1837_v3 = vadd.f32 1.0, %v4110_v51  ;;  %v1971_v28 = vmul.f32 %v1843_v59, %v1459_v13 }
 0x27f   : > { %v1972_v11 = vmul.f32 %v1844_v54, %v1460_v37  ;;  %v2098_v18 = vpack.c.bf16 %v1970_v55, %v1966_v22  ;;  %v1839_v21 = vadd.f32 1.0, %v4112_v23  ;;  %v1981_v37 = vld [vmem:[#allocation2 + $0x180] sm:$0xff] }
 0x280   : > { %2658 = vmatmul.mubr.bf16.gmra.mxu0 %v2093_v57  ;;  %2851 = vmatmul.mubr.bf16.gmra.mxu1 %v2095_v42  ;;  %v1965_v58 = vmul.f32 %v1837_v3, %v1453_v39  ;;  %v1982_v42 = vld [vmem:[#allocation2 + $0x110] sm:$0xff] }
 0x281   : > { %2667 = vmatprep.mubr.bf16.mxu0 %v2098_v18  ;;  %v2100_v19 = vpack.c.bf16 %v1972_v11, %v1968_v45  ;;  %v1967_v34 = vmul.f32 %v1839_v21, %v1455_v60  ;;  %v1983_v18 = vld [vmem:[#allocation2 + $0x118] sm:$0xff] }
 0x282   : > { %v2097_v2 = vpack.c.bf16 %v1969_v16, %v1965_v58 }
 0x283   : > { %2860 = vmatprep.mubr.bf16.mxu1 %v2100_v19  ;;  %v2099_v26 = vpack.c.bf16 %v1971_v28, %v1967_v34  ;;  %v1984_v19 = vld [vmem:[#allocation2 + $0x98] sm:$0xff] }
 0x288   : > { %2668 = vmatmul.mubr.bf16.gmra.mxu0 %v2097_v2  ;;  %2861 = vmatmul.mubr.bf16.gmra.mxu1 %v2099_v26  ;;  %v1985_v2 = vld [vmem:[#allocation2 + $0x120] sm:$0xff] }
 0x291   : > { %v2519_v50 = vpop.f32.mrf.mxu0 }
 0x293   : > { %v2712_v35 = vpop.f32.mrf.mxu1  ;;  %v2521_v14 = vpop.f32.mrf.mxu0 }
 0x294   : > { %v2713_v15 = vadd.f32 %v2712_v35, %v2519_v50  ;;  %v1986_v35 = vld [vmem:[#allocation2 + $0x150] sm:$0xff] }
 0x295   : > { %v2714_v4 = vpop.f32.mrf.mxu1  ;;  %v2523_v8 = vpop.f32.mrf.mxu0 }
 0x296   : > { %v2871_v52 = vadd.f32 %v2713_v15, %v1973_v10  ;;  %v2715_v1 = vadd.f32 %v2714_v4, %v2521_v14  ;;  %v1987_v4 = vld [vmem:[#allocation2 + $0x108] sm:$0xff] }
 0x297   : > { %v2716_v32 = vpop.f32.mrf.mxu1  ;;  %v2525_v24 = vpop.f32.mrf.mxu0 }
 0x298   : > { %2935 = vst [vmem:[#allocation2 + $0xb0] sm:$0xff] %v2871_v52  ;;  %v2872_v41 = vadd.f32 %v2715_v1, %v1974_v36  ;;  %v2717_v31 = vadd.f32 %v2716_v32, %v2523_v8  ;;  %v1988_v32 = vld [vmem:[#allocation2 + $0x60] sm:$0xff] }
 0x299   : > { %v2718_v40 = vpop.f32.mrf.mxu1 }
 0x29a   : > { %2936 = vst [vmem:[#allocation2 + $0x1b0] sm:$0xff] %v2872_v41  ;;  %v2873_v27 = vadd.f32 %v2717_v31, %v1975_v20  ;;  %v2719_v30 = vadd.f32 %v2718_v40, %v2525_v24 }
 0x29c   : > { %2937 = vst [vmem:[#allocation2 + $0xd8] sm:$0xff] %v2873_v27  ;;  %v2874_v25 = vadd.f32 %v2719_v30, %v1976_v38  ;;  %v1989_v27 = vld [vmem:[#allocation2 + $0xe0] sm:$0xff] }
 0x29e   : > { %2938 = vst [vmem:[#allocation2 + $0x18] sm:$0xff] %v2874_v25 }
 0x2a1   : > { %v2529_v7 = vpop.f32.mrf.mxu0 }
 0x2a2   : > { %v2722_v0 = vpop.f32.mrf.mxu1 }
 0x2a3   : > { %v2723_v17 = vadd.f32 %v2722_v0, %v2529_v7  ;;  %v2531_v63 = vpop.f32.mrf.mxu0 }
 0x2a4   : > { %v2724_v43 = vpop.f32.mrf.mxu1 }
 0x2a5   : > { %v2875_v49 = vadd.f32 %v2723_v17, %v1977_v12  ;;  %v2725_v46 = vadd.f32 %v2724_v43, %v2531_v63  ;;  %v2533_v44 = vpop.f32.mrf.mxu0  ;;  %v1990_v12 = vld [vmem:[#allocation2 + $0x188] sm:$0xff]  ;;  %v1991_v43 = vld [vmem:[#allocation2 + $0x138] sm:$0xff] }
 0x2a6   : > { %v2726_v5 = vpop.f32.mrf.mxu1 }
 0x2a7   : > { %2939 = vst [vmem:[#allocation2 + $0x50] sm:$0xff] %v2875_v49  ;;  %v2876_v56 = vadd.f32 %v2725_v46, %v1978_v33  ;;  %v2727_v62 = vadd.f32 %v2726_v5, %v2533_v44  ;;  %v2535_v61 = vpop.f32.mrf.mxu0  ;;  %v1992_v5 = vld [vmem:[#allocation2 + $0x140] sm:$0xff] }
 0x2a8   : > { %v2728_v48 = vpop.f32.mrf.mxu1 }
 0x2a9   : > { %2940 = vst [vmem:[#allocation2 + $0x168] sm:$0xff] %v2876_v56  ;;  %v2877_v53 = vadd.f32 %v2727_v62, %v1979_v47  ;;  %v2729_v51 = vadd.f32 %v2728_v48, %v2535_v61 }
 0x2ab   : > { %2941 = vst [vmem:[#allocation2 + $0x130] sm:$0xff] %v2877_v53  ;;  %v2878_v22 = vadd.f32 %v2729_v51, %v1980_v9  ;;  %v1993_v53 = vld [vmem:[#allocation2 + $0x80] sm:$0xff] }
 0x2ad   : > { %2942 = vst [vmem:[#allocation2 + $0x48] sm:$0xff] %v2878_v22 }
 0x2ae   : > { %v2539_v55 = vpop.f32.mrf.mxu0 }
 0x2af   : > { %v2732_v54 = vpop.f32.mrf.mxu1 }
 0x2b0   : > { %v2733_v23 = vadd.f32 %v2732_v54, %v2539_v55  ;;  %v2541_v57 = vpop.f32.mrf.mxu0 }
 0x2b1   : > { %v2734_v6 = vpop.f32.mrf.mxu1 }
 0x2b2   : > { %v2879_v45 = vadd.f32 %v2733_v23, %v1981_v37  ;;  %v2735_v59 = vadd.f32 %v2734_v6, %v2541_v57  ;;  %v2543_v11 = vpop.f32.mrf.mxu0  ;;  %v1994_v37 = vld [vmem:[#allocation2 + $0x1a8] sm:$0xff]  ;;  %v1995_v6 = vld [vmem:[#allocation2 + $0x1b8] sm:$0xff] }
 0x2b3   : > { %v2736_v3 = vpop.f32.mrf.mxu1 }
 0x2b4   : > { %2943 = vst [vmem:[#allocation2 + $0x180] sm:$0xff] %v2879_v45  ;;  %v2880_v29 = vadd.f32 %v2735_v59, %v1982_v42  ;;  %v2737_v21 = vadd.f32 %v2736_v3, %v2543_v11  ;;  %v2545_v13 = vpop.f32.mrf.mxu0  ;;  %v1996_v3 = vld [vmem:[#allocation2 + $0x28] sm:$0xff] }
 0x2b5   : > { %v2738_v39 = vpop.f32.mrf.mxu1 }
 0x2b6   : > { %2944 = vst [vmem:[#allocation2 + $0x110] sm:$0xff] %v2880_v29  ;;  %v2881_v16 = vadd.f32 %v2737_v21, %v1983_v18  ;;  %v2739_v60 = vadd.f32 %v2738_v39, %v2545_v13 }
 0x2b8   : > { %2945 = vst [vmem:[#allocation2 + $0x118] sm:$0xff] %v2881_v16  ;;  %v2882_v28 = vadd.f32 %v2739_v60, %v1984_v19  ;;  %v1997_v16 = vld [vmem:[#allocation2 + $0x1e8] sm:$0xff] }
 0x2ba   : > { %2946 = vst [vmem:[#allocation2 + $0x98] sm:$0xff] %v2882_v28  ;;  %v2549_v58 = vpop.f32.mrf.mxu0 }
 0x2bc   : > { %v2551_v34 = vpop.f32.mrf.mxu0 }
 0x2bd   : > { %v2742_v26 = vpop.f32.mrf.mxu1 }
 0x2be   : > { %v2743_v50 = vadd.f32 %v2742_v26, %v2549_v58  ;;  %v2553_v10 = vpop.f32.mrf.mxu0 }
 0x2bf   : > { %v2744_v15 = vpop.f32.mrf.mxu1 }
 0x2c0   : > { %v2883_v14 = vadd.f32 %v2743_v50, %v1985_v2  ;;  %v2745_v36 = vadd.f32 %v2744_v15, %v2551_v34  ;;  %v2555_v1 = vpop.f32.mrf.mxu0  ;;  %v1998_v34 = vld [vmem:[#allocation2 + $0xf8] sm:$0xff] }
 0x2c1   : > { %v2746_v52 = vpop.f32.mrf.mxu1 }
 0x2c2   : > { %2947 = vst [vmem:[#allocation2 + $0x120] sm:$0xff] %v2883_v14  ;;  %v2884_v8 = vadd.f32 %v2745_v36, %v1986_v35  ;;  %v2747_v20 = vadd.f32 %v2746_v52, %v2553_v10  ;;  %v1999_v35 = vld [vmem:[#allocation2 + $0x160] sm:$0xff]  ;;  %v2000_v52 = vld [vmem:[#allocation2 + $0x30] sm:$0xff] }
 0x2c3   : > { %v2748_v41 = vpop.f32.mrf.mxu1 }
 0x2c4   : > { %2948 = vst [vmem:[#allocation2 + $0x150] sm:$0xff] %v2884_v8  ;;  %v2885_v31 = vadd.f32 %v2747_v20, %v1987_v4  ;;  %v2749_v24 = vadd.f32 %v2748_v41, %v2555_v1 }
 0x2c6   : > { %2949 = vst [vmem:[#allocation2 + $0x108] sm:$0xff] %v2885_v31  ;;  %v2886_v38 = vadd.f32 %v2749_v24, %v1988_v32  ;;  %v2001_v31 = vld [vmem:[#allocation2 + $0x1e0] sm:$0xff] }
 0x2c8   : > { %2950 = vst [vmem:[#allocation2 + $0x60] sm:$0xff] %v2886_v38  ;;  %v2559_v40 = vpop.f32.mrf.mxu0  ;;  %v2752_v30 = vpop.f32.mrf.mxu1 }
 0x2c9   : > { %v2753_v25 = vadd.f32 %v2752_v30, %v2559_v40 }
 0x2ca   : > { %v2561_v7 = vpop.f32.mrf.mxu0  ;;  %v2754_v0 = vpop.f32.mrf.mxu1 }
 0x2cb   : > { %v2887_v17 = vadd.f32 %v2753_v25, %v1989_v27  ;;  %v2755_v63 = vadd.f32 %v2754_v0, %v2561_v7  ;;  %v2002_v27 = vld [vmem:[#allocation2] sm:$0xff]  ;;  %v2003_v0 = vld [vmem:[#allocation2 + $0xf0] sm:$0xff] }
 0x2cc   : > { %v2563_v33 = vpop.f32.mrf.mxu0  ;;  %v2756_v49 = vpop.f32.mrf.mxu1 }
 0x2cd   : > { %2951 = vst [vmem:[#allocation2 + $0xe0] sm:$0xff] %v2887_v17  ;;  %v2888_v46 = vadd.f32 %v2755_v63, %v1990_v12  ;;  %v2757_v44 = vadd.f32 %v2756_v49, %v2563_v33  ;;  %v2004_v49 = vld [vmem:[#allocation2 + $0x8] sm:$0xff] }
 0x2ce   : > { %v2565_v47 = vpop.f32.mrf.mxu0  ;;  %v2758_v56 = vpop.f32.mrf.mxu1 }
 0x2cf   : > { %2952 = vst [vmem:[#allocation2 + $0x188] sm:$0xff] %v2888_v46  ;;  %v2889_v62 = vadd.f32 %v2757_v44, %v1991_v43  ;;  %v2759_v61 = vadd.f32 %v2758_v56, %v2565_v47 }
 0x2d1   : > { %2953 = vst [vmem:[#allocation2 + $0x138] sm:$0xff] %v2889_v62  ;;  %v2890_v9 = vadd.f32 %v2759_v61, %v1992_v5  ;;  %v2005_v62 = vld [vmem:[#allocation2 + $0x148] sm:$0xff] }
 0x2d3   : > { %2954 = vst [vmem:[#allocation2 + $0x140] sm:$0xff] %v2890_v9 }
 0x2d5   : > { %v2569_v48 = vpop.f32.mrf.mxu0 }
 0x2d6   : > { %v2762_v51 = vpop.f32.mrf.mxu1 }
 0x2d7   : > { %v2763_v22 = vadd.f32 %v2762_v51, %v2569_v48  ;;  %v2571_v55 = vpop.f32.mrf.mxu0 }
 0x2d8   : > { %v2764_v54 = vpop.f32.mrf.mxu1 }
 0x2d9   : > { %v2891_v23 = vadd.f32 %v2763_v22, %v1993_v53  ;;  %v2765_v57 = vadd.f32 %v2764_v54, %v2571_v55  ;;  %v2573_v42 = vpop.f32.mrf.mxu0  ;;  %v2006_v53 = vld [vmem:[#allocation2 + $0x1d0] sm:$0xff]  ;;  %v2007_v54 = vld [vmem:[#allocation2 + $0x100] sm:$0xff] }
 0x2da   : > { %v2766_v45 = vpop.f32.mrf.mxu1 }
 0x2db   : > { %2955 = vst [vmem:[#allocation2 + $0x80] sm:$0xff] %v2891_v23  ;;  %v2892_v59 = vadd.f32 %v2765_v57, %v1994_v37  ;;  %v2767_v11 = vadd.f32 %v2766_v45, %v2573_v42  ;;  %v2575_v18 = vpop.f32.mrf.mxu0  ;;  %v2008_v45 = vld [vmem:[#allocation2 + $0xc8] sm:$0xff] }
 0x2dc   : > { %v2768_v29 = vpop.f32.mrf.mxu1 }
 0x2dd   : > { %2956 = vst [vmem:[#allocation2 + $0x1a8] sm:$0xff] %v2892_v59  ;;  %v2893_v21 = vadd.f32 %v2767_v11, %v1995_v6  ;;  %v2769_v13 = vadd.f32 %v2768_v29, %v2575_v18 }
 0x2df   : > { %2957 = vst [vmem:[#allocation2 + $0x1b8] sm:$0xff] %v2893_v21  ;;  %v2894_v19 = vadd.f32 %v2769_v13, %v1996_v3  ;;  %v2009_v21 = vld [vmem:[#allocation2 + $0x40] sm:$0xff] }
 0x2e1   : > { %2958 = vst [vmem:[#allocation2 + $0x28] sm:$0xff] %v2894_v19 }
 0x2e2   : > { %v2579_v39 = vpop.f32.mrf.mxu0  ;;  %v2772_v60 = vpop.f32.mrf.mxu1 }
 0x2e3   : > { %v2773_v28 = vadd.f32 %v2772_v60, %v2579_v39 }
 0x2e4   : > { %v2581_v58 = vpop.f32.mrf.mxu0  ;;  %v2774_v2 = vpop.f32.mrf.mxu1 }
 0x2e5   : > { %v2895_v26 = vadd.f32 %v2773_v28, %v1997_v16  ;;  %v2775_v50 = vadd.f32 %v2774_v2, %v2581_v58  ;;  %v2010_v16 = vld [vmem:[#allocation2 + $0x1f8] sm:$0xff]  ;;  %v2011_v2 = vld [vmem:[#allocation2 + $0x20] sm:$0xff] }
 0x2e6   : > { %v2583_v10 = vpop.f32.mrf.mxu0  ;;  %v2776_v15 = vpop.f32.mrf.mxu1 }
 0x2e7   : > { %2959 = vst [vmem:[#allocation2 + $0x1e8] sm:$0xff] %v2895_v26  ;;  %v2896_v14 = vadd.f32 %v2775_v50, %v1998_v34  ;;  %v2777_v36 = vadd.f32 %v2776_v15, %v2583_v10  ;;  %v2012_v15 = vld [vmem:[#allocation2 + $0x128] sm:$0xff] }
 0x2e8   : > { %v2585_v4 = vpop.f32.mrf.mxu0  ;;  %v2778_v1 = vpop.f32.mrf.mxu1 }
 0x2e9   : > { %2960 = vst [vmem:[#allocation2 + $0xf8] sm:$0xff] %v2896_v14  ;;  %v2897_v8 = vadd.f32 %v2777_v36, %v1999_v35  ;;  %v2779_v20 = vadd.f32 %v2778_v1, %v2585_v4 }
 0x2eb   : > { %2961 = vst [vmem:[#allocation2 + $0x160] sm:$0xff] %v2897_v8  ;;  %v2898_v32 = vadd.f32 %v2779_v20, %v2000_v52  ;;  %v2013_v8 = vld [vmem:[#allocation2 + $0x1a0] sm:$0xff] }
 0x2ed   : > { %2962 = vst [vmem:[#allocation2 + $0x30] sm:$0xff] %v2898_v32 }
 0x2ef   : > { %v2589_v41 = vpop.f32.mrf.mxu0  ;;  %v2782_v24 = vpop.f32.mrf.mxu1 }
 0x2f0   : > { %v2783_v38 = vadd.f32 %v2782_v24, %v2589_v41 }
 0x2f1   : > { %v2591_v40 = vpop.f32.mrf.mxu0  ;;  %v2784_v30 = vpop.f32.mrf.mxu1 }
 0x2f2   : > { %v2899_v25 = vadd.f32 %v2783_v38, %v2001_v31  ;;  %v2785_v7 = vadd.f32 %v2784_v30, %v2591_v40  ;;  %v2014_v31 = vld [vmem:[#allocation2 + $0x1f0] sm:$0xff]  ;;  %v2015_v30 = vld [vmem:[#allocation2 + $0xe8] sm:$0xff] }
 0x2f3   : > { %v2593_v12 = vpop.f32.mrf.mxu0  ;;  %v2786_v17 = vpop.f32.mrf.mxu1 }
 0x2f4   : > { %2963 = vst [vmem:[#allocation2 + $0x1e0] sm:$0xff] %v2899_v25  ;;  %v2900_v63 = vadd.f32 %v2785_v7, %v2002_v27  ;;  %v2787_v33 = vadd.f32 %v2786_v17, %v2593_v12  ;;  %v2016_v17 = vld [vmem:[#allocation2 + $0x78] sm:$0xff] }
 0x2f5   : > { %v2595_v43 = vpop.f32.mrf.mxu0  ;;  %v2788_v46 = vpop.f32.mrf.mxu1 }
 0x2f6   : > { %2964 = vst [vmem:[#allocation2] sm:$0xff] %v2900_v63  ;;  %v2901_v44 = vadd.f32 %v2787_v33, %v2003_v0  ;;  %v2789_v47 = vadd.f32 %v2788_v46, %v2595_v43 }
 0x2f8   : > { %2965 = vst [vmem:[#allocation2 + $0xf0] sm:$0xff] %v2901_v44  ;;  %v2902_v5 = vadd.f32 %v2789_v47, %v2004_v49  ;;  %v2017_v44 = vld [vmem:[#allocation2 + $0x70] sm:$0xff] }
 0x2fa   : > { %2966 = vst [vmem:[#allocation2 + $0x8] sm:$0xff] %v2902_v5 }
 0x2fc   : > { %v2599_v56 = vpop.f32.mrf.mxu0  ;;  %v2792_v61 = vpop.f32.mrf.mxu1 }
 0x2fd   : > { %v2793_v9 = vadd.f32 %v2792_v61, %v2599_v56 }
 0x2fe   : > { %v2601_v48 = vpop.f32.mrf.mxu0  ;;  %v2794_v51 = vpop.f32.mrf.mxu1 }
 0x2ff   : > { %v2903_v22 = vadd.f32 %v2793_v9, %v2005_v62  ;;  %v2795_v55 = vadd.f32 %v2794_v51, %v2601_v48  ;;  %v2018_v62 = vld [vmem:[#allocation2 + $0x90] sm:$0xff]  ;;  %v2019_v51 = vld [vmem:[#allocation2 + $0x1d8] sm:$0xff] }
 0x300   : > { %v2603_v37 = vpop.f32.mrf.mxu0  ;;  %v2796_v23 = vpop.f32.mrf.mxu1 }
 0x301   : > { %2967 = vst [vmem:[#allocation2 + $0x148] sm:$0xff] %v2903_v22  ;;  %v2904_v57 = vadd.f32 %v2795_v55, %v2006_v53  ;;  %v2797_v42 = vadd.f32 %v2796_v23, %v2603_v37  ;;  %v2020_v23 = vld [vmem:[#allocation2 + $0xd0] sm:$0xff] }
 0x302   : > { %v2605_v6 = vpop.f32.mrf.mxu0  ;;  %v2798_v59 = vpop.f32.mrf.mxu1 }
 0x303   : > { %2968 = vst [vmem:[#allocation2 + $0x1d0] sm:$0xff] %v2904_v57  ;;  %v2905_v11 = vadd.f32 %v2797_v42, %v2007_v54  ;;  %v2799_v18 = vadd.f32 %v2798_v59, %v2605_v6 }
 0x305   : > { %2969 = vst [vmem:[#allocation2 + $0x100] sm:$0xff] %v2905_v11  ;;  %v2906_v3 = vadd.f32 %v2799_v18, %v2008_v45  ;;  %v2021_v11 = vld [vmem:[#allocation2 + $0xb8] sm:$0xff] }
 0x307   : > { %2970 = vst [vmem:[#allocation2 + $0xc8] sm:$0xff] %v2906_v3 }
 0x308   : > { %v2609_v29 = vpop.f32.mrf.mxu0 }
 0x309   : > { %v2802_v13 = vpop.f32.mrf.mxu1 }
 0x30a   : > { %v2803_v19 = vadd.f32 %v2802_v13, %v2609_v29  ;;  %v2611_v39 = vpop.f32.mrf.mxu0 }
 0x30b   : > { %v2804_v60 = vpop.f32.mrf.mxu1 }
 0x30c   : > { %v2907_v28 = vadd.f32 %v2803_v19, %v2009_v21  ;;  %v2805_v58 = vadd.f32 %v2804_v60, %v2611_v39  ;;  %v2613_v34 = vpop.f32.mrf.mxu0  ;;  %v2022_v21 = vld [vmem:[#allocation2 + $0x88] sm:$0xff] }
 0x30d   : > { %v2806_v26 = vpop.f32.mrf.mxu1  ;;  %v2023_v60 = vld [vmem:[#allocation2 + $0xa8] sm:$0xff] }
 0x30e   : > { %2971 = vst [vmem:[#allocation2 + $0x40] sm:$0xff] %v2907_v28  ;;  %v2908_v50 = vadd.f32 %v2805_v58, %v2010_v16  ;;  %v2807_v10 = vadd.f32 %v2806_v26, %v2613_v34  ;;  %v2615_v35 = vpop.f32.mrf.mxu0  ;;  %v2024_v26 = vld [vmem:[#allocation2 + $0x1c8] sm:$0xff] }
 0x30f   : > { %v2808_v14 = vpop.f32.mrf.mxu1 }
 0x310   : > { %2972 = vst [vmem:[#allocation2 + $0x1f8] sm:$0xff] %v2908_v50  ;;  %v2909_v36 = vadd.f32 %v2807_v10, %v2011_v2  ;;  %v2809_v4 = vadd.f32 %v2808_v14, %v2615_v35  ;;  %v2025_v14 = vld [vmem:[#allocation2 + $0x170] sm:$0xff] }
 0x312   : > { %2973 = vst [vmem:[#allocation2 + $0x20] sm:$0xff] %v2909_v36  ;;  %v2910_v52 = vadd.f32 %v2809_v4, %v2012_v15 }
 0x314   : > { %2974 = vst [vmem:[#allocation2 + $0x128] sm:$0xff] %v2910_v52 }
 0x316   : > { %v2619_v1 = vpop.f32.mrf.mxu0 }
 0x318   : > { %v2812_v20 = vpop.f32.mrf.mxu1  ;;  %v2621_v32 = vpop.f32.mrf.mxu0 }
 0x319   : > { %v2813_v41 = vadd.f32 %v2812_v20, %v2619_v1 }
 0x31a   : > { %v2814_v24 = vpop.f32.mrf.mxu1  ;;  %v2623_v38 = vpop.f32.mrf.mxu0 }
 0x31b   : > { %v2911_v40 = vadd.f32 %v2813_v41, %v2013_v8  ;;  %v2815_v27 = vadd.f32 %v2814_v24, %v2621_v32  ;;  %v2026_v8 = vld [vmem:[#allocation2 + $0x178] sm:$0xff]  ;;  %v2027_v24 = vld [vmem:[#allocation2 + $0x68] sm:$0xff] }
 0x31c   : > { %v2816_v25 = vpop.f32.mrf.mxu1  ;;  %v2625_v7 = vpop.f32.mrf.mxu0 }
 0x31d   : > { %2975 = vst [vmem:[#allocation2 + $0x1a0] sm:$0xff] %v2911_v40  ;;  %v2912_v12 = vadd.f32 %v2815_v27, %v2014_v31  ;;  %v2817_v0 = vadd.f32 %v2816_v25, %v2623_v38  ;;  %v2028_v25 = vld [vmem:[#allocation2 + $0x190] sm:$0xff] }
 0x31e   : > { %v2818_v63 = vpop.f32.mrf.mxu1 }
 0x31f   : > { %2976 = vst [vmem:[#allocation2 + $0x1f0] sm:$0xff] %v2912_v12  ;;  %v2913_v33 = vadd.f32 %v2817_v0, %v2015_v30  ;;  %v2819_v43 = vadd.f32 %v2818_v63, %v2625_v7  ;;  %v2029_v63 = vld [vmem:[#allocation2 + $0x198] sm:$0xff] }
 0x321   : > { %2977 = vst [vmem:[#allocation2 + $0xe8] sm:$0xff] %v2913_v33  ;;  %v2914_v49 = vadd.f32 %v2819_v43, %v2016_v17 }
 0x323   : > { %2978 = vst [vmem:[#allocation2 + $0x78] sm:$0xff] %v2914_v49 }
 0x325   : > { %v2629_v46 = vpop.f32.mrf.mxu0 }
 0x326   : > { %v2822_v47 = vpop.f32.mrf.mxu1 }
 0x327   : > { %v2823_v5 = vadd.f32 %v2822_v47, %v2629_v46  ;;  %v2631_v56 = vpop.f32.mrf.mxu0 }
 0x328   : > { %v2824_v61 = vpop.f32.mrf.mxu1 }
 0x329   : > { %v2915_v9 = vadd.f32 %v2823_v5, %v2017_v44  ;;  %v2825_v48 = vadd.f32 %v2824_v61, %v2631_v56  ;;  %v2633_v53 = vpop.f32.mrf.mxu0  ;;  %v2030_v44 = vld [vmem:[#allocation2 + $0x38] sm:$0xff]  ;;  %v2031_v61 = vld [vmem:[#allocation2 + $0xc0] sm:$0xff] }
 0x32a   : > { %v2826_v22 = vpop.f32.mrf.mxu1 }
 0x32b   : > { %2979 = vst [vmem:[#allocation2 + $0x70] sm:$0xff] %v2915_v9  ;;  %v2916_v55 = vadd.f32 %v2825_v48, %v2018_v62  ;;  %v2827_v37 = vadd.f32 %v2826_v22, %v2633_v53  ;;  %v2635_v54 = vpop.f32.mrf.mxu0  ;;  %v2032_v22 = vld [vmem:[#allocation2 + $0x1c0] sm:$0xff] }
 0x32c   : > { %v2828_v57 = vpop.f32.mrf.mxu1 }
 0x32d   : > { %2980 = vst [vmem:[#allocation2 + $0x90] sm:$0xff] %v2916_v55  ;;  %v2917_v42 = vadd.f32 %v2827_v37, %v2019_v51  ;;  %v2829_v6 = vadd.f32 %v2828_v57, %v2635_v54  ;;  %v2033_v57 = vld [vmem:[#allocation2 + $0x158] sm:$0xff] }
 0x32f   : > { %2981 = vst [vmem:[#allocation2 + $0x1d8] sm:$0xff] %v2917_v42  ;;  %v2918_v45 = vadd.f32 %v2829_v6, %v2020_v23 }
 0x330   : > { %v2639_v59 = vpop.f32.mrf.mxu0  ;;  %v2832_v18 = vpop.f32.mrf.mxu1 }
 0x331   : > { %2982 = vst [vmem:[#allocation2 + $0xd0] sm:$0xff] %v2918_v45  ;;  %v2833_v3 = vadd.f32 %v2832_v18, %v2639_v59 }
 0x332   : > { %v2641_v29 = vpop.f32.mrf.mxu0  ;;  %v2834_v13 = vpop.f32.mrf.mxu1 }
 0x333   : > { %v2919_v19 = vadd.f32 %v2833_v3, %v2021_v11  ;;  %v2835_v39 = vadd.f32 %v2834_v13, %v2641_v29  ;;  %v2034_v11 = vld [vmem:[#allocation2 + $0x10] sm:$0xff]  ;;  %v2035_v13 = vld [vmem:[#allocation2 + $0x58] sm:$0xff] }
 0x334   : > { %v2643_v16 = vpop.f32.mrf.mxu0  ;;  %v2836_v28 = vpop.f32.mrf.mxu1 }
 0x335   : > { %2983 = vst [vmem:[#allocation2 + $0xb8] sm:$0xff] %v2919_v19  ;;  %v2920_v58 = vadd.f32 %v2835_v39, %v2022_v21  ;;  %v2837_v34 = vadd.f32 %v2836_v28, %v2643_v16  ;;  %v2036_v28 = vld [vmem:[#allocation2 + $0xa0] sm:$0xff] }
 0x336   : > { %v2645_v2 = vpop.f32.mrf.mxu0  ;;  %v2838_v50 = vpop.f32.mrf.mxu1 }
 0x337   : > { %2984 = vst [vmem:[#allocation2 + $0x88] sm:$0xff] %v2920_v58  ;;  %v2921_v10 = vadd.f32 %v2837_v34, %v2023_v60  ;;  %v2839_v35 = vadd.f32 %v2838_v50, %v2645_v2 }
 0x338   : > { %v2649_v15 = vpop.f32.mrf.mxu0  ;;  %v2842_v36 = vpop.f32.mrf.mxu1 }
 0x339   : > { %2985 = vst [vmem:[#allocation2 + $0xa8] sm:$0xff] %v2921_v10  ;;  %v2922_v4 = vadd.f32 %v2839_v35, %v2024_v26  ;;  %v2843_v52 = vadd.f32 %v2842_v36, %v2649_v15 }
 0x33a   : > { %v2651_v1 = vpop.f32.mrf.mxu0  ;;  %v2844_v20 = vpop.f32.mrf.mxu1 }
 0x33b   : > { %2986 = vst [vmem:[#allocation2 + $0x1c8] sm:$0xff] %v2922_v4  ;;  %v2923_v32 = vadd.f32 %v2843_v52, %v2025_v14  ;;  %v2845_v41 = vadd.f32 %v2844_v20, %v2651_v1 }
 0x33c   : > { %v2653_v31 = vpop.f32.mrf.mxu0  ;;  %v2846_v38 = vpop.f32.mrf.mxu1 }
 0x33d   : > { %2987 = vst [vmem:[#allocation2 + $0x170] sm:$0xff] %v2923_v32  ;;  %v2924_v40 = vadd.f32 %v2845_v41, %v2026_v8  ;;  %v2847_v27 = vadd.f32 %v2846_v38, %v2653_v31 }
 0x33e   : > { %v2655_v30 = vpop.f32.mrf.mxu0  ;;  %v2848_v7 = vpop.f32.mrf.mxu1 }
 0x33f   : > { %2988 = vst [vmem:[#allocation2 + $0x178] sm:$0xff] %v2924_v40  ;;  %v2925_v12 = vadd.f32 %v2847_v27, %v2027_v24  ;;  %v2849_v0 = vadd.f32 %v2848_v7, %v2655_v30 }
 0x340   : > { %v2659_v17 = vpop.f32.mrf.mxu0  ;;  %v2852_v33 = vpop.f32.mrf.mxu1 }
 0x341   : > { %2989 = vst [vmem:[#allocation2 + $0x68] sm:$0xff] %v2925_v12  ;;  %v2926_v43 = vadd.f32 %v2849_v0, %v2028_v25  ;;  %v2853_v49 = vadd.f32 %v2852_v33, %v2659_v17 }
 0x342   : > { %v2661_v46 = vpop.f32.mrf.mxu0  ;;  %v2854_v47 = vpop.f32.mrf.mxu1 }
 0x343   : > { %2990 = vst [vmem:[#allocation2 + $0x190] sm:$0xff] %v2926_v43  ;;  %v2927_v5 = vadd.f32 %v2853_v49, %v2029_v63  ;;  %v2855_v56 = vadd.f32 %v2854_v47, %v2661_v46 }
 0x344   : > { %v2663_v62 = vpop.f32.mrf.mxu0  ;;  %v2856_v9 = vpop.f32.mrf.mxu1 }
 0x345   : > { %2991 = vst [vmem:[#allocation2 + $0x198] sm:$0xff] %v2927_v5  ;;  %v2928_v48 = vadd.f32 %v2855_v56, %v2030_v44  ;;  %v2857_v53 = vadd.f32 %v2856_v9, %v2663_v62 }
 0x346   : > { %v2665_v51 = vpop.f32.mrf.mxu0  ;;  %v2858_v55 = vpop.f32.mrf.mxu1 }
 0x347   : > { %2992 = vst [vmem:[#allocation2 + $0x38] sm:$0xff] %v2928_v48  ;;  %v2929_v37 = vadd.f32 %v2857_v53, %v2031_v61  ;;  %v2859_v54 = vadd.f32 %v2858_v55, %v2665_v51 }
 0x348   : > { %v2669_v23 = vpop.f32.mrf.mxu0  ;;  %v2862_v42 = vpop.f32.mrf.mxu1 }
 0x349   : > { %2993 = vst [vmem:[#allocation2 + $0xc0] sm:$0xff] %v2929_v37  ;;  %v2930_v6 = vadd.f32 %v2859_v54, %v2032_v22  ;;  %v2863_v45 = vadd.f32 %v2862_v42, %v2669_v23 }
 0x34a   : > { %v2671_v59 = vpop.f32.mrf.mxu0  ;;  %v2864_v18 = vpop.f32.mrf.mxu1 }
 0x34b   : > { %2994 = vst [vmem:[#allocation2 + $0x1c0] sm:$0xff] %v2930_v6  ;;  %v2931_v3 = vadd.f32 %v2863_v45, %v2033_v57  ;;  %v2865_v29 = vadd.f32 %v2864_v18, %v2671_v59 }
 0x34c   : > { %v2673_v21 = vpop.f32.mrf.mxu0  ;;  %v2866_v19 = vpop.f32.mrf.mxu1 }
 0x34d   : > { %2995 = vst [vmem:[#allocation2 + $0x158] sm:$0xff] %v2931_v3  ;;  %v2932_v39 = vadd.f32 %v2865_v29, %v2034_v11  ;;  %v2867_v16 = vadd.f32 %v2866_v19, %v2673_v21 }
 0x34e   : > { %v2675_v60 = vpop.f32.mrf.mxu0  ;;  %v2868_v58 = vpop.f32.mrf.mxu1 }
 0x34f   : > { %2996 = vst [vmem:[#allocation2 + $0x10] sm:$0xff] %v2932_v39  ;;  %v2933_v34 = vadd.f32 %v2867_v16, %v2035_v13  ;;  %v2869_v2 = vadd.f32 %v2868_v58, %v2675_v60  ;;  %3002 = sbr.rel (%p3525_p8) target bundleno = 891 (0x37b), region = 64 }
 0x351   : > { %2997 = vst [vmem:[#allocation2 + $0x58] sm:$0xff] %v2933_v34  ;;  %v2934_v26 = vadd.f32 %v2869_v2, %v2036_v28 }
 0x353   : > { %2998 = vst [vmem:[#allocation2 + $0xa0] sm:$0xff] %v2934_v26 }
 0x354   : > { %v3003_v50 = vld [vmem:[#allocation2 + $0xb0] sm:$0xff]  ;;  %v3067_v10 = vld [vmem:[%s6353_s7] sm:$0x3]  ;;  %v6354_v15 = vld [vmem:[#allocation27_spill] sm:$0xff] }
 0x355   : > { %v3004_v35 = vld [vmem:[#allocation2 + $0x1b0] sm:$0xff]  ;;  %v6355_v14 = vsub.s32 0, %v6354_v15  ;;  %v6356_v4 = vsub.s32 1, %v6354_v15  ;;  %v3005_v1 = vld [vmem:[#allocation2 + $0xd8] sm:$0xff]  ;;  %v3008_v32 = vld [vmem:[#allocation2 + $0x168] sm:$0xff] }
 0x356   : > { %v3006_v8 = vld [vmem:[#allocation2 + $0x18] sm:$0xff]  ;;  %v3007_v20 = vld [vmem:[#allocation2 + $0x50] sm:$0xff]  ;;  %v3010_v31 = vld [vmem:[#allocation2 + $0x48] sm:$0xff] }
 0x357   : > { %v6071_v36 = vrot.slane %v3067_v10, %v6355_v14  ;;  %v6075_v52 = vrot.slane %v3067_v10, %v6356_v4  ;;  %v3009_v41 = vld [vmem:[#allocation2 + $0x130] sm:$0xff]  ;;  %v3011_v30 = vld [vmem:[#allocation2 + $0x180] sm:$0xff]  ;;  %v3013_v7 = vld [vmem:[#allocation2 + $0x118] sm:$0xff] }
 0x358   : > { %v3012_v25 = vld [vmem:[#allocation2 + $0x110] sm:$0xff]  ;;  %v3014_v33 = vld [vmem:[#allocation2 + $0x98] sm:$0xff]  ;;  %v3015_v43 = vld [vmem:[#allocation2 + $0x120] sm:$0xff] }
 0x359   : > { %v3079_v24 = vadd.f32 %v6071_v36, %v3003_v50  ;;  %v3080_v38 = vadd.f32 %v6075_v52, %v3004_v35  ;;  %v3081_v40 = vadd.f32 %v6071_v36, %v3005_v1  ;;  %v3082_v27 = vadd.f32 %v6075_v52, %v3006_v8  ;;  %v3016_v49 = vld [vmem:[#allocation2 + $0x150] sm:$0xff]  ;;  %v3017_v56 = vld [vmem:[#allocation2 + $0x108] sm:$0xff]  ;;  %v3018_v62 = vld [vmem:[#allocation2 + $0x60] sm:$0xff] }
 0x35a   : > { %v3083_v12 = vadd.f32 %v6071_v36, %v3007_v20  ;;  %v3084_v0 = vadd.f32 %v6075_v52, %v3008_v32  ;;  %v3085_v17 = vadd.f32 %v6071_v36, %v3009_v41  ;;  %v3086_v63 = vadd.f32 %v6075_v52, %v3010_v31  ;;  %v3019_v61 = vld [vmem:[#allocation2 + $0xe0] sm:$0xff]  ;;  %v3020_v22 = vld [vmem:[#allocation2 + $0x188] sm:$0xff]  ;;  %v3021_v55 = vld [vmem:[#allocation2 + $0x138] sm:$0xff] }
 0x35b   : > { %3143 = vst [vmem:[%s4638_s17] sm:$0xff] %v3079_v24  ;;  %3144 = vst [vmem:[%s4638_s17 + $0x8] sm:$0xff] %v3080_v38  ;;  %v3087_v46 = vadd.f32 %v6071_v36, %v3011_v30  ;;  %v3088_v44 = vadd.f32 %v6075_v52, %v3012_v25  ;;  %v3089_v47 = vadd.f32 %v6071_v36, %v3013_v7  ;;  %v3022_v37 = vld [vmem:[#allocation2 + $0x140] sm:$0xff]  ;;  %v3024_v45 = vld [vmem:[#allocation2 + $0x1a8] sm:$0xff] }
 0x35c   : > { %3145 = vst [vmem:[%s4638_s17 + $0x10] sm:$0xff] %v3081_v40  ;;  %3146 = vst [vmem:[%s4638_s17 + $0x18] sm:$0xff] %v3082_v27  ;;  %v3090_v5 = vadd.f32 %v6075_v52, %v3014_v33  ;;  %v3091_v9 = vadd.f32 %v6071_v36, %v3015_v43  ;;  %v3092_v48 = vadd.f32 %v6075_v52, %v3016_v49  ;;  %v3023_v6 = vld [vmem:[#allocation2 + $0x80] sm:$0xff]  ;;  %v3025_v59 = vld [vmem:[#allocation2 + $0x1b8] sm:$0xff] }
 0x35d   : > { %3147 = vst [vmem:[%s4638_s17 + $0x20] sm:$0xff] %v3083_v12  ;;  %3148 = vst [vmem:[%s4638_s17 + $0x28] sm:$0xff] %v3084_v0  ;;  %v3093_v53 = vadd.f32 %v6071_v36, %v3017_v56  ;;  %v3094_v51 = vadd.f32 %v6075_v52, %v3018_v62  ;;  %v3095_v54 = vadd.f32 %v6071_v36, %v3019_v61  ;;  %v3026_v29 = vld [vmem:[#allocation2 + $0x28] sm:$0xff]  ;;  %v3028_v13 = vld [vmem:[#allocation2 + $0xf8] sm:$0xff] }
 0x35e   : > { %3149 = vst [vmem:[%s4638_s17 + $0x30] sm:$0xff] %v3085_v17  ;;  %3150 = vst [vmem:[%s4638_s17 + $0x38] sm:$0xff] %v3086_v63  ;;  %v3096_v23 = vadd.f32 %v6075_v52, %v3020_v22  ;;  %v3097_v57 = vadd.f32 %v6071_v36, %v3021_v55  ;;  %v3098_v42 = vadd.f32 %v6075_v52, %v3022_v37  ;;  %v3027_v21 = vld [vmem:[#allocation2 + $0x1e8] sm:$0xff]  ;;  %v3029_v60 = vld [vmem:[#allocation2 + $0x160] sm:$0xff] }
 0x35f   : > { %3151 = vst [vmem:[%s4638_s17 + $0x40] sm:$0xff] %v3087_v46  ;;  %3152 = vst [vmem:[%s4638_s17 + $0x48] sm:$0xff] %v3088_v44  ;;  %v3099_v11 = vadd.f32 %v6071_v36, %v3023_v6  ;;  %v3100_v18 = vadd.f32 %v6075_v52, %v3024_v45  ;;  %v3101_v3 = vadd.f32 %v6071_v36, %v3025_v59  ;;  %v3030_v28 = vld [vmem:[#allocation2 + $0x30] sm:$0xff]  ;;  %v3031_v58 = vld [vmem:[#allocation2 + $0x1e0] sm:$0xff] }
 0x360   : > { %3153 = vst [vmem:[%s4638_s17 + $0x50] sm:$0xff] %v3089_v47  ;;  %3154 = vst [vmem:[%s4638_s17 + $0x58] sm:$0xff] %v3090_v5  ;;  %v3102_v19 = vadd.f32 %v6075_v52, %v3026_v29  ;;  %v3103_v39 = vadd.f32 %v6071_v36, %v3027_v21  ;;  %v3104_v16 = vadd.f32 %v6075_v52, %v3028_v13  ;;  %v3032_v50 = vld [vmem:[#allocation2] sm:$0xff]  ;;  %v3033_v10 = vld [vmem:[#allocation2 + $0xf0] sm:$0xff] }
 0x361   : > { %3155 = vst [vmem:[%s4638_s17 + $0x60] sm:$0xff] %v3091_v9  ;;  %3156 = vst [vmem:[%s4638_s17 + $0x68] sm:$0xff] %v3092_v48  ;;  %v3105_v34 = vadd.f32 %v6071_v36, %v3029_v60  ;;  %v3106_v2 = vadd.f32 %v6075_v52, %v3030_v28  ;;  %v3107_v26 = vadd.f32 %v6071_v36, %v3031_v58  ;;  %v3034_v35 = vld [vmem:[#allocation2 + $0x8] sm:$0xff]  ;;  %v3036_v8 = vld [vmem:[#allocation2 + $0x1d0] sm:$0xff] }
 0x362   : > { %3157 = vst [vmem:[%s4638_s17 + $0x70] sm:$0xff] %v3093_v53  ;;  %3158 = vst [vmem:[%s4638_s17 + $0x78] sm:$0xff] %v3094_v51  ;;  %v3108_v15 = vadd.f32 %v6075_v52, %v3032_v50  ;;  %v3109_v14 = vadd.f32 %v6071_v36, %v3033_v10  ;;  %v3110_v4 = vadd.f32 %v6075_v52, %v3034_v35  ;;  %v3035_v1 = vld [vmem:[#allocation2 + $0x148] sm:$0xff]  ;;  %v3037_v20 = vld [vmem:[#allocation2 + $0x100] sm:$0xff] }
 0x363   : > { %3159 = vst [vmem:[%s4638_s17 + $0x80] sm:$0xff] %v3095_v54  ;;  %3160 = vst [vmem:[%s4638_s17 + $0x88] sm:$0xff] %v3096_v23  ;;  %v3111_v32 = vadd.f32 %v6071_v36, %v3035_v1  ;;  %v3112_v41 = vadd.f32 %v6075_v52, %v3036_v8  ;;  %v3113_v31 = vadd.f32 %v6071_v36, %v3037_v20  ;;  %v3038_v24 = vld [vmem:[#allocation2 + $0xc8] sm:$0xff]  ;;  %v3039_v38 = vld [vmem:[#allocation2 + $0x40] sm:$0xff] }
 0x364   : > { %3161 = vst [vmem:[%s4638_s17 + $0x90] sm:$0xff] %v3097_v57  ;;  %3162 = vst [vmem:[%s4638_s17 + $0x98] sm:$0xff] %v3098_v42  ;;  %v3040_v40 = vld [vmem:[#allocation2 + $0x1f8] sm:$0xff]  ;;  %v3114_v27 = vadd.f32 %v6075_v52, %v3038_v24  ;;  %v3115_v30 = vadd.f32 %v6071_v36, %v3039_v38  ;;  %v3041_v7 = vld [vmem:[#allocation2 + $0x20] sm:$0xff] }
 0x365   : > { %3163 = vst [vmem:[%s4638_s17 + $0xa0] sm:$0xff] %v3099_v11  ;;  %3164 = vst [vmem:[%s4638_s17 + $0xa8] sm:$0xff] %v3100_v18  ;;  %v3116_v25 = vadd.f32 %v6075_v52, %v3040_v40  ;;  %v3042_v12 = vld [vmem:[#allocation2 + $0x128] sm:$0xff]  ;;  %v3043_v0 = vld [vmem:[#allocation2 + $0x1a0] sm:$0xff]  ;;  %v3117_v17 = vadd.f32 %v6071_v36, %v3041_v7 }
 0x366   : > { %3165 = vst [vmem:[%s4638_s17 + $0xb0] sm:$0xff] %v3101_v3  ;;  %3166 = vst [vmem:[%s4638_s17 + $0xb8] sm:$0xff] %v3102_v19  ;;  %v3118_v63 = vadd.f32 %v6075_v52, %v3042_v12  ;;  %v3119_v33 = vadd.f32 %v6071_v36, %v3043_v0  ;;  %v3044_v43 = vld [vmem:[#allocation2 + $0x1f0] sm:$0xff]  ;;  %v3045_v49 = vld [vmem:[#allocation2 + $0xe8] sm:$0xff] }
 0x367   : > { %3167 = vst [vmem:[%s4638_s17 + $0xc0] sm:$0xff] %v3103_v39  ;;  %3168 = vst [vmem:[%s4638_s17 + $0xc8] sm:$0xff] %v3104_v16  ;;  %v3046_v46 = vld [vmem:[#allocation2 + $0x78] sm:$0xff]  ;;  %v3120_v44 = vadd.f32 %v6075_v52, %v3044_v43  ;;  %v3121_v47 = vadd.f32 %v6071_v36, %v3045_v49  ;;  %v3047_v56 = vld [vmem:[#allocation2 + $0x70] sm:$0xff] }
 0x368   : > { %3169 = vst [vmem:[%s4638_s17 + $0xd0] sm:$0xff] %v3105_v34  ;;  %3170 = vst [vmem:[%s4638_s17 + $0xd8] sm:$0xff] %v3106_v2  ;;  %v3122_v5 = vadd.f32 %v6075_v52, %v3046_v46  ;;  %v3048_v62 = vld [vmem:[#allocation2 + $0x90] sm:$0xff]  ;;  %v3049_v61 = vld [vmem:[#allocation2 + $0x1d8] sm:$0xff]  ;;  %v3123_v9 = vadd.f32 %v6071_v36, %v3047_v56 }
 0x369   : > { %3171 = vst [vmem:[%s4638_s17 + $0xe0] sm:$0xff] %v3107_v26  ;;  %3172 = vst [vmem:[%s4638_s17 + $0xe8] sm:$0xff] %v3108_v15  ;;  %v3124_v48 = vadd.f32 %v6075_v52, %v3048_v62  ;;  %v3125_v53 = vadd.f32 %v6071_v36, %v3049_v61  ;;  %v3050_v51 = vld [vmem:[#allocation2 + $0xd0] sm:$0xff]  ;;  %v3051_v22 = vld [vmem:[#allocation2 + $0xb8] sm:$0xff] }
 0x36a   : > { %3173 = vst [vmem:[%s4638_s17 + $0xf0] sm:$0xff] %v3109_v14  ;;  %3174 = vst [vmem:[%s4638_s17 + $0xf8] sm:$0xff] %v3110_v4  ;;  %v3052_v55 = vld [vmem:[#allocation2 + $0x88] sm:$0xff]  ;;  %v3126_v37 = vadd.f32 %v6075_v52, %v3050_v51  ;;  %v3127_v54 = vadd.f32 %v6071_v36, %v3051_v22  ;;  %v3055_v6 = vld [vmem:[#allocation2 + $0x170] sm:$0xff] }
 0x36b   : > { %3175 = vst [vmem:[%s4638_s17 + $0x100] sm:$0xff] %v3111_v32  ;;  %3176 = vst [vmem:[%s4638_s17 + $0x108] sm:$0xff] %v3112_v41  ;;  %v3128_v23 = vadd.f32 %v6075_v52, %v3052_v55  ;;  %v3053_v57 = vld [vmem:[#allocation2 + $0xa8] sm:$0xff]  ;;  %v3131_v11 = vadd.f32 %v6071_v36, %v3055_v6  ;;  %v3056_v18 = vld [vmem:[#allocation2 + $0x178] sm:$0xff] }
 0x36c   : > { %3177 = vst [vmem:[%s4638_s17 + $0x110] sm:$0xff] %v3113_v31  ;;  %3178 = vst [vmem:[%s4638_s17 + $0x118] sm:$0xff] %v3114_v27  ;;  %v3054_v42 = vld [vmem:[#allocation2 + $0x1c8] sm:$0xff]  ;;  %v3129_v45 = vadd.f32 %v6071_v36, %v3053_v57  ;;  %v3058_v29 = vld [vmem:[#allocation2 + $0x190] sm:$0xff]  ;;  %v3132_v21 = vadd.f32 %v6075_v52, %v3056_v18 }
 0x36d   : > { %3179 = vst [vmem:[%s4638_s17 + $0x120] sm:$0xff] %v3115_v30  ;;  %3180 = vst [vmem:[%s4638_s17 + $0x128] sm:$0xff] %v3116_v25  ;;  %v3130_v59 = vadd.f32 %v6075_v52, %v3054_v42  ;;  %v3057_v3 = vld [vmem:[#allocation2 + $0x68] sm:$0xff]  ;;  %v3134_v19 = vadd.f32 %v6075_v52, %v3058_v29  ;;  %v3059_v39 = vld [vmem:[#allocation2 + $0x198] sm:$0xff] }
 0x36e   : > { %3181 = vst [vmem:[%s4638_s17 + $0x130] sm:$0xff] %v3117_v17  ;;  %3182 = vst [vmem:[%s4638_s17 + $0x138] sm:$0xff] %v3118_v63  ;;  %v3133_v13 = vadd.f32 %v6071_v36, %v3057_v3  ;;  %v3060_v16 = vld [vmem:[#allocation2 + $0x38] sm:$0xff]  ;;  %v3061_v60 = vld [vmem:[#allocation2 + $0xc0] sm:$0xff]  ;;  %v3135_v28 = vadd.f32 %v6071_v36, %v3059_v39 }
 0x36f   : > { %3183 = vst [vmem:[%s4638_s17 + $0x140] sm:$0xff] %v3119_v33  ;;  %3184 = vst [vmem:[%s4638_s17 + $0x148] sm:$0xff] %v3120_v44  ;;  %v3136_v58 = vadd.f32 %v6075_v52, %v3060_v16  ;;  %v3137_v34 = vadd.f32 %v6071_v36, %v3061_v60  ;;  %v3062_v2 = vld [vmem:[#allocation2 + $0x1c0] sm:$0xff]  ;;  %v3063_v26 = vld [vmem:[#allocation2 + $0x158] sm:$0xff] }
 0x370   : > { %3185 = vst [vmem:[%s4638_s17 + $0x150] sm:$0xff] %v3121_v47  ;;  %3186 = vst [vmem:[%s4638_s17 + $0x158] sm:$0xff] %v3122_v5  ;;  %v3064_v50 = vld [vmem:[#allocation2 + $0x10] sm:$0xff]  ;;  %v3138_v10 = vadd.f32 %v6075_v52, %v3062_v2  ;;  %v3139_v35 = vadd.f32 %v6071_v36, %v3063_v26  ;;  %v3065_v14 = vld [vmem:[#allocation2 + $0x58] sm:$0xff] }
 0x371   : > { %3187 = vst [vmem:[%s4638_s17 + $0x160] sm:$0xff] %v3123_v9  ;;  %3188 = vst [vmem:[%s4638_s17 + $0x168] sm:$0xff] %v3124_v48  ;;  %v3140_v15 = vadd.f32 %v6075_v52, %v3064_v50  ;;  %v3066_v4 = vld [vmem:[#allocation2 + $0xa0] sm:$0xff]  ;;  %v3141_v1 = vadd.f32 %v6071_v36, %v3065_v14 }
 0x372   : > { %3189 = vst [vmem:[%s4638_s17 + $0x170] sm:$0xff] %v3125_v53  ;;  %3190 = vst [vmem:[%s4638_s17 + $0x178] sm:$0xff] %v3126_v37  ;;  %v3142_v8 = vadd.f32 %v6075_v52, %v3066_v4 }
 0x373   : > { %3191 = vst [vmem:[%s4638_s17 + $0x180] sm:$0xff] %v3127_v54  ;;  %3192 = vst [vmem:[%s4638_s17 + $0x188] sm:$0xff] %v3128_v23 }
 0x374   : > { %3193 = vst [vmem:[%s4638_s17 + $0x190] sm:$0xff] %v3129_v45  ;;  %3194 = vst [vmem:[%s4638_s17 + $0x198] sm:$0xff] %v3130_v59 }
 0x375   : > { %3195 = vst [vmem:[%s4638_s17 + $0x1a0] sm:$0xff] %v3131_v11  ;;  %3196 = vst [vmem:[%s4638_s17 + $0x1a8] sm:$0xff] %v3132_v21 }
 0x376   : > { %3197 = vst [vmem:[%s4638_s17 + $0x1b0] sm:$0xff] %v3133_v13  ;;  %3198 = vst [vmem:[%s4638_s17 + $0x1b8] sm:$0xff] %v3134_v19 }
 0x377   : > { %3199 = vst [vmem:[%s4638_s17 + $0x1c0] sm:$0xff] %v3135_v28  ;;  %3200 = vst [vmem:[%s4638_s17 + $0x1c8] sm:$0xff] %v3136_v58 }
 0x378   : > { %3201 = vst [vmem:[%s4638_s17 + $0x1d0] sm:$0xff] %v3137_v34  ;;  %3202 = vst [vmem:[%s4638_s17 + $0x1d8] sm:$0xff] %v3138_v10 }
 0x379   : > { %3203 = vst [vmem:[%s4638_s17 + $0x1e0] sm:$0xff] %v3139_v35  ;;  %3204 = vst [vmem:[%s4638_s17 + $0x1e8] sm:$0xff] %v3140_v15 }
 0x37a   : > { %3205 = vst [vmem:[%s4638_s17 + $0x1f0] sm:$0xff] %v3141_v1  ;;  %3206 = vst [vmem:[%s4638_s17 + $0x1f8] sm:$0xff] %v3142_v8 }
 0x37b PF: > { %s6357_s24 = sld [smem:[#allocation19_spill]]  ;;  %s3222_s15 = sshll.u32 %s4638_s17, 4  ;;  %s6212_s15 = int_to_ptr.vmem [resolvable:$true] %s3222_s15 }
 0x37c   : > { %s6358_s10 = sld [smem:[#allocation39_spill]]  ;;  %s3208_s8 = scalar_lea.sflag [#allocation5], %s4612_s6 }
 0x37d   : > { %s4225_s20 = scalar_lea.vmem %s6212_s15, 8192  ;;  %s4365_s27 = smov [#allocation11]  }
 0x37e   : > { %p4226_p1 = scmp.ne.s32.totalorder %s6212_s15, %s4225_s20  ;;  %s4229_s11 = sshll.u32 %s4365_s27, 4  ;;  %s4230_s11 = int_to_ptr.vmem [resolvable:$false] %s4229_s11 }
 0x37f   : > { %s4231_s14 = scalar_lea.vmem %s4230_s11, 16384  ;;  %p4232_p2 = scmp.lt.s32.totalorder %s6212_s15, %s4230_s11 }
 0x380   : > { %p4227_p0 = pnand %p4226_p1, %p4556_p13  ;;  %p4233_p3 = scmp.lt.s32.totalorder %s4231_s14, %s4225_s20 }
 0x381   : > { %s3539_s28 = sshll.u32 %s6357_s24, 13 }
 0x382   : > { %s6209_s0 = scalar_lea.hbm %s6358_s10, %s3539_s28  ;;  %p4228_p6 = pneg %p4227_p0 }
 0x383   : > { %p4234_p4 = por %p4233_p3, %p4232_p2 }
 0x385   : > { %p4235_p10 = pnand %p4234_p4, %p4228_p6 }
 0x387   : > { %4238 = shalt.err (!%p4235_p10)
}
 0x388   : > { %s4239_s16 = scalar_lea.hbm %s6209_s0, 8192  ;;  %s4243_s21 = scalar_lea.hbm %s6358_s10, 16384 }
 0x389   : > { %p4240_p11 = scmp.ne.s32.totalorder %s6209_s0, %s4239_s16  ;;  %p4244_p7 = scmp.lt.s32.totalorder %s6209_s0, %s6358_s10 }
 0x38a   : > { %p4245_p5 = scmp.lt.s32.totalorder %s4243_s21, %s4239_s16 }
 0x38b   : > { %p4241_p12 = pnand %p4240_p11, %p4556_p13 }
 0x38c   : > { %p4246_p8 = por %p4245_p5, %p4244_p7 }
 0x38d   : > { %p4242_p9 = pneg %p4241_p12 }
 0x38f   : > { %p4247_p1 = pnand %p4246_p8, %p4242_p9 }
 0x391   : > { %4250 = shalt.err (!%p4247_p1)
}
 0x392   : > { %s4366_s30 = smov 256   ;;  %s4367_s18 = smov 16  }
 0x393   : > { %3548 = dma.vmem_to_hbm [thread:$0]  (%p4556_p13), %s6212_s15, 8192, %s6209_s0, %s3208_s8, %s4366_s30, %s4366_s30, %s4367_s18  }
 0x394 PF: > { %s6359_s17 = sld [smem:[#allocation21_spill]] }
 0x395   : > { %s6360_s5 = sld [smem:[#allocation17_spill]] }
 0x396   : > { %s6361_s1 = sld [smem:[#allocation26_spill]] }
 0x39a   : > { %p3568_p0 = scmp.ge.s32.totalorder %s6359_s17, 2 }
 0x39b   : > { %s3237_s7 = sand.u32 1, %s6360_s5  }
 0x39c   : > { %p6362_p6 = scmp.ne.s32.totalorder %s6361_s1, 0  ;;  %s3238_s24 = scalar_lea.sflag [#allocation5], %s3237_s7 }
 0x39e   : > { %p3564_p2 = pnand %p3568_p0, %p6362_p6 }
 0x3a0   : > { %p3565_p3 = pneg %p3564_p2 }
 0x3a2   : > { %4308 = dma.done.wait (%p3565_p3), %s3238_s24, 8192  }
 0x3a3   : > { %4310 = vsyncadd (%p3565_p3), %s3238_s24, 4294959104  ;;  %s27_s28 = sadd.s32 1, %s6359_s17   ;;  %s6363_s12 = sld [smem:[#allocation16_spill]] }
 0x3a4   : > { %p24_p4 = scmp.ge.s32.totalorder %s27_s28, 6   ;;  %s6364_s20 = sld [smem:[#allocation24_spill]] }
 0x3a5   : > { %s6365_s29 = sld [smem:[#allocation18_spill]]  ;;  %s6370_s18 = smov %s4317_s19 }
 0x3a6   : > { %s6366_s23 = sld [smem:[#allocation25_spill]]  ;;  %s6372_s21 = smov %s4329_s22 }
 0x3a7   : > { %s6367_s25 = sld [smem:[#allocation20_spill]]  ;;  %s6374_s24 = smov %s4345_s26 }
 0x3a8   : > { %s6368_s6 = sld [smem:[#allocation22_spill]] }
 0x3a9   : > { %s6369_s27 = sld [smem:[#allocation23_spill]]  ;;  %s6371_s19 = smov %s6363_s12 }
 0x3aa   :  { %26 = sbr.rel (!%p24_p4) target bundleno = 18 (0x12), region = 130 }
 0x3ab   : > { %s6373_s22 = smov %s6365_s29 }
 0x3ae   : > { %s6375_s26 = smov %s6368_s6 }
 0x3af   :  { %3243 = vsyncpa [#allocation4], 1 }
 0x3b0   :  { %3245 = vsyncpa [#allocation4 + $0x1], 1 }
 0x3b1   :  { %3246 = vsyncpa [#allocation7], 1 }
 0x3b2   :  { %3248 = vsyncpa [#allocation7 + $0x1], 1 }
 0x3b3   :  { %3249 = vsyncpa [#allocation10], 1 }
 0x3b4   :  { %3251 = vsyncpa [#allocation10 + $0x1], 1 }
 0x3b5   :  { %3252 = vsyncpa [#allocation5], 1 }
 0x3b6   :  { %3254 = vsyncpa [#allocation5 + $0x1], 1 }

</bundles_post_ra>
